<compile_context>
chip_gen: v5e
topology: v5e:2x2
jax: 0.10.0
libtpu: 0.0.40
codegen_flags: <defaults>
</compile_context>

<pallas_src>
import functools
import math

import jax
import jax.numpy as jnp
from jax import lax
from jax.experimental import pallas as pl
from jax.experimental.pallas import tpu as pltpu

_LN_EPS = 1e-5
_NEG_INF = -1e9
# pl.reciprocal(approx=True) in the softmax denominator (EUP slot, ~1e-3 deviation).  Set False for
# strict parity tests against PyTorch.
_APPROX_RECIP = True


# ----------------------------- small helpers (trace-time) -----------------------------

def _pick_tile(dim, pref, unit):
    """Largest divisor of `dim` that is a multiple of `unit` and <= pref; full dim if none exists."""
    if dim <= pref:
        return dim
    t = (pref // unit) * unit
    while t >= unit:
        if dim % t == 0:
            return t
        t -= unit
    return dim  # rare fallback (dim has no unit-aligned divisor); full dim is always legal


@functools.lru_cache(maxsize=None)
def _vmem_limit_bytes():
    """Per-generation VMEM budget: 85% of physical, capped at 100 MiB (v5e/v6e=128MiB, v7x=64MiB)."""
    cap = 128 * 1024 * 1024
    try:
        cap = int(pltpu.get_tpu_info().vmem_capacity_bytes)
    except Exception:
        pass
    return int(min(cap * 0.85, 100 * 1024 * 1024))


def _dot_nk(x_bf16, w_nk_bf16):
    """x @ w.T with w kept in torch (N, K) layout; bf16 operands, f32 accumulation on the MXU."""
    return lax.dot_general(x_bf16, w_nk_bf16, (((1,), (1,)), ((), ())),
                           preferred_element_type=jnp.float32)


def _layer_norm(z, gamma, beta, eps):
    mean = jnp.mean(z, axis=-1, keepdims=True)
    var = jnp.mean((z - mean) ** 2, axis=-1, keepdims=True)
    return (z - mean) * lax.rsqrt(var + eps) * gamma + beta


def _softmax_lastdim(s):
    m = jnp.max(s, axis=-1, keepdims=True)
    p = jnp.exp(s - m)
    d = jnp.sum(p, axis=-1, keepdims=True)
    if _APPROX_RECIP:
        return p * pl.reciprocal(d, approx=True)
    return p / d


# ----------------------------- Pallas kernels -----------------------------

def _matmul_bias_kernel(x_ref, w_ref, b_ref, o_ref, acc_ref, *, w_is_nk):
    """Tiled y = x @ w(.T) + b with an f32 VMEM accumulator; bf16 MXU inputs."""
    @pl.when(pl.program_id(2) == 0)
    def _():
        acc_ref[...] = jnp.zeros_like(acc_ref)

    x = x_ref[...].astype(jnp.bfloat16)
    w = w_ref[...].astype(jnp.bfloat16)
    if w_is_nk:                       # torch Linear layout (N, K): contract dim 1 of both
        acc_ref[...] += _dot_nk(x, w)
    else:                             # pre-transposed (K, N): plain matmul, lane-dense output
        acc_ref[...] += jnp.dot(x, w, preferred_element_type=jnp.float32)

    @pl.when(pl.program_id(2) == pl.num_programs(2) - 1)
    def _():
        o_ref[...] = (acc_ref[...] + b_ref[...].astype(jnp.float32)).astype(o_ref.dtype)


def _attn_core_kernel(x_ref, q_ref, kv_ref, w_out_ref, b_out_ref, g_ref, beta_ref,
                      o_ref, *, nh, causal, eps):
    """Per (batch, query-tile) program: batched-head attention + out_proj + residual + LayerNorm."""
    x = x_ref[0].astype(jnp.float32)                     # (tq, H) residual stream, f32
    q = q_ref[0].astype(jnp.bfloat16)                    # (tq, H) bf16
    kv = kv_ref[0]                                       # (S, 2H) bf16
    tq, H = x.shape
    S = kv.shape[0]
    dh = H // nh
    scale = 1.0 / math.sqrt(dh)

    # Pack all heads into one batched dot_general (Mosaic pipelines heads through the MXU); one
    # lane-dense context write instead of per-head masked stores.
    qh = jnp.swapaxes(q.reshape(tq, nh, dh), 0, 1)                                   # (nh, tq, dh)
    kh = jnp.swapaxes(kv[:, :H].astype(jnp.bfloat16).reshape(S, nh, dh), 0, 1)       # (nh, S, dh)
    vh = jnp.swapaxes(kv[:, H:].astype(jnp.bfloat16).reshape(S, nh, dh), 0, 1)       # (nh, S, dh)

    s = lax.dot_general(qh, kh, (((2,), (2,)), ((0,), (0,))),
                        preferred_element_type=jnp.float32) * scale                  # (nh, tq, S) f32
    if causal:
        q0 = pl.program_id(1) * tq
        row = q0 + lax.broadcasted_iota(jnp.int32, (tq, S), 0)
        col = lax.broadcasted_iota(jnp.int32, (tq, S), 1)
        s = jnp.where((col > row)[None, :, :], _NEG_INF, s)    # built & applied once (f32)

    p = _softmax_lastdim(s)
    ctx = lax.dot_general(p.astype(jnp.bfloat16), vh, (((2,), (1,)), ((0,), (0,))),
                          preferred_element_type=jnp.float32)                        # (nh, tq, dh)
    attn = jnp.swapaxes(ctx, 0, 1).reshape(tq, H)                                    # lane-dense

    y = _dot_nk(attn.astype(jnp.bfloat16), w_out_ref[...].astype(jnp.bfloat16))
    y = y + b_out_ref[...].astype(jnp.float32)
    z = _layer_norm(x + y, g_ref[...].astype(jnp.float32), beta_ref[...].astype(jnp.float32), eps)
    o_ref[0] = z.astype(o_ref.dtype)


def _ffn_block_kernel(x_ref, w1_ref, b1_ref, w2_ref, b2_ref, g_ref, beta_ref,
                      o_ref, acc_ref, *, eps):
    """FFN tiled over F (reduction axis): relu(x@w1.T+b1)@w2.T accumulated in f32, LN epilogue."""
    f = pl.program_id(1)

    @pl.when(f == 0)
    def _():
        acc_ref[...] = jnp.zeros_like(acc_ref)

    xb = x_ref[...].astype(jnp.bfloat16)
    h = _dot_nk(xb, w1_ref[...].astype(jnp.bfloat16)) + b1_ref[...].astype(jnp.float32)
    h = jnp.maximum(h, 0.0)                                           # fused ReLU (exact under F-tiling)
    acc_ref[...] += _dot_nk(h.astype(jnp.bfloat16), w2_ref[...].astype(jnp.bfloat16))

    @pl.when(f == pl.num_programs(1) - 1)
    def _():
        x = x_ref[...].astype(jnp.float32)
        y = acc_ref[...] + b2_ref[...].astype(jnp.float32)
        z = _layer_norm(x + y, g_ref[...].astype(jnp.float32),
                        beta_ref[...].astype(jnp.float32), eps)
        o_ref[...] = z.astype(o_ref.dtype)


# ----------------------------- pallas_call wrappers -----------------------------

def matmul_bias(x2d, w, b, *, w_is_nk=True, out_dtype=None,
                tm_pref=512, tn_pref=1024, tk_pref=2048):
    M, K = x2d.shape
    N = w.shape[0] if w_is_nk else w.shape[1]
    out_dtype = x2d.dtype if out_dtype is None else out_dtype
    tm = _pick_tile(M, tm_pref, 8)
    tn = _pick_tile(N, tn_pref, 128)
    tk = _pick_tile(K, tk_pref, 128)
    if w_is_nk:
        w_spec = pl.BlockSpec((tn, tk), lambda i, j, k: (j, k))
    else:
        w_spec = pl.BlockSpec((tk, tn), lambda i, j, k: (k, j))
    return pl.pallas_call(
        functools.partial(_matmul_bias_kernel, w_is_nk=w_is_nk),
        grid=(M // tm, N // tn, K // tk),
        out_shape=jax.ShapeDtypeStruct((M, N), out_dtype),
        in_specs=[
            pl.BlockSpec((tm, tk), lambda i, j, k: (i, k)),
            w_spec,
            pl.BlockSpec((1, tn), lambda i, j, k: (0, j)),
        ],
        out_specs=pl.BlockSpec((tm, tn), lambda i, j, k: (i, j)),
        scratch_shapes=[pltpu.VMEM((tm, tn), jnp.float32)],
        compiler_params=pltpu.CompilerParams(
            dimension_semantics=("parallel", "parallel", "arbitrary"),
            vmem_limit_bytes=_vmem_limit_bytes()),
    )(x2d, w, b.reshape(1, -1))


def attn_block(x, q, kv, w_out, b_out, norm_w, norm_b, *, nh, causal, tq_pref=128):
    """Shared self/cross attention core: grid=(B, T//tq), per-tile causal mask, fused epilogue."""
    B, T, H = x.shape
    S = kv.shape[1]
    tq = _pick_tile(T, tq_pref, 8)
    return pl.pallas_call(
        functools.partial(_attn_core_kernel, nh=nh, causal=causal, eps=_LN_EPS),
        grid=(B, T // tq),
        out_shape=jax.ShapeDtypeStruct((B, T, H), x.dtype),
        in_specs=[
            pl.BlockSpec((1, tq, H), lambda b, i: (b, i, 0)),      # residual x tile (f32)
            pl.BlockSpec((1, tq, H), lambda b, i: (b, i, 0)),      # q tile (bf16)
            pl.BlockSpec((1, S, 2 * H), lambda b, i: (b, 0, 0)),   # full K|V (bf16), const over i
            pl.BlockSpec((H, H), lambda b, i: (0, 0)),             # out_proj weight (bf16)
            pl.BlockSpec((1, H), lambda b, i: (0, 0)),
            pl.BlockSpec((1, H), lambda b, i: (0, 0)),
            pl.BlockSpec((1, H), lambda b, i: (0, 0)),
        ],
        out_specs=pl.BlockSpec((1, tq, H), lambda b, i: (b, i, 0)),
        compiler_params=pltpu.CompilerParams(
            dimension_semantics=("parallel", "parallel"),
            vmem_limit_bytes=_vmem_limit_bytes()),
    )(x, q, kv, w_out, b_out.reshape(1, -1), norm_w.reshape(1, -1), norm_b.reshape(1, -1))


def ffn_block(x2d, w1, b1, w2, b2, norm_w, norm_b, *, tm_pref=256, tf_pref=512):
    M, H = x2d.shape
    F = w1.shape[0]
    tm = _pick_tile(M, tm_pref, 8)
    tf = _pick_tile(F, tf_pref, 128)
    return pl.pallas_call(
        functools.partial(_ffn_block_kernel, eps=_LN_EPS),
        grid=(M // tm, F // tf),
        out_shape=jax.ShapeDtypeStruct((M, H), x2d.dtype),
        in_specs=[
            pl.BlockSpec((tm, H), lambda i, f: (i, 0)),
            pl.BlockSpec((tf, H), lambda i, f: (f, 0)),            # lin1 weight F-tile
            pl.BlockSpec((1, tf), lambda i, f: (0, f)),
            pl.BlockSpec((H, tf), lambda i, f: (0, f)),            # lin2 weight F-tile
            pl.BlockSpec((1, H), lambda i, f: (0, 0)),
            pl.BlockSpec((1, H), lambda i, f: (0, 0)),
            pl.BlockSpec((1, H), lambda i, f: (0, 0)),
        ],
        out_specs=pl.BlockSpec((tm, H), lambda i, f: (i, 0)),
        scratch_shapes=[pltpu.VMEM((tm, H), jnp.float32)],
        compiler_params=pltpu.CompilerParams(
            dimension_semantics=("parallel", "arbitrary"),
            vmem_limit_bytes=_vmem_limit_bytes()),
    )(x2d, w1, b1.reshape(1, -1), w2, b2.reshape(1, -1),
      norm_w.reshape(1, -1), norm_b.reshape(1, -1))


# ----------------------------- model forward (thin JAX glue) -----------------------------

def caption_decoder_forward(params, encoder_output, captions, *, num_heads):
    B, T = captions.shape
    H = params["embedding"].shape[1]
    S = encoder_output.shape[1]
    # TODO(synk): embedding gather + positional add stay in XLA glue (data-dependent gather).
    x = jnp.take(params["embedding"], captions, axis=0) * jnp.sqrt(jnp.float32(H))
    x = x + params["pos_enc"][:, :T]
    mem2d = encoder_output.reshape(B * S, H)

    for lp in params["layers"]:
        # ---- self-attention: q / kv projections as batched tiled matmuls, then attention core
        sa = lp["self_attn"]
        x2d = x.reshape(B * T, H)
        q = matmul_bias(x2d, sa["wq"], sa["bq"], out_dtype=jnp.bfloat16).reshape(B, T, H)
        kv = matmul_bias(x2d, sa["wkv"], sa["bkv"], out_dtype=jnp.bfloat16).reshape(B, T, 2 * H)
        x = attn_block(x, q, kv, sa["wo"], sa["bo"], lp["norm1_w"], lp["norm1_b"],
                       nh=num_heads, causal=True)

        # ---- cross-attention: K/V projection of encoder memory is one matmul over B*S rows
        ca = lp["cross_attn"]
        x2d = x.reshape(B * T, H)
        q = matmul_bias(x2d, ca["wq"], ca["bq"], out_dtype=jnp.bfloat16).reshape(B, T, H)
        kv = matmul_bias(mem2d, ca["wkv"], ca["bkv"], out_dtype=jnp.bfloat16).reshape(B, S, 2 * H)
        x = attn_block(x, q, kv, ca["wo"], ca["bo"], lp["norm2_w"], lp["norm2_b"],
                       nh=num_heads, causal=False)   # memory mask is a no-op -> dropped

        # ---- feed-forward (F-tiled reduction)
        x = ffn_block(x.reshape(B * T, H), lp["lin1_w"], lp["lin1_b"],
                      lp["lin2_w"], lp["lin2_b"],
                      lp["norm3_w"], lp["norm3_b"]).reshape(B, T, H)

    V = params["fc_wT"].shape[1]
    logits = matmul_bias(x.reshape(B * T, H), params["fc_wT"], params["fc_b"],
                         w_is_nk=False, out_dtype=jnp.float32,
                         tm_pref=512, tn_pref=1024, tk_pref=4096)
    return logits.reshape(B, T, V)


# ----------------------------- deterministic param init -----------------------------

def init_params(key, hidden, num_heads, num_layers, vocab, max_len, ffn=2048):
    wdt = jnp.bfloat16   # matmul weights live in bf16 (MXU-native; halves HBM/VMEM traffic)

    def nrm(k, shape, scale=0.02):
        return (scale * jax.random.normal(k, shape, jnp.float32)).astype(wdt)

    keys = iter(jax.random.split(key, 4 + num_layers * 8))
    fc_w = nrm(next(keys), (vocab, hidden))                 # torch (V, H) layout ...
    params = {
        "embedding": jax.random.normal(next(keys), (vocab, hidden), jnp.float32),
        "pos_enc": jnp.zeros((1, max_len, hidden), jnp.float32),   # module init: zeros
        "fc_wT": jnp.transpose(fc_w),                       # ... one-time relayout to (H, V)
        "fc_b": jnp.zeros((vocab,), jnp.float32),
        "layers": [],
    }

    def attn_params():
        # torch MultiheadAttention in_proj (3H,H) pre-split once into q (H,H) and kv (2H,H)
        return {
            "wq": nrm(next(keys), (hidden, hidden)),
            "bq": jnp.zeros((hidden,), jnp.float32),
            "wkv": nrm(next(keys), (2 * hidden, hidden)),
            "bkv": jnp.zeros((2 * hidden,), jnp.float32),
            "wo": nrm(next(keys), (hidden, hidden)),
            "bo": jnp.zeros((hidden,), jnp.float32),
        }

    for _ in range(num_layers):
        lp = {
            "self_attn": attn_params(),
            "cross_attn": attn_params(),
            "lin1_w": nrm(next(keys), (ffn, hidden)),
            "lin1_b": jnp.zeros((ffn,), jnp.float32),
            "lin2_w": nrm(next(keys), (hidden, ffn)),
            "lin2_b": jnp.zeros((hidden,), jnp.float32),
            "norm1_w": jnp.ones((hidden,), jnp.float32),
            "norm1_b": jnp.zeros((hidden,), jnp.float32),
            "norm2_w": jnp.ones((hidden,), jnp.float32),
            "norm2_b": jnp.zeros((hidden,), jnp.float32),
            "norm3_w": jnp.ones((hidden,), jnp.float32),
            "norm3_b": jnp.zeros((hidden,), jnp.float32),
        }
        params["layers"].append(lp)
    return params


if __name__ == "__main__":
    B, T, S = 2, 8, 10            # batch, caption length, encoder sequence length
    HIDDEN, HEADS, LAYERS = 32, 4, 2
    VOCAB, MAX_LEN = 50, 16

    key = jax.random.PRNGKey(0)
    k_par, k_enc, k_cap = jax.random.split(key, 3)
    params = init_params(k_par, HIDDEN, HEADS, LAYERS, VOCAB, MAX_LEN)
    encoder_output = jax.random.normal(k_enc, (B, S, HIDDEN), jnp.float32)
    captions = jax.random.randint(k_cap, (B, T), 0, VOCAB)

    fwd = jax.jit(functools.partial(caption_decoder_forward, num_heads=HEADS))
    out = fwd(params, encoder_output, captions)
    jax.block_until_ready(out)
    assert out.shape == (B, T, VOCAB) and out.dtype == jnp.float32
    print("KERNEL_OK")
</pallas_src>

<mosaic_0001>
module attributes {stable_mosaic.version = 11 : i64} {
  func.func @_matmul_bias_kernel(%arg0: i32, %arg1: i32, %arg2: i32, %arg3: memref<16x32xf32, #tpu.memory_space<vmem>>, %arg4: memref<32x32xbf16, #tpu.memory_space<vmem>>, %arg5: memref<1x32xf32, #tpu.memory_space<vmem>>, %arg6: memref<16x32xbf16, #tpu.memory_space<vmem>>, %arg7: memref<16x32xf32, #tpu.memory_space<vmem>>) attributes {dimension_semantics = [#tpu.dimension_semantics<parallel>, #tpu.dimension_semantics<parallel>, #tpu.dimension_semantics<arbitrary>], iteration_bounds = array<i64: 1, 1, 1>, scalar_prefetch = 0 : i64, scratch_operands = 1 : i64, tpu.core_type = #tpu.core_type<tc>, window_params = [{transform_indices = @transform_0, window_bounds = array<i64: 16, 32>}, {transform_indices = @transform_1, window_bounds = array<i64: 32, 32>}, {transform_indices = @transform_2, window_bounds = array<i64: 1, 32>}, {transform_indices = @transform_3, window_bounds = array<i64: 16, 32>}]} {
    %c0_i32 = arith.constant 0 : i32
    %0 = arith.cmpi eq, %arg2, %c0_i32 : i32
    %1 = arith.extui %0 : i1 to i32
    %c0_i32_0 = arith.constant 0 : i32
    %2 = arith.cmpi ne, %1, %c0_i32_0 : i32
    scf.if %2 {
      %cst_10 = arith.constant 0.000000e+00 : f32
      %13 = vector.broadcast %cst_10 : f32 to vector<16x32xf32>
      %c0_11 = arith.constant 0 : index
      %c0_12 = arith.constant 0 : index
      %14 = vector.load %arg7[%c0_11, %c0_12] : memref<16x32xf32, #tpu.memory_space<vmem>>, vector<16x32xf32>
      tpu.vector_store %arg7[%c0_11, %c0_12], %13 {strides = array<i32>} : memref<16x32xf32, #tpu.memory_space<vmem>>, vector<16x32xf32>,
    } else {
    }
    %c0 = arith.constant 0 : index
    %c0_1 = arith.constant 0 : index
    %3 = vector.load %arg3[%c0, %c0_1] : memref<16x32xf32, #tpu.memory_space<vmem>>, vector<16x32xf32>
    %4 = arith.truncf %3 : vector<16x32xf32> to vector<16x32xbf16>
    %c0_2 = arith.constant 0 : index
    %c0_3 = arith.constant 0 : index
    %5 = vector.load %arg4[%c0_2, %c0_3] : memref<32x32xbf16, #tpu.memory_space<vmem>>, vector<32x32xbf16>
    %c0_4 = arith.constant 0 : index
    %c0_5 = arith.constant 0 : index
    %6 = vector.load %arg7[%c0_4, %c0_5] : memref<16x32xf32, #tpu.memory_space<vmem>>, vector<16x32xf32>
    %cst = arith.constant dense<0.000000e+00> : vector<16x32xf32>
    %7 = tpu.matmul %4, %5, %cst {dimension_numbers = #tpu.dot_dimension_numbers<[1], [1], [0], [0], [0, 0, 1, 0], [], []>} : vector<16x32xbf16>, vector<32x32xbf16>, vector<16x32xf32> -> vector<16x32xf32>
    %8 = arith.addf %6, %7 : vector<16x32xf32>
    %c0_6 = arith.constant 0 : index
    %c0_7 = arith.constant 0 : index
    %9 = vector.load %arg7[%c0_6, %c0_7] : memref<16x32xf32, #tpu.memory_space<vmem>>, vector<16x32xf32>
    tpu.vector_store %arg7[%c0_6, %c0_7], %8 {strides = array<i32>} : memref<16x32xf32, #tpu.memory_space<vmem>>, vector<16x32xf32>,
    %c0_i32_8 = arith.constant 0 : i32
    %10 = arith.cmpi eq, %arg2, %c0_i32_8 : i32
    %11 = arith.extui %10 : i1 to i32
    %c0_i32_9 = arith.constant 0 : i32
    %12 = arith.cmpi ne, %11, %c0_i32_9 : i32
    scf.if %12 {
      %c0_10 = arith.constant 0 : index
      %c0_11 = arith.constant 0 : index
      %13 = vector.load %arg7[%c0_10, %c0_11] : memref<16x32xf32, #tpu.memory_space<vmem>>, vector<16x32xf32>
      %c0_12 = arith.constant 0 : index
      %c0_13 = arith.constant 0 : index
      %14 = vector.load %arg5[%c0_12, %c0_13] : memref<1x32xf32, #tpu.memory_space<vmem>>, vector<1x32xf32>
      %15 = vector.broadcast %14 : vector<1x32xf32> to vector<16x32xf32>
      %16 = arith.addf %13, %15 : vector<16x32xf32>
      %17 = arith.truncf %16 : vector<16x32xf32> to vector<16x32xbf16>
      %c0_14 = arith.constant 0 : index
      %c0_15 = arith.constant 0 : index
      %18 = vector.load %arg6[%c0_14, %c0_15] : memref<16x32xbf16, #tpu.memory_space<vmem>>, vector<16x32xbf16>
      tpu.vector_store %arg6[%c0_14, %c0_15], %17 {strides = array<i32>} : memref<16x32xbf16, #tpu.memory_space<vmem>>, vector<16x32xbf16>,
    } else {
    }
    return
  }
  func.func @transform_0(%arg0: i32, %arg1: i32, %arg2: i32) -> (i32, i32) {
    %c0_i32 = arith.constant 0 : i32
    return %arg0, %arg2 : i32, i32
  }
  func.func @transform_1(%arg0: i32, %arg1: i32, %arg2: i32) -> (i32, i32) {
    %c0_i32 = arith.constant 0 : i32
    return %arg1, %arg2 : i32, i32
  }
  func.func @transform_2(%arg0: i32, %arg1: i32, %arg2: i32) -> (i32, i32) {
    %c0_i32 = arith.constant 0 : i32
    %c0_i32_0 = arith.constant 0 : i32
    return %c0_i32, %arg1 : i32, i32
  }
  func.func @transform_3(%arg0: i32, %arg1: i32, %arg2: i32) -> (i32, i32) {
    %c0_i32 = arith.constant 0 : i32
    return %arg0, %arg1 : i32, i32
  }
}

module attributes {stable_mosaic.version = 11 : i64} {
  func.func @_matmul_bias_kernel(%arg0: i32, %arg1: i32, %arg2: i32, %arg3: memref<16x32xf32, #tpu.memory_space<vmem>>, %arg4: memref<64x32xbf16, #tpu.memory_space<vmem>>, %arg5: memref<1x64xf32, #tpu.memory_space<vmem>>, %arg6: memref<16x64xbf16, #tpu.memory_space<vmem>>, %arg7: memref<16x64xf32, #tpu.memory_space<vmem>>) attributes {dimension_semantics = [#tpu.dimension_semantics<parallel>, #tpu.dimension_semantics<parallel>, #tpu.dimension_semantics<arbitrary>], iteration_bounds = array<i64: 1, 1, 1>, scalar_prefetch = 0 : i64, scratch_operands = 1 : i64, tpu.core_type = #tpu.core_type<tc>, window_params = [{transform_indices = @transform_0, window_bounds = array<i64: 16, 32>}, {transform_indices = @transform_1, window_bounds = array<i64: 64, 32>}, {transform_indices = @transform_2, window_bounds = array<i64: 1, 64>}, {transform_indices = @transform_3, window_bounds = array<i64: 16, 64>}]} {
    %c0_i32 = arith.constant 0 : i32
    %0 = arith.cmpi eq, %arg2, %c0_i32 : i32
    %1 = arith.extui %0 : i1 to i32
    %c0_i32_0 = arith.constant 0 : i32
    %2 = arith.cmpi ne, %1, %c0_i32_0 : i32
    scf.if %2 {
      %cst_10 = arith.constant 0.000000e+00 : f32
      %13 = vector.broadcast %cst_10 : f32 to vector<16x64xf32>
      %c0_11 = arith.constant 0 : index
      %c0_12 = arith.constant 0 : index
      %14 = vector.load %arg7[%c0_11, %c0_12] : memref<16x64xf32, #tpu.memory_space<vmem>>, vector<16x64xf32>
      tpu.vector_store %arg7[%c0_11, %c0_12], %13 {strides = array<i32>} : memref<16x64xf32, #tpu.memory_space<vmem>>, vector<16x64xf32>,
    } else {
    }
    %c0 = arith.constant 0 : index
    %c0_1 = arith.constant 0 : index
    %3 = vector.load %arg3[%c0, %c0_1] : memref<16x32xf32, #tpu.memory_space<vmem>>, vector<16x32xf32>
    %4 = arith.truncf %3 : vector<16x32xf32> to vector<16x32xbf16>
    %c0_2 = arith.constant 0 : index
    %c0_3 = arith.constant 0 : index
    %5 = vector.load %arg4[%c0_2, %c0_3] : memref<64x32xbf16, #tpu.memory_space<vmem>>, vector<64x32xbf16>
    %c0_4 = arith.constant 0 : index
    %c0_5 = arith.constant 0 : index
    %6 = vector.load %arg7[%c0_4, %c0_5] : memref<16x64xf32, #tpu.memory_space<vmem>>, vector<16x64xf32>
    %cst = arith.constant dense<0.000000e+00> : vector<16x64xf32>
    %7 = tpu.matmul %4, %5, %cst {dimension_numbers = #tpu.dot_dimension_numbers<[1], [1], [0], [0], [0, 0, 1, 0], [], []>} : vector<16x32xbf16>, vector<64x32xbf16>, vector<16x64xf32> -> vector<16x64xf32>
    %8 = arith.addf %6, %7 : vector<16x64xf32>
    %c0_6 = arith.constant 0 : index
    %c0_7 = arith.constant 0 : index
    %9 = vector.load %arg7[%c0_6, %c0_7] : memref<16x64xf32, #tpu.memory_space<vmem>>, vector<16x64xf32>
    tpu.vector_store %arg7[%c0_6, %c0_7], %8 {strides = array<i32>} : memref<16x64xf32, #tpu.memory_space<vmem>>, vector<16x64xf32>,
    %c0_i32_8 = arith.constant 0 : i32
    %10 = arith.cmpi eq, %arg2, %c0_i32_8 : i32
    %11 = arith.extui %10 : i1 to i32
    %c0_i32_9 = arith.constant 0 : i32
    %12 = arith.cmpi ne, %11, %c0_i32_9 : i32
    scf.if %12 {
      %c0_10 = arith.constant 0 : index
      %c0_11 = arith.constant 0 : index
      %13 = vector.load %arg7[%c0_10, %c0_11] : memref<16x64xf32, #tpu.memory_space<vmem>>, vector<16x64xf32>
      %c0_12 = arith.constant 0 : index
      %c0_13 = arith.constant 0 : index
      %14 = vector.load %arg5[%c0_12, %c0_13] : memref<1x64xf32, #tpu.memory_space<vmem>>, vector<1x64xf32>
      %15 = vector.broadcast %14 : vector<1x64xf32> to vector<16x64xf32>
      %16 = arith.addf %13, %15 : vector<16x64xf32>
      %17 = arith.truncf %16 : vector<16x64xf32> to vector<16x64xbf16>
      %c0_14 = arith.constant 0 : index
      %c0_15 = arith.constant 0 : index
      %18 = vector.load %arg6[%c0_14, %c0_15] : memref<16x64xbf16, #tpu.memory_space<vmem>>, vector<16x64xbf16>
      tpu.vector_store %arg6[%c0_14, %c0_15], %17 {strides = array<i32>} : memref<16x64xbf16, #tpu.memory_space<vmem>>, vector<16x64xbf16>,
    } else {
    }
    return
  }
  func.func @transform_0(%arg0: i32, %arg1: i32, %arg2: i32) -> (i32, i32) {
    %c0_i32 = arith.constant 0 : i32
    return %arg0, %arg2 : i32, i32
  }
  func.func @transform_1(%arg0: i32, %arg1: i32, %arg2: i32) -> (i32, i32) {
    %c0_i32 = arith.constant 0 : i32
    return %arg1, %arg2 : i32, i32
  }
  func.func @transform_2(%arg0: i32, %arg1: i32, %arg2: i32) -> (i32, i32) {
    %c0_i32 = arith.constant 0 : i32
    %c0_i32_0 = arith.constant 0 : i32
    return %c0_i32, %arg1 : i32, i32
  }
  func.func @transform_3(%arg0: i32, %arg1: i32, %arg2: i32) -> (i32, i32) {
    %c0_i32 = arith.constant 0 : i32
    return %arg0, %arg1 : i32, i32
  }
}

module attributes {stable_mosaic.version = 11 : i64} {
  func.func @_attn_core_kernel(%arg0: i32, %arg1: i32, %arg2: memref<1x8x32xf32, #tpu.memory_space<vmem>>, %arg3: memref<1x8x32xbf16, #tpu.memory_space<vmem>>, %arg4: memref<1x8x64xbf16, #tpu.memory_space<vmem>>, %arg5: memref<32x32xbf16, #tpu.memory_space<vmem>>, %arg6: memref<1x32xf32, #tpu.memory_space<vmem>>, %arg7: memref<1x32xf32, #tpu.memory_space<vmem>>, %arg8: memref<1x32xf32, #tpu.memory_space<vmem>>, %arg9: memref<1x8x32xf32, #tpu.memory_space<vmem>>) attributes {dimension_semantics = [#tpu.dimension_semantics<parallel>, #tpu.dimension_semantics<parallel>], iteration_bounds = array<i64: 2, 1>, scalar_prefetch = 0 : i64, scratch_operands = 0 : i64, tpu.core_type = #tpu.core_type<tc>, window_params = [{transform_indices = @transform_0, window_bounds = array<i64: 1, 8, 32>}, {transform_indices = @transform_1, window_bounds = array<i64: 1, 8, 32>}, {transform_indices = @transform_2, window_bounds = array<i64: 1, 8, 64>}, {pipeline_mode = #tpu.pipeline_mode<synchronous>, transform_indices = @transform_3, window_bounds = array<i64: 32, 32>}, {pipeline_mode = #tpu.pipeline_mode<synchronous>, transform_indices = @transform_4, window_bounds = array<i64: 1, 32>}, {pipeline_mode = #tpu.pipeline_mode<synchronous>, transform_indices = @transform_5, window_bounds = array<i64: 1, 32>}, {pipeline_mode = #tpu.pipeline_mode<synchronous>, transform_indices = @transform_6, window_bounds = array<i64: 1, 32>}, {transform_indices = @transform_7, window_bounds = array<i64: 1, 8, 32>}]} {
    %c0 = arith.constant 0 : index
    %c0_0 = arith.constant 0 : index
    %c0_1 = arith.constant 0 : index
    %0 = vector.load %arg2[%c0, %c0_0, %c0_1] : memref<1x8x32xf32, #tpu.memory_space<vmem>>, vector<1x8x32xf32>
    %1 = vector.shape_cast %0 : vector<1x8x32xf32> to vector<8x32xf32>
    %c0_2 = arith.constant 0 : index
    %c0_3 = arith.constant 0 : index
    %c0_4 = arith.constant 0 : index
    %2 = vector.load %arg3[%c0_2, %c0_3, %c0_4] : memref<1x8x32xbf16, #tpu.memory_space<vmem>>, vector<1x8x32xbf16>
    %3 = vector.shape_cast %2 : vector<1x8x32xbf16> to vector<8x32xbf16>
    %c0_5 = arith.constant 0 : index
    %c0_6 = arith.constant 0 : index
    %c0_7 = arith.constant 0 : index
    %4 = vector.load %arg4[%c0_5, %c0_6, %c0_7] : memref<1x8x64xbf16, #tpu.memory_space<vmem>>, vector<1x8x64xbf16>
    %5 = vector.shape_cast %4 : vector<1x8x64xbf16> to vector<8x64xbf16>
    %6 = vector.shape_cast %3 : vector<8x32xbf16> to vector<8x4x8xbf16>
    %7 = tpu.transpose %6, [1, 0, 2] : vector<8x4x8xbf16> -> vector<4x8x8xbf16>
    %8 = vector.extract_strided_slice %5 {offsets = [0, 0], sizes = [8, 32], strides = [1, 1]} : vector<8x64xbf16> to vector<8x32xbf16>
    %9 = vector.shape_cast %8 : vector<8x32xbf16> to vector<8x4x8xbf16>
    %10 = tpu.transpose %9, [1, 0, 2] : vector<8x4x8xbf16> -> vector<4x8x8xbf16>
    %11 = vector.extract_strided_slice %5 {offsets = [0, 32], sizes = [8, 32], strides = [1, 1]} : vector<8x64xbf16> to vector<8x32xbf16>
    %12 = vector.shape_cast %11 : vector<8x32xbf16> to vector<8x4x8xbf16>
    %13 = tpu.transpose %12, [1, 0, 2] : vector<8x4x8xbf16> -> vector<4x8x8xbf16>
    %cst = arith.constant dense<0.000000e+00> : vector<4x8x8xf32>
    %14 = tpu.matmul %7, %10, %cst {dimension_numbers = #tpu.dot_dimension_numbers<[2], [2], [1], [1], [0, 0, 0, 1, 1, 1], [0], [0]>} : vector<4x8x8xbf16>, vector<4x8x8xbf16>, vector<4x8x8xf32> -> vector<4x8x8xf32>
    %cst_8 = arith.constant 0.353553385 : f32
    %15 = vector.broadcast %cst_8 : f32 to vector<4x8x8xf32>
    %16 = arith.mulf %14, %15 : vector<4x8x8xf32>
    %c8_i32 = arith.constant 8 : i32
    %17 = arith.muli %arg1, %c8_i32 : i32
    %18 = tpu.iota {dimensions = array<i32: 0>} : vector<8x8xi32>
    %19 = vector.broadcast %17 : i32 to vector<8x8xi32>
    %20 = arith.addi %19, %18 : vector<8x8xi32>
    %21 = tpu.iota {dimensions = array<i32: 1>} : vector<8x8xi32>
    %22 = arith.cmpi sgt, %21, %20 : vector<8x8xi32>
    %23 = vector.shape_cast %22 : vector<8x8xi1> to vector<1x8x8xi1>
    %cst_9 = arith.constant -1.000000e+09 : f32
    %24 = vector.shape_cast %23 : vector<1x8x8xi1> to vector<1x8x8xi1>
    %25 = vector.broadcast %24 : vector<1x8x8xi1> to vector<4x8x8xi1>
    %26 = vector.broadcast %cst_9 : f32 to vector<4x8x8xf32>
    %27 = arith.select %25, %26, %16 : vector<4x8x8xi1>, vector<4x8x8xf32>
    %cst_10 = arith.constant dense<0xFF800000> : vector<4x8xf32>
    %28 = vector.multi_reduction <maximumf>, %27, %cst_10 [2] : vector<4x8x8xf32> to vector<4x8xf32>
    %29 = vector.shape_cast %28 : vector<4x8xf32> to vector<4x8x1xf32>
    %30 = vector.broadcast %29 : vector<4x8x1xf32> to vector<4x8x8xf32>
    %31 = arith.subf %27, %30 : vector<4x8x8xf32>
    %32 = math.exp %31 : vector<4x8x8xf32>
    %cst_11 = arith.constant dense<0.000000e+00> : vector<4x8xf32>
    %33 = vector.multi_reduction <add>, %32, %cst_11 [2] : vector<4x8x8xf32> to vector<4x8xf32>
    %34 = vector.shape_cast %33 : vector<4x8xf32> to vector<4x8x1xf32>
    %35 = tpu.reciprocal %34 {approx = true} : vector<4x8x1xf32> -> vector<4x8x1xf32>
    %36 = vector.broadcast %35 : vector<4x8x1xf32> to vector<4x8x8xf32>
    %37 = arith.mulf %32, %36 : vector<4x8x8xf32>
    %38 = arith.truncf %37 : vector<4x8x8xf32> to vector<4x8x8xbf16>
    %cst_12 = arith.constant dense<0.000000e+00> : vector<4x8x8xf32>
    %39 = tpu.matmul %38, %13, %cst_12 {dimension_numbers = #tpu.dot_dimension_numbers<[2], [1], [1], [2], [0, 0, 0, 1, 1, 2], [0], [0]>} : vector<4x8x8xbf16>, vector<4x8x8xbf16>, vector<4x8x8xf32> -> vector<4x8x8xf32>
    %40 = tpu.transpose %39, [1, 0, 2] : vector<4x8x8xf32> -> vector<8x4x8xf32>
    %41 = vector.shape_cast %40 : vector<8x4x8xf32> to vector<8x32xf32>
    %42 = arith.truncf %41 : vector<8x32xf32> to vector<8x32xbf16>
    %c0_13 = arith.constant 0 : index
    %c0_14 = arith.constant 0 : index
    %43 = vector.load %arg5[%c0_13, %c0_14] : memref<32x32xbf16, #tpu.memory_space<vmem>>, vector<32x32xbf16>
    %cst_15 = arith.constant dense<0.000000e+00> : vector<8x32xf32>
    %44 = tpu.matmul %42, %43, %cst_15 {dimension_numbers = #tpu.dot_dimension_numbers<[1], [1], [0], [0], [0, 0, 1, 0], [], []>} : vector<8x32xbf16>, vector<32x32xbf16>, vector<8x32xf32> -> vector<8x32xf32>
    %c0_16 = arith.constant 0 : index
    %c0_17 = arith.constant 0 : index
    %45 = vector.load %arg6[%c0_16, %c0_17] : memref<1x32xf32, #tpu.memory_space<vmem>>, vector<1x32xf32>
    %46 = vector.broadcast %45 : vector<1x32xf32> to vector<8x32xf32>
    %47 = arith.addf %44, %46 : vector<8x32xf32>
    %48 = arith.addf %1, %47 : vector<8x32xf32>
    %c0_18 = arith.constant 0 : index
    %c0_19 = arith.constant 0 : index
    %49 = vector.load %arg7[%c0_18, %c0_19] : memref<1x32xf32, #tpu.memory_space<vmem>>, vector<1x32xf32>
    %c0_20 = arith.constant 0 : index
    %c0_21 = arith.constant 0 : index
    %50 = vector.load %arg8[%c0_20, %c0_21] : memref<1x32xf32, #tpu.memory_space<vmem>>, vector<1x32xf32>
    %cst_22 = arith.constant dense<0.000000e+00> : vector<8xf32>
    %51 = vector.multi_reduction <add>, %48, %cst_22 [1] : vector<8x32xf32> to vector<8xf32>
    %52 = vector.shape_cast %51 : vector<8xf32> to vector<8x1xf32>
    %cst_23 = arith.constant 3.200000e+01 : f32
    %53 = vector.broadcast %cst_23 : f32 to vector<8x1xf32>
    %54 = arith.divf %52, %53 : vector<8x1xf32>
    %55 = vector.broadcast %54 : vector<8x1xf32> to vector<8x32xf32>
    %56 = arith.subf %48, %55 : vector<8x32xf32>
    %57 = arith.mulf %56, %56 : vector<8x32xf32>
    %cst_24 = arith.constant dense<0.000000e+00> : vector<8xf32>
    %58 = vector.multi_reduction <add>, %57, %cst_24 [1] : vector<8x32xf32> to vector<8xf32>
    %59 = vector.shape_cast %58 : vector<8xf32> to vector<8x1xf32>
    %cst_25 = arith.constant 3.200000e+01 : f32
    %60 = vector.broadcast %cst_25 : f32 to vector<8x1xf32>
    %61 = arith.divf %59, %60 : vector<8x1xf32>
    %62 = vector.broadcast %54 : vector<8x1xf32> to vector<8x32xf32>
    %63 = arith.subf %48, %62 : vector<8x32xf32>
    %cst_26 = arith.constant 9.99999974E-6 : f32
    %64 = vector.broadcast %cst_26 : f32 to vector<8x1xf32>
    %65 = arith.addf %61, %64 : vector<8x1xf32>
    %66 = math.rsqrt %65 : vector<8x1xf32>
    %67 = vector.broadcast %66 : vector<8x1xf32> to vector<8x32xf32>
    %68 = arith.mulf %63, %67 : vector<8x32xf32>
    %69 = vector.broadcast %49 : vector<1x32xf32> to vector<8x32xf32>
    %70 = arith.mulf %68, %69 : vector<8x32xf32>
    %71 = vector.broadcast %50 : vector<1x32xf32> to vector<8x32xf32>
    %72 = arith.addf %70, %71 : vector<8x32xf32>
    %c0_27 = arith.constant 0 : index
    %c0_28 = arith.constant 0 : index
    %c0_29 = arith.constant 0 : index
    %73 = vector.load %arg9[%c0_27, %c0_28, %c0_29] : memref<1x8x32xf32, #tpu.memory_space<vmem>>, vector<1x8x32xf32>
    %74 = vector.shape_cast %73 : vector<1x8x32xf32> to vector<8x32xf32>
    %75 = vector.shape_cast %72 : vector<8x32xf32> to vector<1x8x32xf32>
    tpu.vector_store %arg9[%c0_27, %c0_28, %c0_29], %75 {strides = array<i32>} : memref<1x8x32xf32, #tpu.memory_space<vmem>>, vector<1x8x32xf32>,
    return
  }
  func.func @transform_0(%arg0: i32, %arg1: i32) -> (i32, i32, i32) {
    %c0_i32 = arith.constant 0 : i32
    %c0_i32_0 = arith.constant 0 : i32
    return %arg0, %arg1, %c0_i32 : i32, i32, i32
  }
  func.func @transform_1(%arg0: i32, %arg1: i32) -> (i32, i32, i32) {
    %c0_i32 = arith.constant 0 : i32
    %c0_i32_0 = arith.constant 0 : i32
    return %arg0, %arg1, %c0_i32 : i32, i32, i32
  }
  func.func @transform_2(%arg0: i32, %arg1: i32) -> (i32, i32, i32) {
    %c0_i32 = arith.constant 0 : i32
    %c0_i32_0 = arith.constant 0 : i32
    %c0_i32_1 = arith.constant 0 : i32
    return %arg0, %c0_i32, %c0_i32_0 : i32, i32, i32
  }
  func.func @transform_3(%arg0: i32, %arg1: i32) -> (i32, i32) {
    %c0_i32 = arith.constant 0 : i32
    %c0_i32_0 = arith.constant 0 : i32
    %c0_i32_1 = arith.constant 0 : i32
    return %c0_i32, %c0_i32_0 : i32, i32
  }
  func.func @transform_4(%arg0: i32, %arg1: i32) -> (i32, i32) {
    %c0_i32 = arith.constant 0 : i32
    %c0_i32_0 = arith.constant 0 : i32
    %c0_i32_1 = arith.constant 0 : i32
    return %c0_i32, %c0_i32_0 : i32, i32
  }
  func.func @transform_5(%arg0: i32, %arg1: i32) -> (i32, i32) {
    %c0_i32 = arith.constant 0 : i32
    %c0_i32_0 = arith.constant 0 : i32
    %c0_i32_1 = arith.constant 0 : i32
    return %c0_i32, %c0_i32_0 : i32, i32
  }
  func.func @transform_6(%arg0: i32, %arg1: i32) -> (i32, i32) {
    %c0_i32 = arith.constant 0 : i32
    %c0_i32_0 = arith.constant 0 : i32
    %c0_i32_1 = arith.constant 0 : i32
    return %c0_i32, %c0_i32_0 : i32, i32
  }
  func.func @transform_7(%arg0: i32, %arg1: i32) -> (i32, i32, i32) {
    %c0_i32 = arith.constant 0 : i32
    %c0_i32_0 = arith.constant 0 : i32
    return %arg0, %arg1, %c0_i32 : i32, i32, i32
  }
}

module attributes {stable_mosaic.version = 11 : i64} {
  func.func @_matmul_bias_kernel(%arg0: i32, %arg1: i32, %arg2: i32, %arg3: memref<20x32xf32, #tpu.memory_space<vmem>>, %arg4: memref<64x32xbf16, #tpu.memory_space<vmem>>, %arg5: memref<1x64xf32, #tpu.memory_space<vmem>>, %arg6: memref<20x64xbf16, #tpu.memory_space<vmem>>, %arg7: memref<20x64xf32, #tpu.memory_space<vmem>>) attributes {dimension_semantics = [#tpu.dimension_semantics<parallel>, #tpu.dimension_semantics<parallel>, #tpu.dimension_semantics<arbitrary>], iteration_bounds = array<i64: 1, 1, 1>, scalar_prefetch = 0 : i64, scratch_operands = 1 : i64, tpu.core_type = #tpu.core_type<tc>, window_params = [{transform_indices = @transform_0, window_bounds = array<i64: 20, 32>}, {transform_indices = @transform_1, window_bounds = array<i64: 64, 32>}, {transform_indices = @transform_2, window_bounds = array<i64: 1, 64>}, {transform_indices = @transform_3, window_bounds = array<i64: 20, 64>}]} {
    %c0_i32 = arith.constant 0 : i32
    %0 = arith.cmpi eq, %arg2, %c0_i32 : i32
    %1 = arith.extui %0 : i1 to i32
    %c0_i32_0 = arith.constant 0 : i32
    %2 = arith.cmpi ne, %1, %c0_i32_0 : i32
    scf.if %2 {
      %cst_10 = arith.constant 0.000000e+00 : f32
      %13 = vector.broadcast %cst_10 : f32 to vector<20x64xf32>
      %c0_11 = arith.constant 0 : index
      %c0_12 = arith.constant 0 : index
      %14 = vector.load %arg7[%c0_11, %c0_12] : memref<20x64xf32, #tpu.memory_space<vmem>>, vector<20x64xf32>
      tpu.vector_store %arg7[%c0_11, %c0_12], %13 {strides = array<i32>} : memref<20x64xf32, #tpu.memory_space<vmem>>, vector<20x64xf32>,
    } else {
    }
    %c0 = arith.constant 0 : index
    %c0_1 = arith.constant 0 : index
    %3 = vector.load %arg3[%c0, %c0_1] : memref<20x32xf32, #tpu.memory_space<vmem>>, vector<20x32xf32>
    %4 = arith.truncf %3 : vector<20x32xf32> to vector<20x32xbf16>
    %c0_2 = arith.constant 0 : index
    %c0_3 = arith.constant 0 : index
    %5 = vector.load %arg4[%c0_2, %c0_3] : memref<64x32xbf16, #tpu.memory_space<vmem>>, vector<64x32xbf16>
    %c0_4 = arith.constant 0 : index
    %c0_5 = arith.constant 0 : index
    %6 = vector.load %arg7[%c0_4, %c0_5] : memref<20x64xf32, #tpu.memory_space<vmem>>, vector<20x64xf32>
    %cst = arith.constant dense<0.000000e+00> : vector<20x64xf32>
    %7 = tpu.matmul %4, %5, %cst {dimension_numbers = #tpu.dot_dimension_numbers<[1], [1], [0], [0], [0, 0, 1, 0], [], []>} : vector<20x32xbf16>, vector<64x32xbf16>, vector<20x64xf32> -> vector<20x64xf32>
    %8 = arith.addf %6, %7 : vector<20x64xf32>
    %c0_6 = arith.constant 0 : index
    %c0_7 = arith.constant 0 : index
    %9 = vector.load %arg7[%c0_6, %c0_7] : memref<20x64xf32, #tpu.memory_space<vmem>>, vector<20x64xf32>
    tpu.vector_store %arg7[%c0_6, %c0_7], %8 {strides = array<i32>} : memref<20x64xf32, #tpu.memory_space<vmem>>, vector<20x64xf32>,
    %c0_i32_8 = arith.constant 0 : i32
    %10 = arith.cmpi eq, %arg2, %c0_i32_8 : i32
    %11 = arith.extui %10 : i1 to i32
    %c0_i32_9 = arith.constant 0 : i32
    %12 = arith.cmpi ne, %11, %c0_i32_9 : i32
    scf.if %12 {
      %c0_10 = arith.constant 0 : index
      %c0_11 = arith.constant 0 : index
      %13 = vector.load %arg7[%c0_10, %c0_11] : memref<20x64xf32, #tpu.memory_space<vmem>>, vector<20x64xf32>
      %c0_12 = arith.constant 0 : index
      %c0_13 = arith.constant 0 : index
      %14 = vector.load %arg5[%c0_12, %c0_13] : memref<1x64xf32, #tpu.memory_space<vmem>>, vector<1x64xf32>
      %15 = vector.broadcast %14 : vector<1x64xf32> to vector<20x64xf32>
      %16 = arith.addf %13, %15 : vector<20x64xf32>
      %17 = arith.truncf %16 : vector<20x64xf32> to vector<20x64xbf16>
      %c0_14 = arith.constant 0 : index
      %c0_15 = arith.constant 0 : index
      %18 = vector.load %arg6[%c0_14, %c0_15] : memref<20x64xbf16, #tpu.memory_space<vmem>>, vector<20x64xbf16>
      tpu.vector_store %arg6[%c0_14, %c0_15], %17 {strides = array<i32>} : memref<20x64xbf16, #tpu.memory_space<vmem>>, vector<20x64xbf16>,
    } else {
    }
    return
  }
  func.func @transform_0(%arg0: i32, %arg1: i32, %arg2: i32) -> (i32, i32) {
    %c0_i32 = arith.constant 0 : i32
    return %arg0, %arg2 : i32, i32
  }
  func.func @transform_1(%arg0: i32, %arg1: i32, %arg2: i32) -> (i32, i32) {
    %c0_i32 = arith.constant 0 : i32
    return %arg1, %arg2 : i32, i32
  }
  func.func @transform_2(%arg0: i32, %arg1: i32, %arg2: i32) -> (i32, i32) {
    %c0_i32 = arith.constant 0 : i32
    %c0_i32_0 = arith.constant 0 : i32
    return %c0_i32, %arg1 : i32, i32
  }
  func.func @transform_3(%arg0: i32, %arg1: i32, %arg2: i32) -> (i32, i32) {
    %c0_i32 = arith.constant 0 : i32
    return %arg0, %arg1 : i32, i32
  }
}

module attributes {stable_mosaic.version = 11 : i64} {
  func.func @_attn_core_kernel(%arg0: i32, %arg1: i32, %arg2: memref<1x8x32xf32, #tpu.memory_space<vmem>>, %arg3: memref<1x8x32xbf16, #tpu.memory_space<vmem>>, %arg4: memref<1x10x64xbf16, #tpu.memory_space<vmem>>, %arg5: memref<32x32xbf16, #tpu.memory_space<vmem>>, %arg6: memref<1x32xf32, #tpu.memory_space<vmem>>, %arg7: memref<1x32xf32, #tpu.memory_space<vmem>>, %arg8: memref<1x32xf32, #tpu.memory_space<vmem>>, %arg9: memref<1x8x32xf32, #tpu.memory_space<vmem>>) attributes {dimension_semantics = [#tpu.dimension_semantics<parallel>, #tpu.dimension_semantics<parallel>], iteration_bounds = array<i64: 2, 1>, scalar_prefetch = 0 : i64, scratch_operands = 0 : i64, tpu.core_type = #tpu.core_type<tc>, window_params = [{transform_indices = @transform_0, window_bounds = array<i64: 1, 8, 32>}, {transform_indices = @transform_1, window_bounds = array<i64: 1, 8, 32>}, {transform_indices = @transform_2, window_bounds = array<i64: 1, 10, 64>}, {pipeline_mode = #tpu.pipeline_mode<synchronous>, transform_indices = @transform_3, window_bounds = array<i64: 32, 32>}, {pipeline_mode = #tpu.pipeline_mode<synchronous>, transform_indices = @transform_4, window_bounds = array<i64: 1, 32>}, {pipeline_mode = #tpu.pipeline_mode<synchronous>, transform_indices = @transform_5, window_bounds = array<i64: 1, 32>}, {pipeline_mode = #tpu.pipeline_mode<synchronous>, transform_indices = @transform_6, window_bounds = array<i64: 1, 32>}, {transform_indices = @transform_7, window_bounds = array<i64: 1, 8, 32>}]} {
    %c0 = arith.constant 0 : index
    %c0_0 = arith.constant 0 : index
    %c0_1 = arith.constant 0 : index
    %0 = vector.load %arg2[%c0, %c0_0, %c0_1] : memref<1x8x32xf32, #tpu.memory_space<vmem>>, vector<1x8x32xf32>
    %1 = vector.shape_cast %0 : vector<1x8x32xf32> to vector<8x32xf32>
    %c0_2 = arith.constant 0 : index
    %c0_3 = arith.constant 0 : index
    %c0_4 = arith.constant 0 : index
    %2 = vector.load %arg3[%c0_2, %c0_3, %c0_4] : memref<1x8x32xbf16, #tpu.memory_space<vmem>>, vector<1x8x32xbf16>
    %3 = vector.shape_cast %2 : vector<1x8x32xbf16> to vector<8x32xbf16>
    %c0_5 = arith.constant 0 : index
    %c0_6 = arith.constant 0 : index
    %c0_7 = arith.constant 0 : index
    %4 = vector.load %arg4[%c0_5, %c0_6, %c0_7] : memref<1x10x64xbf16, #tpu.memory_space<vmem>>, vector<1x10x64xbf16>
    %5 = vector.shape_cast %4 : vector<1x10x64xbf16> to vector<10x64xbf16>
    %6 = vector.shape_cast %3 : vector<8x32xbf16> to vector<8x4x8xbf16>
    %7 = tpu.transpose %6, [1, 0, 2] : vector<8x4x8xbf16> -> vector<4x8x8xbf16>
    %8 = vector.extract_strided_slice %5 {offsets = [0, 0], sizes = [10, 32], strides = [1, 1]} : vector<10x64xbf16> to vector<10x32xbf16>
    %9 = vector.shape_cast %8 : vector<10x32xbf16> to vector<10x4x8xbf16>
    %10 = tpu.transpose %9, [1, 0, 2] : vector<10x4x8xbf16> -> vector<4x10x8xbf16>
    %11 = vector.extract_strided_slice %5 {offsets = [0, 32], sizes = [10, 32], strides = [1, 1]} : vector<10x64xbf16> to vector<10x32xbf16>
    %12 = vector.shape_cast %11 : vector<10x32xbf16> to vector<10x4x8xbf16>
    %13 = tpu.transpose %12, [1, 0, 2] : vector<10x4x8xbf16> -> vector<4x10x8xbf16>
    %cst = arith.constant dense<0.000000e+00> : vector<4x8x10xf32>
    %14 = tpu.matmul %7, %10, %cst {dimension_numbers = #tpu.dot_dimension_numbers<[2], [2], [1], [1], [0, 0, 0, 1, 1, 1], [0], [0]>} : vector<4x8x8xbf16>, vector<4x10x8xbf16>, vector<4x8x10xf32> -> vector<4x8x10xf32>
    %cst_8 = arith.constant 0.353553385 : f32
    %15 = vector.broadcast %cst_8 : f32 to vector<4x8x10xf32>
    %16 = arith.mulf %14, %15 : vector<4x8x10xf32>
    %cst_9 = arith.constant dense<0xFF800000> : vector<4x8xf32>
    %17 = vector.multi_reduction <maximumf>, %16, %cst_9 [2] : vector<4x8x10xf32> to vector<4x8xf32>
    %18 = vector.shape_cast %17 : vector<4x8xf32> to vector<4x8x1xf32>
    %19 = vector.broadcast %18 : vector<4x8x1xf32> to vector<4x8x10xf32>
    %20 = arith.subf %16, %19 : vector<4x8x10xf32>
    %21 = math.exp %20 : vector<4x8x10xf32>
    %cst_10 = arith.constant dense<0.000000e+00> : vector<4x8xf32>
    %22 = vector.multi_reduction <add>, %21, %cst_10 [2] : vector<4x8x10xf32> to vector<4x8xf32>
    %23 = vector.shape_cast %22 : vector<4x8xf32> to vector<4x8x1xf32>
    %24 = tpu.reciprocal %23 {approx = true} : vector<4x8x1xf32> -> vector<4x8x1xf32>
    %25 = vector.broadcast %24 : vector<4x8x1xf32> to vector<4x8x10xf32>
    %26 = arith.mulf %21, %25 : vector<4x8x10xf32>
    %27 = arith.truncf %26 : vector<4x8x10xf32> to vector<4x8x10xbf16>
    %cst_11 = arith.constant dense<0.000000e+00> : vector<4x8x8xf32>
    %28 = tpu.matmul %27, %13, %cst_11 {dimension_numbers = #tpu.dot_dimension_numbers<[2], [1], [1], [2], [0, 0, 0, 1, 1, 2], [0], [0]>} : vector<4x8x10xbf16>, vector<4x10x8xbf16>, vector<4x8x8xf32> -> vector<4x8x8xf32>
    %29 = tpu.transpose %28, [1, 0, 2] : vector<4x8x8xf32> -> vector<8x4x8xf32>
    %30 = vector.shape_cast %29 : vector<8x4x8xf32> to vector<8x32xf32>
    %31 = arith.truncf %30 : vector<8x32xf32> to vector<8x32xbf16>
    %c0_12 = arith.constant 0 : index
    %c0_13 = arith.constant 0 : index
    %32 = vector.load %arg5[%c0_12, %c0_13] : memref<32x32xbf16, #tpu.memory_space<vmem>>, vector<32x32xbf16>
    %cst_14 = arith.constant dense<0.000000e+00> : vector<8x32xf32>
    %33 = tpu.matmul %31, %32, %cst_14 {dimension_numbers = #tpu.dot_dimension_numbers<[1], [1], [0], [0], [0, 0, 1, 0], [], []>} : vector<8x32xbf16>, vector<32x32xbf16>, vector<8x32xf32> -> vector<8x32xf32>
    %c0_15 = arith.constant 0 : index
    %c0_16 = arith.constant 0 : index
    %34 = vector.load %arg6[%c0_15, %c0_16] : memref<1x32xf32, #tpu.memory_space<vmem>>, vector<1x32xf32>
    %35 = vector.broadcast %34 : vector<1x32xf32> to vector<8x32xf32>
    %36 = arith.addf %33, %35 : vector<8x32xf32>
    %37 = arith.addf %1, %36 : vector<8x32xf32>
    %c0_17 = arith.constant 0 : index
    %c0_18 = arith.constant 0 : index
    %38 = vector.load %arg7[%c0_17, %c0_18] : memref<1x32xf32, #tpu.memory_space<vmem>>, vector<1x32xf32>
    %c0_19 = arith.constant 0 : index
    %c0_20 = arith.constant 0 : index
    %39 = vector.load %arg8[%c0_19, %c0_20] : memref<1x32xf32, #tpu.memory_space<vmem>>, vector<1x32xf32>
    %cst_21 = arith.constant dense<0.000000e+00> : vector<8xf32>
    %40 = vector.multi_reduction <add>, %37, %cst_21 [1] : vector<8x32xf32> to vector<8xf32>
    %41 = vector.shape_cast %40 : vector<8xf32> to vector<8x1xf32>
    %cst_22 = arith.constant 3.200000e+01 : f32
    %42 = vector.broadcast %cst_22 : f32 to vector<8x1xf32>
    %43 = arith.divf %41, %42 : vector<8x1xf32>
    %44 = vector.broadcast %43 : vector<8x1xf32> to vector<8x32xf32>
    %45 = arith.subf %37, %44 : vector<8x32xf32>
    %46 = arith.mulf %45, %45 : vector<8x32xf32>
    %cst_23 = arith.constant dense<0.000000e+00> : vector<8xf32>
    %47 = vector.multi_reduction <add>, %46, %cst_23 [1] : vector<8x32xf32> to vector<8xf32>
    %48 = vector.shape_cast %47 : vector<8xf32> to vector<8x1xf32>
    %cst_24 = arith.constant 3.200000e+01 : f32
    %49 = vector.broadcast %cst_24 : f32 to vector<8x1xf32>
    %50 = arith.divf %48, %49 : vector<8x1xf32>
    %51 = vector.broadcast %43 : vector<8x1xf32> to vector<8x32xf32>
    %52 = arith.subf %37, %51 : vector<8x32xf32>
    %cst_25 = arith.constant 9.99999974E-6 : f32
    %53 = vector.broadcast %cst_25 : f32 to vector<8x1xf32>
    %54 = arith.addf %50, %53 : vector<8x1xf32>
    %55 = math.rsqrt %54 : vector<8x1xf32>
    %56 = vector.broadcast %55 : vector<8x1xf32> to vector<8x32xf32>
    %57 = arith.mulf %52, %56 : vector<8x32xf32>
    %58 = vector.broadcast %38 : vector<1x32xf32> to vector<8x32xf32>
    %59 = arith.mulf %57, %58 : vector<8x32xf32>
    %60 = vector.broadcast %39 : vector<1x32xf32> to vector<8x32xf32>
    %61 = arith.addf %59, %60 : vector<8x32xf32>
    %c0_26 = arith.constant 0 : index
    %c0_27 = arith.constant 0 : index
    %c0_28 = arith.constant 0 : index
    %62 = vector.load %arg9[%c0_26, %c0_27, %c0_28] : memref<1x8x32xf32, #tpu.memory_space<vmem>>, vector<1x8x32xf32>
    %63 = vector.shape_cast %62 : vector<1x8x32xf32> to vector<8x32xf32>
    %64 = vector.shape_cast %61 : vector<8x32xf32> to vector<1x8x32xf32>
    tpu.vector_store %arg9[%c0_26, %c0_27, %c0_28], %64 {strides = array<i32>} : memref<1x8x32xf32, #tpu.memory_space<vmem>>, vector<1x8x32xf32>,
    return
  }
  func.func @transform_0(%arg0: i32, %arg1: i32) -> (i32, i32, i32) {
    %c0_i32 = arith.constant 0 : i32
    %c0_i32_0 = arith.constant 0 : i32
    return %arg0, %arg1, %c0_i32 : i32, i32, i32
  }
  func.func @transform_1(%arg0: i32, %arg1: i32) -> (i32, i32, i32) {
    %c0_i32 = arith.constant 0 : i32
    %c0_i32_0 = arith.constant 0 : i32
    return %arg0, %arg1, %c0_i32 : i32, i32, i32
  }
  func.func @transform_2(%arg0: i32, %arg1: i32) -> (i32, i32, i32) {
    %c0_i32 = arith.constant 0 : i32
    %c0_i32_0 = arith.constant 0 : i32
    %c0_i32_1 = arith.constant 0 : i32
    return %arg0, %c0_i32, %c0_i32_0 : i32, i32, i32
  }
  func.func @transform_3(%arg0: i32, %arg1: i32) -> (i32, i32) {
    %c0_i32 = arith.constant 0 : i32
    %c0_i32_0 = arith.constant 0 : i32
    %c0_i32_1 = arith.constant 0 : i32
    return %c0_i32, %c0_i32_0 : i32, i32
  }
  func.func @transform_4(%arg0: i32, %arg1: i32) -> (i32, i32) {
    %c0_i32 = arith.constant 0 : i32
    %c0_i32_0 = arith.constant 0 : i32
    %c0_i32_1 = arith.constant 0 : i32
    return %c0_i32, %c0_i32_0 : i32, i32
  }
  func.func @transform_5(%arg0: i32, %arg1: i32) -> (i32, i32) {
    %c0_i32 = arith.constant 0 : i32
    %c0_i32_0 = arith.constant 0 : i32
    %c0_i32_1 = arith.constant 0 : i32
    return %c0_i32, %c0_i32_0 : i32, i32
  }
  func.func @transform_6(%arg0: i32, %arg1: i32) -> (i32, i32) {
    %c0_i32 = arith.constant 0 : i32
    %c0_i32_0 = arith.constant 0 : i32
    %c0_i32_1 = arith.constant 0 : i32
    return %c0_i32, %c0_i32_0 : i32, i32
  }
  func.func @transform_7(%arg0: i32, %arg1: i32) -> (i32, i32, i32) {
    %c0_i32 = arith.constant 0 : i32
    %c0_i32_0 = arith.constant 0 : i32
    return %arg0, %arg1, %c0_i32 : i32, i32, i32
  }
}

module attributes {stable_mosaic.version = 11 : i64} {
  func.func @_ffn_block_kernel(%arg0: i32, %arg1: i32, %arg2: memref<16x32xf32, #tpu.memory_space<vmem>>, %arg3: memref<512x32xbf16, #tpu.memory_space<vmem>>, %arg4: memref<1x512xf32, #tpu.memory_space<vmem>>, %arg5: memref<32x512xbf16, #tpu.memory_space<vmem>>, %arg6: memref<1x32xf32, #tpu.memory_space<vmem>>, %arg7: memref<1x32xf32, #tpu.memory_space<vmem>>, %arg8: memref<1x32xf32, #tpu.memory_space<vmem>>, %arg9: memref<16x32xf32, #tpu.memory_space<vmem>>, %arg10: memref<16x32xf32, #tpu.memory_space<vmem>>) attributes {dimension_semantics = [#tpu.dimension_semantics<parallel>, #tpu.dimension_semantics<arbitrary>], iteration_bounds = array<i64: 1, 4>, scalar_prefetch = 0 : i64, scratch_operands = 1 : i64, tpu.core_type = #tpu.core_type<tc>, window_params = [{transform_indices = @transform_0, window_bounds = array<i64: 16, 32>}, {transform_indices = @transform_1, window_bounds = array<i64: 512, 32>}, {transform_indices = @transform_2, window_bounds = array<i64: 1, 512>}, {transform_indices = @transform_3, window_bounds = array<i64: 32, 512>}, {pipeline_mode = #tpu.pipeline_mode<synchronous>, transform_indices = @transform_4, window_bounds = array<i64: 1, 32>}, {pipeline_mode = #tpu.pipeline_mode<synchronous>, transform_indices = @transform_5, window_bounds = array<i64: 1, 32>}, {pipeline_mode = #tpu.pipeline_mode<synchronous>, transform_indices = @transform_6, window_bounds = array<i64: 1, 32>}, {transform_indices = @transform_7, window_bounds = array<i64: 16, 32>}]} {
    %c0_i32 = arith.constant 0 : i32
    %0 = arith.cmpi eq, %arg1, %c0_i32 : i32
    %1 = arith.extui %0 : i1 to i32
    %c0_i32_0 = arith.constant 0 : i32
    %2 = arith.cmpi ne, %1, %c0_i32_0 : i32
    scf.if %2 {
      %cst_15 = arith.constant 0.000000e+00 : f32
      %21 = vector.broadcast %cst_15 : f32 to vector<16x32xf32>
      %c0_16 = arith.constant 0 : index
      %c0_17 = arith.constant 0 : index
      %22 = vector.load %arg10[%c0_16, %c0_17] : memref<16x32xf32, #tpu.memory_space<vmem>>, vector<16x32xf32>
      tpu.vector_store %arg10[%c0_16, %c0_17], %21 {strides = array<i32>} : memref<16x32xf32, #tpu.memory_space<vmem>>, vector<16x32xf32>,
    } else {
    }
    %c0 = arith.constant 0 : index
    %c0_1 = arith.constant 0 : index
    %3 = vector.load %arg2[%c0, %c0_1] : memref<16x32xf32, #tpu.memory_space<vmem>>, vector<16x32xf32>
    %4 = arith.truncf %3 : vector<16x32xf32> to vector<16x32xbf16>
    %c0_2 = arith.constant 0 : index
    %c0_3 = arith.constant 0 : index
    %5 = vector.load %arg3[%c0_2, %c0_3] : memref<512x32xbf16, #tpu.memory_space<vmem>>, vector<512x32xbf16>
    %cst = arith.constant dense<0.000000e+00> : vector<16x512xf32>
    %6 = tpu.matmul %4, %5, %cst {dimension_numbers = #tpu.dot_dimension_numbers<[1], [1], [0], [0], [0, 0, 1, 0], [], []>} : vector<16x32xbf16>, vector<512x32xbf16>, vector<16x512xf32> -> vector<16x512xf32>
    %c0_4 = arith.constant 0 : index
    %c0_5 = arith.constant 0 : index
    %7 = vector.load %arg4[%c0_4, %c0_5] : memref<1x512xf32, #tpu.memory_space<vmem>>, vector<1x512xf32>
    %8 = vector.broadcast %7 : vector<1x512xf32> to vector<16x512xf32>
    %9 = arith.addf %6, %8 : vector<16x512xf32>
    %cst_6 = arith.constant 0.000000e+00 : f32
    %10 = vector.broadcast %cst_6 : f32 to vector<16x512xf32>
    %11 = arith.maximumf %9, %10 : vector<16x512xf32>
    %c0_7 = arith.constant 0 : index
    %c0_8 = arith.constant 0 : index
    %12 = vector.load %arg10[%c0_7, %c0_8] : memref<16x32xf32, #tpu.memory_space<vmem>>, vector<16x32xf32>
    %13 = arith.truncf %11 : vector<16x512xf32> to vector<16x512xbf16>
    %c0_9 = arith.constant 0 : index
    %c0_10 = arith.constant 0 : index
    %14 = vector.load %arg5[%c0_9, %c0_10] : memref<32x512xbf16, #tpu.memory_space<vmem>>, vector<32x512xbf16>
    %cst_11 = arith.constant dense<0.000000e+00> : vector<16x32xf32>
    %15 = tpu.matmul %13, %14, %cst_11 {dimension_numbers = #tpu.dot_dimension_numbers<[1], [1], [0], [0], [0, 0, 1, 0], [], []>} : vector<16x512xbf16>, vector<32x512xbf16>, vector<16x32xf32> -> vector<16x32xf32>
    %16 = arith.addf %12, %15 : vector<16x32xf32>
    %c0_12 = arith.constant 0 : index
    %c0_13 = arith.constant 0 : index
    %17 = vector.load %arg10[%c0_12, %c0_13] : memref<16x32xf32, #tpu.memory_space<vmem>>, vector<16x32xf32>
    tpu.vector_store %arg10[%c0_12, %c0_13], %16 {strides = array<i32>} : memref<16x32xf32, #tpu.memory_space<vmem>>, vector<16x32xf32>,
    %c3_i32 = arith.constant 3 : i32
    %18 = arith.cmpi eq, %arg1, %c3_i32 : i32
    %19 = arith.extui %18 : i1 to i32
    %c0_i32_14 = arith.constant 0 : i32
    %20 = arith.cmpi ne, %19, %c0_i32_14 : i32
    scf.if %20 {
      %c0_15 = arith.constant 0 : index
      %c0_16 = arith.constant 0 : index
      %21 = vector.load %arg2[%c0_15, %c0_16] : memref<16x32xf32, #tpu.memory_space<vmem>>, vector<16x32xf32>
      %c0_17 = arith.constant 0 : index
      %c0_18 = arith.constant 0 : index
      %22 = vector.load %arg10[%c0_17, %c0_18] : memref<16x32xf32, #tpu.memory_space<vmem>>, vector<16x32xf32>
      %c0_19 = arith.constant 0 : index
      %c0_20 = arith.constant 0 : index
      %23 = vector.load %arg6[%c0_19, %c0_20] : memref<1x32xf32, #tpu.memory_space<vmem>>, vector<1x32xf32>
      %24 = vector.broadcast %23 : vector<1x32xf32> to vector<16x32xf32>
      %25 = arith.addf %22, %24 : vector<16x32xf32>
      %26 = arith.addf %21, %25 : vector<16x32xf32>
      %c0_21 = arith.constant 0 : index
      %c0_22 = arith.constant 0 : index
      %27 = vector.load %arg7[%c0_21, %c0_22] : memref<1x32xf32, #tpu.memory_space<vmem>>, vector<1x32xf32>
      %c0_23 = arith.constant 0 : index
      %c0_24 = arith.constant 0 : index
      %28 = vector.load %arg8[%c0_23, %c0_24] : memref<1x32xf32, #tpu.memory_space<vmem>>, vector<1x32xf32>
      %cst_25 = arith.constant dense<0.000000e+00> : vector<16xf32>
      %29 = vector.multi_reduction <add>, %26, %cst_25 [1] : vector<16x32xf32> to vector<16xf32>
      %30 = vector.shape_cast %29 : vector<16xf32> to vector<16x1xf32>
      %cst_26 = arith.constant 3.200000e+01 : f32
      %31 = vector.broadcast %cst_26 : f32 to vector<16x1xf32>
      %32 = arith.divf %30, %31 : vector<16x1xf32>
      %33 = vector.broadcast %32 : vector<16x1xf32> to vector<16x32xf32>
      %34 = arith.subf %26, %33 : vector<16x32xf32>
      %35 = arith.mulf %34, %34 : vector<16x32xf32>
      %cst_27 = arith.constant dense<0.000000e+00> : vector<16xf32>
      %36 = vector.multi_reduction <add>, %35, %cst_27 [1] : vector<16x32xf32> to vector<16xf32>
      %37 = vector.shape_cast %36 : vector<16xf32> to vector<16x1xf32>
      %cst_28 = arith.constant 3.200000e+01 : f32
      %38 = vector.broadcast %cst_28 : f32 to vector<16x1xf32>
      %39 = arith.divf %37, %38 : vector<16x1xf32>
      %40 = vector.broadcast %32 : vector<16x1xf32> to vector<16x32xf32>
      %41 = arith.subf %26, %40 : vector<16x32xf32>
      %cst_29 = arith.constant 9.99999974E-6 : f32
      %42 = vector.broadcast %cst_29 : f32 to vector<16x1xf32>
      %43 = arith.addf %39, %42 : vector<16x1xf32>
      %44 = math.rsqrt %43 : vector<16x1xf32>
      %45 = vector.broadcast %44 : vector<16x1xf32> to vector<16x32xf32>
      %46 = arith.mulf %41, %45 : vector<16x32xf32>
      %47 = vector.broadcast %27 : vector<1x32xf32> to vector<16x32xf32>
      %48 = arith.mulf %46, %47 : vector<16x32xf32>
      %49 = vector.broadcast %28 : vector<1x32xf32> to vector<16x32xf32>
      %50 = arith.addf %48, %49 : vector<16x32xf32>
      %c0_30 = arith.constant 0 : index
      %c0_31 = arith.constant 0 : index
      %51 = vector.load %arg9[%c0_30, %c0_31] : memref<16x32xf32, #tpu.memory_space<vmem>>, vector<16x32xf32>
      tpu.vector_store %arg9[%c0_30, %c0_31], %50 {strides = array<i32>} : memref<16x32xf32, #tpu.memory_space<vmem>>, vector<16x32xf32>,
    } else {
    }
    return
  }
  func.func @transform_0(%arg0: i32, %arg1: i32) -> (i32, i32) {
    %c0_i32 = arith.constant 0 : i32
    %c0_i32_0 = arith.constant 0 : i32
    return %arg0, %c0_i32 : i32, i32
  }
  func.func @transform_1(%arg0: i32, %arg1: i32) -> (i32, i32) {
    %c0_i32 = arith.constant 0 : i32
    %c0_i32_0 = arith.constant 0 : i32
    return %arg1, %c0_i32 : i32, i32
  }
  func.func @transform_2(%arg0: i32, %arg1: i32) -> (i32, i32) {
    %c0_i32 = arith.constant 0 : i32
    %c0_i32_0 = arith.constant 0 : i32
    return %c0_i32, %arg1 : i32, i32
  }
  func.func @transform_3(%arg0: i32, %arg1: i32) -> (i32, i32) {
    %c0_i32 = arith.constant 0 : i32
    %c0_i32_0 = arith.constant 0 : i32
    return %c0_i32, %arg1 : i32, i32
  }
  func.func @transform_4(%arg0: i32, %arg1: i32) -> (i32, i32) {
    %c0_i32 = arith.constant 0 : i32
    %c0_i32_0 = arith.constant 0 : i32
    %c0_i32_1 = arith.constant 0 : i32
    return %c0_i32, %c0_i32_0 : i32, i32
  }
  func.func @transform_5(%arg0: i32, %arg1: i32) -> (i32, i32) {
    %c0_i32 = arith.constant 0 : i32
    %c0_i32_0 = arith.constant 0 : i32
    %c0_i32_1 = arith.constant 0 : i32
    return %c0_i32, %c0_i32_0 : i32, i32
  }
  func.func @transform_6(%arg0: i32, %arg1: i32) -> (i32, i32) {
    %c0_i32 = arith.constant 0 : i32
    %c0_i32_0 = arith.constant 0 : i32
    %c0_i32_1 = arith.constant 0 : i32
    return %c0_i32, %c0_i32_0 : i32, i32
  }
  func.func @transform_7(%arg0: i32, %arg1: i32) -> (i32, i32) {
    %c0_i32 = arith.constant 0 : i32
    %c0_i32_0 = arith.constant 0 : i32
    return %arg0, %c0_i32 : i32, i32
  }
}

module attributes {stable_mosaic.version = 11 : i64} {
  func.func @_matmul_bias_kernel(%arg0: i32, %arg1: i32, %arg2: i32, %arg3: memref<16x32xf32, #tpu.memory_space<vmem>>, %arg4: memref<32x50xbf16, #tpu.memory_space<vmem>>, %arg5: memref<1x50xf32, #tpu.memory_space<vmem>>, %arg6: memref<16x50xf32, #tpu.memory_space<vmem>>, %arg7: memref<16x50xf32, #tpu.memory_space<vmem>>) attributes {dimension_semantics = [#tpu.dimension_semantics<parallel>, #tpu.dimension_semantics<parallel>, #tpu.dimension_semantics<arbitrary>], iteration_bounds = array<i64: 1, 1, 1>, scalar_prefetch = 0 : i64, scratch_operands = 1 : i64, tpu.core_type = #tpu.core_type<tc>, window_params = [{transform_indices = @transform_0, window_bounds = array<i64: 16, 32>}, {transform_indices = @transform_1, window_bounds = array<i64: 32, 50>}, {transform_indices = @transform_2, window_bounds = array<i64: 1, 50>}, {transform_indices = @transform_3, window_bounds = array<i64: 16, 50>}]} {
    %c0_i32 = arith.constant 0 : i32
    %0 = arith.cmpi eq, %arg2, %c0_i32 : i32
    %1 = arith.extui %0 : i1 to i32
    %c0_i32_0 = arith.constant 0 : i32
    %2 = arith.cmpi ne, %1, %c0_i32_0 : i32
    scf.if %2 {
      %cst_10 = arith.constant 0.000000e+00 : f32
      %13 = vector.broadcast %cst_10 : f32 to vector<16x50xf32>
      %c0_11 = arith.constant 0 : index
      %c0_12 = arith.constant 0 : index
      %14 = vector.load %arg7[%c0_11, %c0_12] : memref<16x50xf32, #tpu.memory_space<vmem>>, vector<16x50xf32>
      tpu.vector_store %arg7[%c0_11, %c0_12], %13 {strides = array<i32>} : memref<16x50xf32, #tpu.memory_space<vmem>>, vector<16x50xf32>,
    } else {
    }
    %c0 = arith.constant 0 : index
    %c0_1 = arith.constant 0 : index
    %3 = vector.load %arg3[%c0, %c0_1] : memref<16x32xf32, #tpu.memory_space<vmem>>, vector<16x32xf32>
    %4 = arith.truncf %3 : vector<16x32xf32> to vector<16x32xbf16>
    %c0_2 = arith.constant 0 : index
    %c0_3 = arith.constant 0 : index
    %5 = vector.load %arg4[%c0_2, %c0_3] : memref<32x50xbf16, #tpu.memory_space<vmem>>, vector<32x50xbf16>
    %c0_4 = arith.constant 0 : index
    %c0_5 = arith.constant 0 : index
    %6 = vector.load %arg7[%c0_4, %c0_5] : memref<16x50xf32, #tpu.memory_space<vmem>>, vector<16x50xf32>
    %cst = arith.constant dense<0.000000e+00> : vector<16x50xf32>
    %7 = tpu.matmul %4, %5, %cst {dimension_numbers = #tpu.dot_dimension_numbers<[1], [0], [0], [1], [0, 0, 1, 1], [], []>} : vector<16x32xbf16>, vector<32x50xbf16>, vector<16x50xf32> -> vector<16x50xf32>
    %8 = arith.addf %6, %7 : vector<16x50xf32>
    %c0_6 = arith.constant 0 : index
    %c0_7 = arith.constant 0 : index
    %9 = vector.load %arg7[%c0_6, %c0_7] : memref<16x50xf32, #tpu.memory_space<vmem>>, vector<16x50xf32>
    tpu.vector_store %arg7[%c0_6, %c0_7], %8 {strides = array<i32>} : memref<16x50xf32, #tpu.memory_space<vmem>>, vector<16x50xf32>,
    %c0_i32_8 = arith.constant 0 : i32
    %10 = arith.cmpi eq, %arg2, %c0_i32_8 : i32
    %11 = arith.extui %10 : i1 to i32
    %c0_i32_9 = arith.constant 0 : i32
    %12 = arith.cmpi ne, %11, %c0_i32_9 : i32
    scf.if %12 {
      %c0_10 = arith.constant 0 : index
      %c0_11 = arith.constant 0 : index
      %13 = vector.load %arg7[%c0_10, %c0_11] : memref<16x50xf32, #tpu.memory_space<vmem>>, vector<16x50xf32>
      %c0_12 = arith.constant 0 : index
      %c0_13 = arith.constant 0 : index
      %14 = vector.load %arg5[%c0_12, %c0_13] : memref<1x50xf32, #tpu.memory_space<vmem>>, vector<1x50xf32>
      %15 = vector.broadcast %14 : vector<1x50xf32> to vector<16x50xf32>
      %16 = arith.addf %13, %15 : vector<16x50xf32>
      %c0_14 = arith.constant 0 : index
      %c0_15 = arith.constant 0 : index
      %17 = vector.load %arg6[%c0_14, %c0_15] : memref<16x50xf32, #tpu.memory_space<vmem>>, vector<16x50xf32>
      tpu.vector_store %arg6[%c0_14, %c0_15], %16 {strides = array<i32>} : memref<16x50xf32, #tpu.memory_space<vmem>>, vector<16x50xf32>,
    } else {
    }
    return
  }
  func.func @transform_0(%arg0: i32, %arg1: i32, %arg2: i32) -> (i32, i32) {
    %c0_i32 = arith.constant 0 : i32
    return %arg0, %arg2 : i32, i32
  }
  func.func @transform_1(%arg0: i32, %arg1: i32, %arg2: i32) -> (i32, i32) {
    %c0_i32 = arith.constant 0 : i32
    return %arg2, %arg1 : i32, i32
  }
  func.func @transform_2(%arg0: i32, %arg1: i32, %arg2: i32) -> (i32, i32) {
    %c0_i32 = arith.constant 0 : i32
    %c0_i32_0 = arith.constant 0 : i32
    return %c0_i32, %arg1 : i32, i32
  }
  func.func @transform_3(%arg0: i32, %arg1: i32, %arg2: i32) -> (i32, i32) {
    %c0_i32 = arith.constant 0 : i32
    return %arg0, %arg1 : i32, i32
  }
}

</mosaic_0001>

<bundles_post_ra>
// kernel: caption_decoder_forward.15
= control target key start
LH: loop header
LB: loop body
LE: loop exit
PB: predicated region body
PF: predicated region fallthrough
CT: control target
= control target key end

     0   :  { %vm19_vm0 = vcmask 261120   ;;  %v102_v1 = vmov 0.0   ;;  %vm82_vm1 = vcmask 257024   ;;  %s151_s1 = inlined_call_operand.vmem [shape: bf16[32,32], index: 1, kind: input, shape index: {}]   ;;  %s152_s2 = inlined_call_operand.vmem [shape: f32[1,32], index: 2, kind: input, shape index: {}]   ;;  %s153_s0 = inlined_call_operand.vmem [shape: f32[16,32], index: 0, kind: input, shape index: {}]   ;;  %s154_s3 = inlined_call_operand.vmem [shape: bf16[16,32], index: 3, kind: output, shape index: {}]  }
   0x1   :  { %v99_v0 = vld [vmem:[%s151_s1 + $0x8] sm:$0xff]  ;;  %20 = vst.msk [vmem:[#allocation2] sm:$0xff] %vm19_vm0, %v102_v1  ;;  %v98_v3 = vld [vmem:[%s151_s1] sm:$0xff] }
   0x2   :  { %21 = vst.msk [vmem:[#allocation2 + $0x8] sm:$0xff] %vm19_vm0, %v102_v1  ;;  %v49_v2 = vsel %vm19_vm0, %v99_v0, 0  ;;  %v46_v4 = vsel %vm19_vm0, %v98_v3, 0  ;;  %v22_v5 = vld [vmem:[%s153_s0] sm:$0xff]  ;;  %v23_v6 = vld [vmem:[%s153_s0 + $0x8] sm:$0xff] }
   0x3   :  { %57 = vmatpush.bf16.xpose.msra.mxu0 %v49_v2  ;;  %v24_v7 = vpack.c.bf16 %v23_v6, %v22_v5  ;;  %v101_v12 = vld [vmem:[%s152_s2] ss:$0 sm:$0xff] }
   0x8   :  { %v29_v8 = vld [vmem:[#allocation2] sm:$0xff] }
   0x9   :  { %v30_v11 = vld [vmem:[#allocation2 + $0x8] sm:$0xff] }
   0xb   :  { %58 = vmatpush.bf16.xpose.msra.mxu0 %v46_v4 }
  0x12   :  { %97 = vmatmul.msk.bf16.vlgmr.msra.gmra.mxu0 %vm19_vm0, %v24_v7 }
  0x8f   :  { %v60_v9 = vpop.f32.mrf.mxu0 }
  0x90   :  { %v65_v10 = vadd.f32 %v60_v9, %v29_v8 }
  0x92   :  { %67 = vst.msk [vmem:[#allocation2] sm:$0xff] %vm19_vm0, %v65_v10 }
  0x97   :  { %v62_v13 = vpop.f32.mrf.mxu0 }
  0x98   :  { %v66_v14 = vadd.f32 %v62_v13, %v30_v11 }
  0x99   :  { %v72_v15 = vld [vmem:[#allocation2] sm:$0xff] }
  0x9a   :  { %v78_v16 = vadd.f32 %v101_v12, %v72_v15  ;;  %68 = vst.msk [vmem:[#allocation2 + $0x8] sm:$0xff] %vm19_vm0, %v66_v14 }
  0x9c   :  { %v80_v17 = vpack.c.bf16 %v78_v16, %v78_v16 }
  0x9e   :  { %83 = vst.msk [vmem:[%s154_s3] sm:$0xf] %vm82_vm1, %v80_v17 }
  0xa1   :  { %v73_v18 = vld [vmem:[#allocation2 + $0x8] sm:$0xff] }
  0xa2   :  { %v79_v19 = vadd.f32 %v101_v12, %v73_v18 }
  0xa4   :  { %v81_v20 = vpack.c.bf16 %v79_v19, %v79_v19 }
  0xa6   :  { %84 = vst.msk [vmem:[%s154_s3 + $0x4] sm:$0xf] %vm82_vm1, %v81_v20 }

// kernel: caption_decoder_forward.16
= control target key start
LH: loop header
LB: loop body
LE: loop exit
PB: predicated region body
PF: predicated region fallthrough
CT: control target
= control target key end

     0   :  { %vm55_vm0 = vcmask 261120   ;;  %vm19_vm1 = vcmask 523264   ;;  %v133_v3 = vmov 0.0   ;;  %vm103_vm2 = vcmask 519168   ;;  %s190_s1 = inlined_call_operand.vmem [shape: bf16[64,32], index: 1, kind: input, shape index: {}]   ;;  %s191_s2 = inlined_call_operand.vmem [shape: f32[1,64], index: 2, kind: input, shape index: {}]   ;;  %s192_s0 = inlined_call_operand.vmem [shape: f32[16,32], index: 0, kind: input, shape index: {}]   ;;  %s193_s3 = inlined_call_operand.vmem [shape: bf16[16,64], index: 3, kind: output, shape index: {}]  }
   0x1   :  { %v130_v0 = vld [vmem:[%s190_s1 + $0x18] sm:$0xff]  ;;  %v129_v2 = vld [vmem:[%s190_s1 + $0x10] sm:$0xff]  ;;  %20 = vst.msk [vmem:[#allocation2] sm:$0xff] %vm19_vm1, %v133_v3  ;;  %v128_v5 = vld [vmem:[%s190_s1 + $0x8] sm:$0xff] }
   0x2   :  { %v69_v1 = vsel %vm55_vm0, %v130_v0, 0  ;;  %21 = vst.msk [vmem:[#allocation2 + $0x8] sm:$0xff] %vm19_vm1, %v133_v3  ;;  %v66_v4 = vsel %vm55_vm0, %v129_v2, 0  ;;  %v63_v6 = vsel %vm55_vm0, %v128_v5, 0  ;;  %v127_v7 = vld [vmem:[%s190_s1] sm:$0xff]  ;;  %v23_v10 = vld [vmem:[%s192_s0 + $0x8] sm:$0xff] }
   0x3   :  { %75 = vmatpush.bf16.xpose.msra.mxu0 %v69_v1  ;;  %v60_v8 = vsel %vm55_vm0, %v127_v7, 0  ;;  %v22_v9 = vld [vmem:[%s192_s0] sm:$0xff] }
   0x4   :  { %v24_v11 = vpack.c.bf16 %v23_v10, %v22_v9  ;;  %v132_v16 = vld [vmem:[%s191_s2] ss:$0 sm:$0xff] }
   0x8   :  { %v33_v12 = vld [vmem:[#allocation2] sm:$0xff] }
   0x9   :  { %v34_v15 = vld [vmem:[#allocation2 + $0x8] sm:$0xff] }
   0xb   :  { %76 = vmatpush.bf16.xpose.msra.mxu0 %v66_v4 }
  0x13   :  { %77 = vmatpush.bf16.xpose.msra.mxu0 %v63_v6 }
  0x1b   :  { %78 = vmatpush.bf16.xpose.msra.mxu0 %v60_v8 }
  0x22   :  { %126 = vmatmul.msk.bf16.vlgmr.msra.gmra.mxu0 %vm55_vm0, %v24_v11 }
  0x9f   :  { %v80_v13 = vpop.f32.mrf.mxu0 }
  0xa0   :  { %v85_v14 = vadd.f32 %v80_v13, %v33_v12 }
  0xa2   :  { %88 = vst.msk [vmem:[#allocation2] sm:$0xff] %vm19_vm1, %v85_v14 }
  0xa7   :  { %v82_v17 = vpop.f32.mrf.mxu0 }
  0xa8   :  { %v86_v18 = vadd.f32 %v82_v17, %v34_v15 }
  0xa9   :  { %v93_v19 = vld [vmem:[#allocation2] sm:$0xff] }
  0xaa   :  { %v99_v20 = vadd.f32 %v132_v16, %v93_v19  ;;  %89 = vst.msk [vmem:[#allocation2 + $0x8] sm:$0xff] %vm19_vm1, %v86_v18 }
  0xac   :  { %v101_v21 = vpack.c.bf16 %v99_v20, %v99_v20 }
  0xae   :  { %104 = vst.msk [vmem:[%s193_s3] sm:$0xf] %vm103_vm2, %v101_v21 }
  0xb1   :  { %v94_v22 = vld [vmem:[#allocation2 + $0x8] sm:$0xff] }
  0xb2   :  { %v100_v23 = vadd.f32 %v132_v16, %v94_v22 }
  0xb4   :  { %v102_v24 = vpack.c.bf16 %v100_v23, %v100_v23 }
  0xb6   :  { %105 = vst.msk [vmem:[%s193_s3 + $0x4] sm:$0xf] %vm103_vm2, %v102_v24 }

// kernel: caption_decoder_forward.19
= control target key start
LH: loop header
LB: loop body
LE: loop exit
PB: predicated region body
PF: predicated region fallthrough
CT: control target
= control target key end

     0   :  { %vm60_vm0 = vcmask 261120   ;;  %vm19_vm1 = vcmask 523264   ;;  %v157_v3 = vmov 0.0   ;;  %vm22_vm2 = vcmask 519168   ;;  %s225_s1 = inlined_call_operand.vmem [shape: bf16[64,32], index: 1, kind: input, shape index: {}]   ;;  %s226_s0 = inlined_call_operand.vmem [shape: f32[20,32], index: 0, kind: input, shape index: {}]   ;;  %s227_s2 = inlined_call_operand.vmem [shape: f32[1,64], index: 2, kind: input, shape index: {}]   ;;  %s228_s3 = inlined_call_operand.vmem [shape: bf16[20,64], index: 3, kind: output, shape index: {}]  }
   0x1   :  { %v150_v0 = vld [vmem:[%s225_s1 + $0x18] sm:$0xff]  ;;  %v149_v2 = vld [vmem:[%s225_s1 + $0x10] sm:$0xff]  ;;  %20 = vst.msk [vmem:[#allocation2] sm:$0xff] %vm19_vm1, %v157_v3  ;;  %v148_v5 = vld [vmem:[%s225_s1 + $0x8] sm:$0xff]  ;;  %vm123_vm3 = vcmask 517120  }
   0x2   :  { %v77_v1 = vsel %vm60_vm0, %v150_v0, 0  ;;  %21 = vst.msk [vmem:[#allocation2 + $0x8] sm:$0xff] %vm19_vm1, %v157_v3  ;;  %v74_v4 = vsel %vm60_vm0, %v149_v2, 0  ;;  %v71_v6 = vsel %vm60_vm0, %v148_v5, 0  ;;  %v147_v7 = vld [vmem:[%s225_s1] sm:$0xff]  ;;  %v25_v10 = vld [vmem:[%s226_s0 + $0x8] sm:$0xff] }
   0x3   :  { %83 = vmatpush.bf16.xpose.msra.mxu0 %v77_v1  ;;  %151 = vmatpush.bf16.xpose.msra.mxu1 %v77_v1  ;;  %v68_v8 = vsel %vm60_vm0, %v147_v7, 0  ;;  %v24_v9 = vld [vmem:[%s226_s0] sm:$0xff]  ;;  %v26_v11 = vld [vmem:[%s226_s0 + $0x10] sm:$0xf]  ;;  %23 = vst.msk [vmem:[#allocation2 + $0x10] sm:$0xf] %vm22_vm2, %v157_v3 }
   0x4   :  { %v27_v12 = vpack.c.bf16 %v25_v10, %v24_v9  ;;  %v28_v13 = vpack.c.bf16 %v26_v11, %v26_v11  ;;  %v156_v21 = vld [vmem:[%s227_s2] ss:$0 sm:$0xff] }
   0x8   :  { %v37_v14 = vld [vmem:[#allocation2] sm:$0xff] }
   0x9   :  { %v38_v20 = vld [vmem:[#allocation2 + $0x8] sm:$0xff] }
   0xa   :  { %v39_v15 = vld [vmem:[#allocation2 + $0x10] sm:$0xf] }
   0xb   :  { %84 = vmatpush.bf16.xpose.msra.mxu0 %v74_v4  ;;  %152 = vmatpush.bf16.xpose.msra.mxu1 %v74_v4 }
  0x13   :  { %85 = vmatpush.bf16.xpose.msra.mxu0 %v71_v6  ;;  %153 = vmatpush.bf16.xpose.msra.mxu1 %v71_v6 }
  0x1b   :  { %86 = vmatpush.bf16.xpose.msra.mxu0 %v68_v8  ;;  %154 = vmatpush.bf16.xpose.msra.mxu1 %v68_v8 }
  0x22   :  { %145 = vmatmul.msk.bf16.vlgmr.msra.gmra.mxu0 %vm60_vm0, %v27_v12  ;;  %146 = vmatmul.msk.bf16.vlgmr.msra.gmra.mxu1 %vm60_vm0, %v28_v13 }
  0x9f   :  { %v88_v16 = vpop.f32.mrf.mxu0  ;;  %v93_v17 = vpop.f32.mrf.mxu1 }
  0xa0   :  { %v97_v18 = vadd.f32 %v88_v16, %v37_v14  ;;  %v99_v19 = vadd.f32 %v93_v17, %v39_v15 }
  0xa2   :  { %101 = vst.msk [vmem:[#allocation2] sm:$0xff] %vm19_vm1, %v97_v18 }
  0xa3   :  { %104 = vst.msk [vmem:[#allocation2 + $0x10] sm:$0xf] %vm22_vm2, %v99_v19 }
  0xa7   :  { %v90_v22 = vpop.f32.mrf.mxu0  ;;  %v95_v23 = vpop.f32.mrf.mxu1 }
  0xa8   :  { %v98_v24 = vadd.f32 %v90_v22, %v38_v20 }
  0xa9   :  { %v108_v25 = vld [vmem:[#allocation2] sm:$0xff] }
  0xaa   :  { %v110_v26 = vld [vmem:[#allocation2 + $0x10] sm:$0xf]  ;;  %v115_v27 = vadd.f32 %v156_v21, %v108_v25  ;;  %102 = vst.msk [vmem:[#allocation2 + $0x8] sm:$0xff] %vm19_vm1, %v98_v24 }
  0xab   :  { %v117_v28 = vadd.f32 %v156_v21, %v110_v26 }
  0xac   :  { %v118_v29 = vpack.c.bf16 %v115_v27, %v115_v27 }
  0xad   :  { %v120_v30 = vpack.c.bf16 %v117_v28, %v117_v28 }
  0xae   :  { %121 = vst.msk [vmem:[%s228_s3] sm:$0xf] %vm22_vm2, %v118_v29 }
  0xaf   :  { %124 = vst.msk [vmem:[%s228_s3 + $0x8] sm:$0x3] %vm123_vm3, %v120_v30 }
  0xb1   :  { %v109_v31 = vld [vmem:[#allocation2 + $0x8] sm:$0xff] }
  0xb2   :  { %v116_v32 = vadd.f32 %v156_v21, %v109_v31 }
  0xb4   :  { %v119_v33 = vpack.c.bf16 %v116_v32, %v116_v32 }
  0xb6   :  { %122 = vst.msk [vmem:[%s228_s3 + $0x4] sm:$0xf] %vm22_vm2, %v119_v33 }

// kernel: caption_decoder_forward.17
= control target key start
LH: loop header
LB: loop body
LE: loop exit
PB: predicated region body
PF: predicated region fallthrough
CT: control target
= control target key end

     0   :  { %s1412_s24 = smov 0   ;;  %s1414_s25 = smov 0   ;;  %s1678_s0 = inlined_call_operand.vmem [shape: f32[2,8,32], index: 0, kind: input, shape index: {}]   ;;  %s1679_s1 = inlined_call_operand.vmem [shape: bf16[2,8,32], index: 1, kind: input, shape index: {}]   ;;  %s1680_s2 = inlined_call_operand.vmem [shape: bf16[2,8,64], index: 2, kind: input, shape index: {}]   ;;  %s1681_s3 = inlined_call_operand.vmem [shape: bf16[32,32], index: 3, kind: input, shape index: {}]   ;;  %s1682_s4 = inlined_call_operand.vmem [shape: f32[1,32], index: 4, kind: input, shape index: {}]   ;;  %s1683_s5 = inlined_call_operand.vmem [shape: f32[1,32], index: 5, kind: input, shape index: {}]   ;;  %s1684_s6 = inlined_call_operand.vmem [shape: f32[1,32], index: 6, kind: input, shape index: {}]   ;;  %s1685_s7 = inlined_call_operand.vmem [shape: f32[2,8,32], index: 7, kind: output, shape index: {}]  }
   0x1   :  { %s1416_s26 = smov 0  }
   0x2 LB: > { %s29_s27 = sadd.s32 1, %s1356_s25  ;;  %p1255_p0 = scmp.ge.s32.totalorder %s1360_s26, 1  ;;  %s1360_s26 = sphi %s1416_s26, %s17_s26   ;;  %s1356_s25 = sphi %s1414_s25, %s1687_s25   ;;  %s1352_s24 = sphi %s1412_s24, %s1686_s24  }
   0x3   : > { %p31_p1 = scmp.ge.s32.totalorder %s29_s27, 2  ;;  %p278_p2 = scmp.lt.s32.totalorder %s1360_s26, 3 }
   0x5   : > { %s1689_s27 = smov (%p31_p1, %s29_s27), 0  ;;  %p279_p3 = pnand %p1255_p0, %p278_p2 }
   0x6   : > { %p325_p4 = scmp.lt.s32.totalorder (!%p279_p3), %s1352_s24, 1  ;;  %s1362_s12 = smov (!%p279_p3), 104  }
   0x7   : > { %282 = sbr.rel (%p279_p3) target bundleno = 1242 (0x4da), region = 48  ;;  %s1363_s13 = smov (!%p279_p3), 120  }
   0x8   : > { %s1364_s14 = smov (!%p279_p3), 112   ;;  %s1365_s15 = smov (!%p279_p3), 96  }
   0x9   : > { %s1368_s16 = smov (!%p279_p3), 24   ;;  %s1369_s17 = smov (!%p279_p3), 16  }
   0xa   : > { %s1370_s18 = smov (!%p279_p3), 8  }
   0xc   : > { %s1691_s24 = smov (!%p325_p4, %s1352_s24), 1  ;;  %v1366_v4 = vmov 1983009808   ;;  %v1367_v19 = vmov 1934713408   ;;  %vm384_vm0 = vcmask 1047556  }
   0xd   : > { %s1257_s28 = sshll.u32 %s1691_s24, 2  ;;  %v375_v5 = vunpack.c.l.s4 %v1366_v4  ;;  %v389_v20 = vunpack.c.l.s4 %v1367_v19  ;;  %vm719_vm1 = vcmask 64512   ;;  %vm865_vm3 = vcmask 1043456   ;;  %s1256_s23 = sshll.u32 %s1691_s24, 3 }
   0xe   : > { %s342_s8 = scalar_lea.vmem %s1680_s2, %s1257_s28  ;;  %s338_s11 = scalar_lea.vmem %s1679_s1, %s1257_s28  ;;  %vm1086_vm4 = vcmask 261120   ;;  %vm1063_vm5 = vcmask 130048   ;;  %vm1065_vm6 = vcmask 195584  }
   0xf   : > { %v353_v0 = vld [vmem:[%s342_s8] sm:$0xf]  ;;  %v1445_v13 = vunpack.c.0.s8 %v375_v5  ;;  %v1458_v33 = vunpack.c.0.s8 %v389_v20  ;;  %s331_s9 = scalar_lea.vmem %s1678_s0, %s1256_s23 }
  0x10   : > { %481 = vrot.lane.b32.xlu1 %v353_v0, %s1362_s12  ;;  %477 = vrot.lane.b32.xlu0 %v353_v0, %s1363_s13  ;;  %v352_v1 = vld [vmem:[%s338_s11] sm:$0xf]  ;;  %v486_v8 = vshrl.u32 %v353_v0, 16 }
  0x11   : > { %357 = vrot.lane.b32.xlu2 %v352_v1, %s1364_s14  ;;  %v364_v21 = vshrl.u32 %v352_v1, 16 }
  0x18   : > { %479 = vrot.lane.b32.xlu0 %v353_v0, %s1364_s14  ;;  %355 = vrot.lane.b32.xlu1 %v352_v1, %s1363_s13 }
  0x19   : > { %359 = vrot.lane.b32.xlu2 %v352_v1, %s1362_s12 }
  0x20   : > { %597 = vrot.lane.b32.xlu0 %v353_v0, %s1365_s15 }
  0x6b   : > { %v358_v2 = vpop.permute.xlu2 %357 }
  0x6c   : > { %v370_v9 = vshrl.u32 %v358_v2, 16 }
  0x73   : > { %v360_v3 = vpop.permute.xlu2 %359 }
  0x74   : > { %v369_v10 = vpack.i.b16 %v360_v3, %v358_v2  ;;  %v371_v11 = vshrl.u32 %v360_v3, 16 }
  0x76   : > { %v372_v16 = vpack.i.b16 %v371_v11, %v370_v9  ;;  %v382_v17 = vperm.slane %v369_v10, %v1445_v13 }
  0x78   : > { %v383_v25 = vrot.slane %v382_v17, 4  ;;  %v409_v26 = vperm.slane %v372_v16, %v1445_v13 }
  0x7a   : > { %v410_v39 = vrot.slane %v409_v26, 4 }
  0x82   : > { %v1440_v6 = vpop.permute.xlu1 %481  ;;  %v1442_v7 = vpop.permute.xlu0 %477 }
  0x83   : > { %v487_v12 = vshrl.u32 %v1442_v7, 16  ;;  %v485_v14 = vpack.i.b16 %v1442_v7, %v353_v0  ;;  %v493_v22 = vshrl.u32 %v1440_v6, 16 }
  0x85   : > { %v488_v15 = vpack.i.b16 %v487_v12, %v486_v8  ;;  %v499_v18 = vperm.slane %v485_v14, %v1445_v13 }
  0x87   : > { %v525_v23 = vperm.slane %v488_v15, %v1445_v13  ;;  %v507_v32 = vrot.slane %v499_v18, 4 }
  0x89   : > { %v533_v38 = vrot.slane %v525_v23, 4 }
  0x8a   : > { %v1452_v24 = vpop.permute.xlu0 %479  ;;  %v356_v27 = vpop.permute.xlu1 %355 }
  0x8b   : > { %v491_v28 = vpack.i.b16 %v1440_v6, %v1452_v24  ;;  %v492_v29 = vshrl.u32 %v1452_v24, 16  ;;  %v363_v30 = vpack.i.b16 %v356_v27, %v352_v1  ;;  %v365_v31 = vshrl.u32 %v356_v27, 16 }
  0x8d   : > { %v494_v34 = vpack.i.b16 %v493_v22, %v492_v29  ;;  %v504_v35 = vperm.slane %v491_v28, %v1445_v13  ;;  %v366_v36 = vpack.i.b16 %v365_v31, %v364_v21  ;;  %v377_v37 = vperm.slane %v363_v30, %v1445_v13 }
  0x8f   : > { %v505_v40 = vrot.slane %v504_v35, 4  ;;  %v508_v41 = vsel %vm384_vm0, %v504_v35, %v507_v32  ;;  %v530_v42 = vperm.slane %v494_v34, %v1445_v13  ;;  %v385_v43 = vsel %vm384_vm0, %v383_v25, %v377_v37 }
  0x90   : > { %v516_v44 = vperm.slane %v508_v41, %v1458_v33  ;;  %v386_v45 = vrot.slane %v377_v37, 4  ;;  %v391_v46 = vperm.slane %v385_v43, %v1458_v33  ;;  %v404_v50 = vperm.slane %v366_v36, %v1445_v13 }
  0x91   : > { %v506_v47 = vsel %vm384_vm0, %v505_v40, %v499_v18  ;;  %v531_v48 = vrot.slane %v530_v42, 4  ;;  %v534_v49 = vsel %vm384_vm0, %v530_v42, %v533_v38 }
  0x92   : > { %v512_v51 = vperm.slane %v506_v47, %v1458_v33  ;;  %v519_v52 = vrot.slane %v516_v44, 4  ;;  %v542_v53 = vperm.slane %v534_v49, %v1458_v33  ;;  %v387_v54 = vsel %vm384_vm0, %v382_v17, %v386_v45 }
  0x93   : > { %v532_v55 = vsel %vm384_vm0, %v531_v48, %v525_v23  ;;  %v395_v56 = vperm.slane %v387_v54, %v1458_v33  ;;  %v411_v57 = vsel %vm384_vm0, %v410_v39, %v404_v50  ;;  %v396_v63 = vrot.slane %v391_v46, 4 }
  0x94   : > { %v517_v58 = vrot.slane %v512_v51, 4  ;;  %v520_v59 = vsel %vm384_vm0, 0, %v519_v52  ;;  %v538_v60 = vperm.slane %v532_v55, %v1458_v33  ;;  %v545_v61 = vrot.slane %v542_v53, 4 }
  0x95   : > { %v552_v62 = vrot.slane %v520_v59, 4  ;;  %v398_v0 = vrot.slane %v395_v56, 4  ;;  %v412_v1 = vrot.slane %v404_v50, 4  ;;  %v417_v4 = vperm.slane %v411_v57, %v1458_v33 }
  0x96   : > { %v543_v2 = vrot.slane %v538_v60, 4  ;;  %v546_v3 = vsel %vm384_vm0, 0, %v545_v61  ;;  %v518_v5 = vsel %vm384_vm0, 0, %v517_v58  ;;  %v397_v15 = vsel %vm384_vm0, 0, %v396_v63 }
  0x97   : > { %v571_v8 = vrot.slane %v546_v3, 4  ;;  %v399_v9 = vsel %vm384_vm0, 0, %v398_v0  ;;  %v413_v10 = vsel %vm384_vm0, %v409_v26, %v412_v1  ;;  %v547_v16 = vsel %vm384_vm0, %v519_v52, %v512_v51 }
  0x98   : > { %v421_v11 = vperm.slane %v413_v10, %v1458_v33  ;;  %v431_v12 = vrot.slane %v399_v9, 4  ;;  %v544_v14 = vsel %vm384_vm0, 0, %v543_v2  ;;  %v553_v17 = vsel %vm384_vm0, %v552_v62, %v518_v5 }
  0x99   : > { %v572_v18 = vsel %vm384_vm0, %v571_v8, %v544_v14  ;;  %v422_v19 = vrot.slane %v417_v4, 4  ;;  %v557_v21 = vperm.slane %v553_v17, %v1445_v13  ;;  %v566_v22 = vsel %vm384_vm0, %v545_v61, %v538_v60 }
  0x9a   : > { %v424_v20 = vrot.slane %v421_v11, 4  ;;  %v426_v23 = vsel %vm384_vm0, %v398_v0, %v391_v46  ;;  %v576_v25 = vperm.slane %v572_v18, %v1445_v13  ;;  %v432_v26 = vsel %vm384_vm0, %v431_v12, %v397_v15 }
  0x9b   : > { %v551_v28 = vperm.slane %v547_v16, %v1445_v13  ;;  %v558_v29 = vrot.slane %v557_v21, 4  ;;  %v436_v30 = vperm.slane %v432_v26, %v1445_v13  ;;  %v570_v32 = vperm.slane %v566_v22, %v1445_v13 }
  0x9c   : > { %v425_v27 = vsel %vm384_vm0, 0, %v424_v20  ;;  %v577_v34 = vrot.slane %v576_v25, 4  ;;  %v423_v35 = vsel %vm384_vm0, 0, %v422_v19  ;;  %v430_v37 = vperm.slane %v426_v23, %v1445_v13 }
  0x9d   : > { %v450_v31 = vrot.slane %v425_v27, 4  ;;  %v559_v36 = vsel %vm384_vm0, %v558_v29, %v551_v28  ;;  %v437_v38 = vrot.slane %v436_v30, 4  ;;  %v445_v44 = vsel %vm384_vm0, %v424_v20, %v417_v4 }
  0x9e   : > { %v563_v39 = vperm.slane %v559_v36, %v1458_v33  ;;  %v578_v40 = vsel %vm384_vm0, %v577_v34, %v570_v32  ;;  %v449_v54 = vperm.slane %v445_v44, %v1445_v13  ;;  %v801_v18 = vlaneseq  ;;  %v598_v44 = vpop.permute.xlu0 %597 }
  0x9f   : > { %v451_v41 = vsel %vm384_vm0, %v450_v31, %v423_v35  ;;  %v582_v42 = vperm.slane %v578_v40, %v1458_v33  ;;  %v438_v43 = vsel %vm384_vm0, %v437_v38, %v430_v37 }
  0xa0   : > { %v455_v45 = vperm.slane %v451_v41, %v1445_v13  ;;  %v588_v46 = vshrl.u32 %v563_v39, 16  ;;  %v564_v47 = vrot.slane %v563_v39, 4  ;;  %v442_v48 = vperm.slane %v438_v43, %v1458_v33 }
  0xa1   : > { %v587_v49 = vpack.i.b16 %v582_v42, %v563_v39  ;;  %v589_v50 = vshrl.u32 %v582_v42, 16  ;;  %v583_v51 = vrot.slane %v582_v42, 4  ;;  %v802_v19 = vshrl.u32 %v801_v18, 7 }
  0xa2   : > { %v456_v52 = vrot.slane %v455_v45, 4  ;;  %v565_v53 = vsel %vm384_vm0, 0, %v564_v47  ;;  %v443_v0 = vrot.slane %v442_v48, 4  ;;  %v467_v9 = vshrl.u32 %v442_v48, 16 }
  0xa3   : > { %v724_v55 = vsel %vm719_vm1, %v587_v49, 0  ;;  %v590_v56 = vpack.i.b16 %v589_v50, %v588_v46  ;;  %v584_v57 = vsel %vm384_vm0, 0, %v583_v51  ;;  %v594_v59 = vshrl.u32 %v565_v53, 16 }
  0xa4   : > { %733 = vmatpush.bf16.xpose.msra.mxu0 %v724_v55  ;;  %v593_v58 = vpack.i.b16 %v584_v57, %v565_v53  ;;  %v595_v60 = vshrl.u32 %v584_v57, 16  ;;  %v457_v61 = vsel %vm384_vm0, %v456_v52, %v449_v54  ;;  %v444_v10 = vsel %vm384_vm0, 0, %v443_v0 }
  0xa5   : > { %v743_v62 = vsel %vm719_vm1, %v590_v56, 0  ;;  %v461_v63 = vperm.slane %v457_v61, %v1458_v33  ;;  %v473_v16 = vshrl.u32 %v444_v10, 16  ;;  %v806_v20 = vand.u32 127, %v801_v18 }
  0xa6   : > { %752 = vmatpush.bf16.xpose.msra.mxu1 %v743_v62  ;;  %v762_v1 = vsel %vm719_vm1, %v593_v58, 0  ;;  %v596_v2 = vpack.i.b16 %v595_v60, %v594_v59 }
  0xa7   : > { %771 = vmatpush.bf16.xpose.msra.mxu2 %v762_v1  ;;  %v468_v3 = vshrl.u32 %v461_v63, 16  ;;  %v462_v4 = vrot.slane %v461_v63, 4  ;;  %v466_v8 = vpack.i.b16 %v461_v63, %v442_v48  ;;  %vm807_vm2 = vcmp.gt.s32.totalorder %v806_v20, %v802_v19 }
  0xa8   : > { %v781_v5 = vsel %vm719_vm1, %v596_v2, 0 }
  0xa9   : > { %790 = vmatpush.bf16.xpose.msra.mxu3 %v781_v5  ;;  %v463_v11 = vsel %vm384_vm0, 0, %v462_v4  ;;  %v469_v14 = vpack.i.b16 %v468_v3, %v467_v9  ;;  %v608_v5 = vshrl.u32 %v598_v44, 16 }
  0xaa   : > { %v474_v12 = vshrl.u32 %v463_v11, 16  ;;  %v472_v15 = vpack.i.b16 %v463_v11, %v444_v10 }
  0xab   : > { %1260 = vmatmul.msk.bf16.vlgmr.msra.gmra.mxu0 %vm719_vm1, %v466_v8 }
  0xac   : > { %v475_v17 = vpack.i.b16 %v474_v12, %v473_v16 }
  0xad   : > { %1261 = vmatmul.msk.bf16.vlgmr.msra.gmra.mxu1 %vm719_vm1, %v469_v14 }
  0xae   : > { %1262 = vmatmul.msk.bf16.vlgmr.msra.gmra.mxu2 %vm719_vm1, %v472_v15 }
  0xb0   : > { %1263 = vmatmul.msk.bf16.vlgmr.msra.gmra.mxu3 %vm719_vm1, %v475_v17 }
 0x128   : > { %v735_v21 = vpop.f32.mrf.mxu0 }
 0x129   : > { %v796_v22 = vmul.f32 0.35355338, %v735_v21 }
 0x12a   : > { %v754_v23 = vpop.f32.mrf.mxu1 }
 0x12b   : > { %v810_v25 = vsel %vm807_vm2, -1e+09, %v796_v22  ;;  %v797_v27 = vmul.f32 0.35355338, %v754_v23 }
 0x12c   : > { %v814_v26 = vsel %vm719_vm1, %v810_v25, -inf }
 0x12d   : > { %815 = vmax.xlane.f32.xlu2 %v814_v26  ;;  %v811_v30 = vsel %vm807_vm2, -1e+09, %v797_v27 }
 0x12e   : > { %v817_v36 = vsel %vm719_vm1, %v811_v30, -inf }
 0x130   : > { %v737_v28 = vpop.f32.mrf.mxu0 }
 0x131   : > { %v773_v29 = vpop.f32.mrf.mxu2 }
 0x132   : > { %v798_v31 = vmul.f32 0.35355338, %v773_v29  ;;  %v756_v32 = vpop.f32.mrf.mxu1 }
 0x133   : > { %v792_v34 = vpop.f32.mrf.mxu3 }
 0x134   : > { %v799_v35 = vmul.f32 0.35355338, %v792_v34  ;;  %v812_v37 = vsel %vm807_vm2, -1e+09, %v798_v31 }
 0x135   : > { %818 = vmax.xlane.f32.xlu2 %v817_v36  ;;  %v820_v38 = vsel %vm719_vm1, %v812_v37, -inf }
 0x136   : > { %821 = vmax.xlane.f32.xlu0 %v820_v38  ;;  %v813_v39 = vsel %vm807_vm2, -1e+09, %v799_v35 }
 0x137   : > { %v823_v40 = vsel %vm719_vm1, %v813_v39, -inf }
 0x138   : > { %824 = vmax.xlane.f32.xlu1 %v823_v40 }
 0x139   : > { %v775_v41 = vpop.f32.mrf.mxu2 }
 0x13b   : > { %v794_v42 = vpop.f32.mrf.mxu3 }
 0x14a   : > { %603 = vrot.lane.b32.xlu0 %v1440_v6, %s1365_s15 }
 0x14d   : > { %601 = vrot.lane.b32.xlu2 %v1452_v24, %s1365_s15 }
 0x151   : > { %599 = vrot.lane.b32.xlu1 %v1442_v7, %s1365_s15 }
 0x1a0   : > { %v816_v43 = vpop.xlane.xlu2 %815 }
 0x1a1   : > { %v826_v45 = vsub.f32 %v810_v25, %v816_v43 }
 0x1a3   : > { %v830_v46 = vmul.f32 1.442695, %v826_v45 }
 0x1a5   : > { %1318 = vpow2.f32 %v830_v46 }
 0x1a8   : > { %v819_v47 = vpop.xlane.xlu2 %818 }
 0x1a9   : > { %v822_v48 = vpop.xlane.xlu0 %821  ;;  %v827_v52 = vsub.f32 %v811_v30, %v819_v47 }
 0x1aa   : > { %v828_v49 = vsub.f32 %v812_v37, %v822_v48 }
 0x1ab   : > { %v1538_v50 = vpop.eup %1318  ;;  %v825_v51 = vpop.xlane.xlu1 %824  ;;  %v832_v54 = vmul.f32 1.442695, %v827_v52 }
 0x1ac   : > { %v834_v53 = vmul.f32 1.442695, %v828_v49  ;;  %v829_v6 = vsub.f32 %v813_v39, %v825_v51  ;;  %v838_v24 = vsel %vm719_vm1, %v1538_v50, 0.0 }
 0x1ad   : > { %839 = vadd.xlane.f32.xlu2 %v838_v24 }
 0x1ae   : > { %1320 = vpow2.f32 %v834_v53  ;;  %v836_v7 = vmul.f32 1.442695, %v829_v6 }
 0x1b0   : > { %1322 = vpow2.f32 %v836_v7  ;;  %v602_v60 = vpop.permute.xlu2 %601 }
 0x1b1   : > { %1324 = vpow2.f32 %v832_v54  ;;  %v614_v0 = vshrl.u32 %v602_v60, 16 }
 0x1b4   : > { %v1542_v55 = vpop.eup %1320 }
 0x1b5   : > { %v844_v56 = vsel %vm719_vm1, %v1542_v55, 0.0 }
 0x1b6   : > { %v1546_v57 = vpop.eup %1322  ;;  %845 = vadd.xlane.f32.xlu1 %v844_v56 }
 0x1b7   : > { %v847_v58 = vsel %vm719_vm1, %v1546_v57, 0.0  ;;  %v1550_v59 = vpop.eup %1324 }
 0x1b8   : > { %848 = vadd.xlane.f32.xlu0 %v847_v58  ;;  %v841_v63 = vsel %vm719_vm1, %v1550_v59, 0.0 }
 0x1bc   : > { %v604_v61 = vpop.permute.xlu0 %603 }
 0x1bd   : > { %v615_v62 = vshrl.u32 %v604_v61, 16  ;;  %v613_v1 = vpack.i.b16 %v604_v61, %v602_v60 }
 0x1be   : > { %842 = vadd.xlane.f32.xlu1 %v841_v63 }
 0x1bf   : > { %v616_v2 = vpack.i.b16 %v615_v62, %v614_v0  ;;  %v626_v3 = vperm.slane %v613_v1, %v1445_v13 }
 0x1c1   : > { %v652_v8 = vperm.slane %v616_v2, %v1445_v13  ;;  %v627_v11 = vrot.slane %v626_v3, 4 }
 0x1c3   : > { %v600_v4 = vpop.permute.xlu1 %599  ;;  %v653_v15 = vrot.slane %v652_v8, 4 }
 0x1c4   : > { %v607_v9 = vpack.i.b16 %v600_v4, %v598_v44  ;;  %v609_v10 = vshrl.u32 %v600_v4, 16 }
 0x1c6   : > { %v610_v12 = vpack.i.b16 %v609_v10, %v608_v5  ;;  %v621_v14 = vperm.slane %v607_v9, %v1445_v13 }
 0x1c8   : > { %v628_v16 = vsel %vm384_vm0, %v627_v11, %v621_v14  ;;  %v629_v17 = vrot.slane %v621_v14, 4  ;;  %v647_v18 = vperm.slane %v610_v12, %v1445_v13 }
 0x1c9   : > { %v634_v19 = vperm.slane %v628_v16, %v1458_v33 }
 0x1ca   : > { %v630_v20 = vsel %vm384_vm0, %v626_v3, %v629_v17  ;;  %v654_v21 = vsel %vm384_vm0, %v653_v15, %v647_v18  ;;  %v655_v22 = vrot.slane %v647_v18, 4 }
 0x1cb   : > { %v638_v23 = vperm.slane %v630_v20, %v1458_v33  ;;  %v660_v25 = vperm.slane %v654_v21, %v1458_v33  ;;  %v639_v27 = vrot.slane %v634_v19, 4 }
 0x1cc   : > { %v656_v26 = vsel %vm384_vm0, %v652_v8, %v655_v22 }
 0x1cd   : > { %v641_v28 = vrot.slane %v638_v23, 4  ;;  %v664_v29 = vperm.slane %v656_v26, %v1458_v33  ;;  %v665_v31 = vrot.slane %v660_v25, 4  ;;  %v640_v35 = vsel %vm384_vm0, 0, %v639_v27 }
 0x1cf   : > { %v642_v30 = vsel %vm384_vm0, 0, %v641_v28  ;;  %v667_v32 = vrot.slane %v664_v29, 4  ;;  %v669_v38 = vsel %vm384_vm0, %v641_v28, %v634_v19  ;;  %v666_v40 = vsel %vm384_vm0, 0, %v665_v31 }
 0x1d0   : > { %v674_v34 = vrot.slane %v642_v30, 4  ;;  %v673_v44 = vperm.slane %v669_v38, %v1445_v13 }
 0x1d1   : > { %v668_v36 = vsel %vm384_vm0, 0, %v667_v32  ;;  %v688_v42 = vsel %vm384_vm0, %v667_v32, %v660_v25 }
 0x1d2   : > { %v693_v37 = vrot.slane %v668_v36, 4  ;;  %v675_v39 = vsel %vm384_vm0, %v674_v34, %v640_v35  ;;  %v692_v48 = vperm.slane %v688_v42, %v1445_v13 }
 0x1d3   : > { %v679_v41 = vperm.slane %v675_v39, %v1445_v13 }
 0x1d4   : > { %v694_v43 = vsel %vm384_vm0, %v693_v37, %v666_v40 }
 0x1d5   : > { %v680_v45 = vrot.slane %v679_v41, 4  ;;  %v698_v46 = vperm.slane %v694_v43, %v1445_v13 }
 0x1d7   : > { %v681_v47 = vsel %vm384_vm0, %v680_v45, %v673_v44  ;;  %v699_v49 = vrot.slane %v698_v46, 4 }
 0x1d8   : > { %v685_v51 = vperm.slane %v681_v47, %v1458_v33 }
 0x1d9   : > { %v700_v52 = vsel %vm384_vm0, %v699_v49, %v692_v48 }
 0x1da   : > { %v704_v53 = vperm.slane %v700_v52, %v1458_v33  ;;  %v686_v6 = vrot.slane %v685_v51, 4  ;;  %v710_v24 = vshrl.u32 %v685_v51, 16 }
 0x1dc   : > { %v709_v7 = vpack.i.b16 %v704_v53, %v685_v51  ;;  %v711_v54 = vshrl.u32 %v704_v53, 16  ;;  %v687_v56 = vsel %vm384_vm0, 0, %v686_v6  ;;  %v705_v58 = vrot.slane %v704_v53, 4 }
 0x1dd   : > { %v716_v0 = vshrl.u32 %v687_v56, 16 }
 0x1de   : > { %v867_v60 = vsel %vm865_vm3, %v709_v7, 0  ;;  %v712_v61 = vpack.i.b16 %v711_v54, %v710_v24  ;;  %v706_v62 = vsel %vm384_vm0, 0, %v705_v58 }
 0x1df   : > { %876 = vmatpush.bf16.msrb.mxu0 %v867_v60  ;;  %v715_v63 = vpack.i.b16 %v706_v62, %v687_v56  ;;  %v717_v1 = vshrl.u32 %v706_v62, 16 }
 0x1e0   : > { %v886_v2 = vsel %vm865_vm3, %v712_v61, 0 }
 0x1e1   : > { %895 = vmatpush.bf16.msrb.mxu1 %v886_v2  ;;  %v905_v3 = vsel %vm865_vm3, %v715_v63, 0  ;;  %v718_v4 = vpack.i.b16 %v717_v1, %v716_v0 }
 0x1e2   : > { %914 = vmatpush.bf16.msrb.mxu2 %v905_v3 }
 0x1e3   : > { %v924_v5 = vsel %vm865_vm3, %v718_v4, 0 }
 0x1e4   : > { %933 = vmatpush.bf16.msrb.mxu3 %v924_v5 }
 0x220   : > { %v840_v8 = vpop.xlane.xlu2 %839 }
 0x221   : > { %1326 = vrcp.f32 %v840_v8 }
 0x227   : > { %v1327_v9 = vpop.eup %1326 }
 0x228   : > { %v854_v10 = vmul.f32 %v1327_v9, %v1538_v50 }
 0x229   : > { %v846_v11 = vpop.xlane.xlu1 %845 }
 0x22a   : > { %1328 = vrcp.f32 %v846_v11  ;;  %v858_v12 = vpack.c.bf16 %v854_v10, %v854_v10 }
 0x22b   : > { %v849_v14 = vpop.xlane.xlu0 %848 }
 0x22c   : > { %1330 = vrcp.f32 %v849_v14  ;;  %1264 = vmatmul.msk.bf16.vlgmr.msrb.gmra.mxu0 %vm719_vm1, %v858_v12 }
 0x230   : > { %v1329_v15 = vpop.eup %1328 }
 0x231   : > { %v856_v16 = vmul.f32 %v1329_v15, %v1542_v55  ;;  %v843_v17 = vpop.xlane.xlu1 %842 }
 0x232   : > { %v1331_v18 = vpop.eup %1330  ;;  %1332 = vrcp.f32 %v843_v17 }
 0x233   : > { %v857_v19 = vmul.f32 %v1331_v18, %v1546_v57  ;;  %v860_v20 = vpack.c.bf16 %v856_v16, %v856_v16 }
 0x235   : > { %1266 = vmatmul.msk.bf16.vlgmr.msrb.gmra.mxu2 %vm719_vm1, %v860_v20  ;;  %v861_v21 = vpack.c.bf16 %v857_v19, %v857_v19 }
 0x237   : > { %1267 = vmatmul.msk.bf16.vlgmr.msrb.gmra.mxu3 %vm719_vm1, %v861_v21 }
 0x238   : > { %v1333_v50 = vpop.eup %1332 }
 0x239   : > { %v855_v22 = vmul.f32 %v1333_v50, %v1550_v59 }
 0x23b   : > { %v859_v23 = vpack.c.bf16 %v855_v22, %v855_v22 }
 0x23d   : > { %1265 = vmatmul.msk.bf16.vlgmr.msrb.gmra.mxu1 %vm719_vm1, %v859_v23 }
 0x2a9   : > { %v878_v25 = vpop.f32.mrf.mxu0 }
 0x2aa   : > { %v942_v55 = vrot.slane %v878_v25, 4 }
 0x2b1   : > { %v880_v26 = vpop.f32.mrf.mxu0 }
 0x2b8   : > { %v916_v27 = vpop.f32.mrf.mxu2 }
 0x2b9   : > { %v939_v28 = vrot.slane %v916_v27, 4  ;;  %v943_v29 = vsel %vm384_vm0, %v916_v27, %v942_v55 }
 0x2ba   : > { %v951_v57 = vperm.slane %v943_v29, %v1445_v13  ;;  %v897_v30 = vpop.f32.mrf.mxu1  ;;  %v935_v31 = vpop.f32.mrf.mxu3 }
 0x2bb   : > { %v941_v32 = vsel %vm384_vm0, %v939_v28, %v878_v25  ;;  %v954_v34 = vrot.slane %v897_v30, 4  ;;  %v952_v35 = vrot.slane %v935_v31, 4 }
 0x2bc   : > { %v947_v59 = vperm.slane %v941_v32, %v1445_v13  ;;  %v978_v39 = vrot.slane %v951_v57, 4 }
 0x2bd   : > { %v953_v36 = vsel %vm384_vm0, %v952_v35, %v897_v30  ;;  %v955_v37 = vsel %vm384_vm0, %v935_v31, %v954_v34  ;;  %v1279_v31 = vld [vmem:[%s1681_s3] sm:$0xff] }
 0x2be   : > { %v966_v38 = vrot.slane %v947_v59, 4  ;;  %v959_v40 = vperm.slane %v953_v36, %v1445_v13  ;;  %v963_v41 = vperm.slane %v955_v37, %v1445_v13  ;;  %v1091_v32 = vsel %vm1086_vm4, %v1279_v31, 0 }
 0x2c0   : > { %v964_v42 = vrot.slane %v959_v40, 4  ;;  %v967_v43 = vsel %vm384_vm0, %v959_v40, %v966_v38  ;;  %v976_v44 = vrot.slane %v963_v41, 4  ;;  %v979_v45 = vsel %vm384_vm0, %v963_v41, %v978_v39  ;;  %v918_v46 = vpop.f32.mrf.mxu2  ;;  %v1315_v40 = vld [vmem:[%s1682_s4] ss:$0 sm:$0xff] }
 0x2c1   : > { %v975_v47 = vperm.slane %v967_v43, %v1458_v33  ;;  %v987_v48 = vperm.slane %v979_v45, %v1458_v33 }
 0x2c2   : > { %v965_v49 = vsel %vm384_vm0, %v964_v42, %v947_v59  ;;  %v977_v51 = vsel %vm384_vm0, %v976_v44, %v951_v57  ;;  %v899_v52 = vpop.f32.mrf.mxu1  ;;  %v937_v53 = vpop.f32.mrf.mxu3  ;;  %v351_v42 = vld [vmem:[%s331_s9] sm:$0xff] }
 0x2c3   : > { %v971_v6 = vperm.slane %v965_v49, %v1458_v33  ;;  %v983_v24 = vperm.slane %v977_v51, %v1458_v33  ;;  %v990_v7 = vrot.slane %v975_v47, 4  ;;  %v994_v54 = vrot.slane %v987_v48, 4 }
 0x2c4   : > { %v1371_v47 = vmov 32.0  }
 0x2c5   : > { %v988_v56 = vrot.slane %v971_v6, 4  ;;  %v991_v58 = vsel %vm384_vm0, 0.0, %v990_v7  ;;  %v992_v60 = vrot.slane %v983_v24, 4  ;;  %v995_v61 = vsel %vm384_vm0, 0.0, %v994_v54 }
 0x2c6   : > { %v1001_v62 = vrot.slane %v991_v58, 4  ;;  %v1007_v63 = vsel %vm384_vm0, %v994_v54, %v983_v24  ;;  %v1012_v0 = vrot.slane %v995_v61, 4  ;;  %v996_v1 = vsel %vm384_vm0, %v990_v7, %v971_v6 }
 0x2c7   : > { %v993_v2 = vsel %vm384_vm0, 0.0, %v992_v60  ;;  %v989_v3 = vsel %vm384_vm0, 0.0, %v988_v56  ;;  %v1000_v4 = vperm.slane %v996_v1, %v1445_v13  ;;  %v1011_v5 = vperm.slane %v1007_v63, %v1445_v13 }
 0x2c8   : > { %v1002_v8 = vsel %vm384_vm0, %v1001_v62, %v989_v3  ;;  %v1013_v9 = vsel %vm384_vm0, %v1012_v0, %v993_v2  ;;  %1334 = vrcp.f32 %v1371_v47 }
 0x2c9   : > { %v1006_v10 = vperm.slane %v1002_v8, %v1445_v13  ;;  %v1017_v11 = vperm.slane %v1013_v9, %v1445_v13  ;;  %v1020_v12 = vrot.slane %v1000_v4, 4  ;;  %v1032_v14 = vrot.slane %v1011_v5, 4  ;;  %v1317_v9 = vld [vmem:[%s1684_s6] ss:$0 sm:$0xff] }
 0x2cb   : > { %v1021_v15 = vsel %vm384_vm0, %v1006_v10, %v1020_v12  ;;  %v1033_v16 = vsel %vm384_vm0, %v1017_v11, %v1032_v14  ;;  %v1018_v17 = vrot.slane %v1006_v10, 4  ;;  %v1030_v18 = vrot.slane %v1017_v11, 4 }
 0x2cc   : > { %v1029_v19 = vperm.slane %v1021_v15, %v1458_v33  ;;  %v1041_v20 = vperm.slane %v1033_v16, %v1458_v33 }
 0x2cd   : > { %v1019_v21 = vsel %vm384_vm0, %v1018_v17, %v1000_v4  ;;  %v1031_v50 = vsel %vm384_vm0, %v1030_v18, %v1011_v5  ;;  %v1316_v5 = vld [vmem:[%s1683_s5] ss:$0 sm:$0xff] }
 0x2ce   : > { %v1048_v22 = vrot.slane %v1029_v19, 4  ;;  %v1046_v23 = vrot.slane %v1041_v20, 4  ;;  %v1025_v13 = vperm.slane %v1019_v21, %v1458_v33  ;;  %v1037_v25 = vperm.slane %v1031_v50, %v1458_v33  ;;  %v1280_v33 = vld [vmem:[%s1681_s3 + $0x8] sm:$0xff]  ;;  %v1335_v48 = vpop.eup %1334 }
 0x2cf   : > { %v1094_v30 = vsel %vm1086_vm4, %v1280_v33, 0  ;;  %v1116_v49 = vmul.f32 32.0, %v1335_v48  ;;  %vm1120_vm7 = vweird.f32 %v1335_v48 }
 0x2d0   : > { %v1049_v26 = vsel %vm384_vm0, %v1041_v20, %v1048_v22  ;;  %v1047_v55 = vsel %vm384_vm0, %v1046_v23, %v1029_v19  ;;  %v1042_v27 = vrot.slane %v1037_v25, 4  ;;  %v1044_v28 = vrot.slane %v1025_v13, 4  ;;  %1102 = vmatpush.bf16.xpose.msra.mxu0 %v1094_v30 }
 0x2d1   : > { %1059 = vrot.lane.b32.xlu1 %v1049_v26, %s1368_s16  ;;  %1055 = vrot.lane.b32.xlu2 %v1047_v55, %s1369_s17  ;;  %v1117_v51 = vsub.f32 1.0, %v1116_v49  ;;  %s349_s16 = scalar_lea.vmem %s1685_s7, %s1256_s23 }
 0x2d2   : > { %v1045_v29 = vsel %vm384_vm0, %v1037_v25, %v1044_v28  ;;  %v1043_v57 = vsel %vm384_vm0, %v1042_v27, %v1025_v13 }
 0x2d3   : > { %1051 = vrot.lane.b32.xlu0 %v1045_v29, %s1370_s18  ;;  %v1118_v52 = vmul.f32 %v1335_v48, %v1117_v51 }
 0x2d5   : > { %v1119_v53 = vadd.f32 %v1335_v48, %v1118_v52 }
 0x2d7   : > { %v1121_v6 = vsel %vm1120_vm7, %v1335_v48, %v1119_v53 }
 0x2d8   : > { %1103 = vmatpush.bf16.xpose.msra.mxu0 %v1091_v32 }
 0x32b   : > { %v1056_v35 = vpop.permute.xlu2 %1055 }
 0x343   : > { %v1060_v36 = vpop.permute.xlu1 %1059 }
 0x345   : > { %v1052_v34 = vpop.permute.xlu0 %1051 }
 0x346   : > { %v1062_v59 = vsel %vm719_vm1, %v1043_v57, %v1052_v34 }
 0x347   : > { %v1064_v37 = vsel %vm1063_vm5, %v1062_v59, %v1056_v35 }
 0x348   : > { %v1066_v38 = vsel %vm1065_vm6, %v1064_v37, %v1060_v36 }
 0x349   : > { %v1067_v39 = vpack.c.bf16 %v1066_v38, %v1066_v38 }
 0x34b   : > { %1276 = vmatmul.msk.bf16.vlgmr.msra.gmra.mxu0 %vm1086_vm4, %v1067_v39 }
 0x3c8   : > { %v1105_v41 = vpop.f32.mrf.mxu0 }
 0x3c9   : > { %v1106_v43 = vadd.f32 %v1315_v40, %v1105_v41 }
 0x3cb   : > { %v1109_v44 = vadd.f32 %v1106_v43, %v351_v42 }
 0x3cd   : > { %v1112_v45 = vsel %vm1086_vm4, %v1109_v44, 0.0 }
 0x3ce   : > { %1113 = vadd.xlane.f32.xlu0 %v1112_v45 }
 0x3d0   : > { %v1107_v46 = vpop.f32.mrf.mxu0 }
 0x441   : > { %v1114_v24 = vpop.xlane.xlu0 %1113 }
 0x442   : > { %v1122_v7 = vmul.f32 %v1121_v6, %v1114_v24 }
 0x444   : > { %v1123_v54 = vsub.f32 %v1109_v44, %v1122_v7 }
 0x446   : > { %v1124_v56 = vmul.f32 %v1123_v54, %v1123_v54 }
 0x448   : > { %v1125_v58 = vsel %vm1086_vm4, %v1124_v56, 0.0 }
 0x449   : > { %1126 = vadd.xlane.f32.xlu2 %v1125_v58 }
 0x4bc   : > { %v1127_v60 = vpop.xlane.xlu2 %1126 }
 0x4bd   : > { %v1128_v61 = vmul.f32 %v1127_v60, %v1121_v6 }
 0x4bf   : > { %v1129_v62 = vadd.f32 1e-05, %v1128_v61 }
 0x4c1   : > { %1336 = vrsqrt.f32 %v1129_v62  ;;  %vm1136_vm9 = vweird.f32 %v1129_v62 }
 0x4c7   : > { %v1337_v63 = vpop.eup %1336 }
 0x4c8   : > { %v1131_v0 = vmul.f32 %v1337_v63, %v1129_v62  ;;  %vm1137_vm8 = vweird.f32 %v1337_v63 }
 0x4c9   : > { %vm1138_vm10 = vmor %vm1136_vm9, %vm1137_vm8 }
 0x4ca   : > { %v1132_v1 = vmul.f32 %v1337_v63, %v1131_v0 }
 0x4cc   : > { %v1133_v2 = vmul.f32 0.5, %v1132_v1 }
 0x4ce   : > { %v1134_v3 = vsub.f32 1.5, %v1133_v2 }
 0x4d0   : > { %v1135_v4 = vmul.f32 %v1337_v63, %v1134_v3 }
 0x4d2   : > { %v1139_v8 = vsel %vm1138_vm10, %v1337_v63, %v1135_v4 }
 0x4d3   : > { %v1140_v10 = vmul.f32 %v1139_v8, %v1123_v54 }
 0x4d5   : > { %v1144_v11 = vmul.f32 %v1316_v5, %v1140_v10 }
 0x4d7   : > { %v1148_v12 = vadd.f32 %v1317_v9, %v1144_v11 }
 0x4d9   : > { %1149 = vst.msk [vmem:[%s349_s16] sm:$0xff] %vm1086_vm4, %v1148_v12 }
 0x4da PF: > { %s17_s26 = sadd.s32 1, %s1360_s26   ;;  %s1686_s24 = smov %s1356_s25 }
 0x4db   : > { %p14_p5 = scmp.ge.s32.totalorder %s17_s26, 4   ;;  %s1687_s25 = smov %s1689_s27 }
 0x4dd   :  { %16 = sbr.rel (!%p14_p5) target bundleno = 2 (0x2), region = 84 }

// kernel: caption_decoder_forward.21
= control target key start
LH: loop header
LB: loop body
LE: loop exit
PB: predicated region body
PF: predicated region fallthrough
CT: control target
= control target key end

     0   :  { %s1454_s24 = smov 0   ;;  %s1456_s25 = smov 0   ;;  %s1656_s0 = inlined_call_operand.vmem [shape: f32[16,32], index: 0, kind: input, shape index: {}]   ;;  %s1657_s1 = inlined_call_operand.vmem [shape: bf16[2048,32], index: 1, kind: input, shape index: {}]   ;;  %s1658_s2 = inlined_call_operand.vmem [shape: f32[1,2048], index: 2, kind: input, shape index: {}]   ;;  %s1659_s3 = inlined_call_operand.vmem [shape: bf16[32,2048], index: 3, kind: input, shape index: {}]   ;;  %s1660_s4 = inlined_call_operand.vmem [shape: f32[1,32], index: 4, kind: input, shape index: {}]   ;;  %s1661_s5 = inlined_call_operand.vmem [shape: f32[1,32], index: 5, kind: input, shape index: {}]   ;;  %s1662_s6 = inlined_call_operand.vmem [shape: f32[1,32], index: 6, kind: input, shape index: {}]   ;;  %s1663_s7 = inlined_call_operand.vmem [shape: f32[16,32], index: 7, kind: output, shape index: {}]  }
   0x1   :  { %s1458_s26 = smov 0   ;;  %s1460_s27 = smov 0  }
   0x2   :  { %s1462_s28 = smov 0  }
   0x3 LB: > { %s26_s29 = sadd.s32 1, %s1406_s27  ;;  %p121_p1 = scmp.ne.s32.totalorder %s1398_s25, %s1394_s24  ;;  %s1410_s28 = sphi %s1462_s28, %s17_s28   ;;  %s1406_s27 = sphi %s1460_s27, %s1667_s27   ;;  %s1402_s26 = sphi %s1458_s26, %s1666_s26   ;;  %s1398_s25 = sphi %s1456_s25, %s1665_s25   ;;  %s1394_s24 = sphi %s1454_s24, %s1664_s24  }
   0x4   : > { %p27_p0 = scmp.ge.s32.totalorder %s26_s29, 4  ;;  %p122_p2 = scmp.eq.s32.totalorder %s1410_s28, 0 }
   0x5   : > { %s114_s8 = sadd.s32 1, %s1398_s25  ;;  %p1101_p5 = scmp.ge.s32.totalorder %s1410_s28, 4 }
   0x6   : > { %s1669_s29 = smov (%p27_p0, %s26_s29), 0  ;;  %p123_p3 = por %p122_p2, %p121_p1 }
   0x7   : > { %s111_s30 = ssub.s32 %s1406_s27, %s1669_s29  ;;  %254 = sbr.rel (%p1101_p5) target bundleno = 24 (0x18), region = 32 }
   0x8   : > { %p112_p4 = scmp.eq.s32.totalorder %s111_s30, 0 }
   0xa   : > { %s1489_s9 = scalar_select %p112_p4, %s1398_s25, %s114_s8  }
   0xc   : > { %274 = sbr.rel (!%p123_p3) target bundleno = 24 (0x18), region = 44  ;;  %s276_s10 = sand.u32 (%p123_p3), 1, %s1398_s25  }
   0xd   : > { %s1280_s11 = sshll.u32 (%p123_p3), %s1406_s27, 4  ;;  %s1102_s12 = sshll.u32 (%p123_p3), %s276_s10, 6 }
   0xe   : > { %s281_s15 = scalar_lea.vmem (%p123_p3), %s1659_s3, %s1280_s11  ;;  %s278_s16 = scalar_lea.vmem (%p123_p3), [#allocation3], %s1102_s12 }
   0xf   : > { %v294_v0 = vld [vmem:[%s281_s15] sm:$0xff] (%p123_p3)  ;;  %v296_v1 = vld [vmem:[%s281_s15 + $0x8] sm:$0xff] (%p123_p3) }
  0x10   : > { %v298_v2 = vld [vmem:[%s281_s15 + $0x40] sm:$0xff] (%p123_p3)  ;;  %295 = vst [vmem:[%s278_s16] sm:$0xff] (%p123_p3), %v294_v0  ;;  %v300_v3 = vld [vmem:[%s281_s15 + $0x48] sm:$0xff] (%p123_p3) }
  0x11   : > { %297 = vst [vmem:[%s278_s16 + $0x8] sm:$0xff] %v296_v1  ;;  %v302_v4 = vld [vmem:[%s281_s15 + $0x80] sm:$0xff]  ;;  %v304_v5 = vld [vmem:[%s281_s15 + $0x88] sm:$0xff] }
  0x12   : > { %299 = vst [vmem:[%s278_s16 + $0x10] sm:$0xff] %v298_v2  ;;  %v306_v6 = vld [vmem:[%s281_s15 + $0xc0] sm:$0xff]  ;;  %v308_v7 = vld [vmem:[%s281_s15 + $0xc8] sm:$0xff] }
  0x13   : > { %301 = vst [vmem:[%s278_s16 + $0x18] sm:$0xff] %v300_v3 }
  0x14   : > { %303 = vst [vmem:[%s278_s16 + $0x20] sm:$0xff] %v302_v4 }
  0x15   : > { %305 = vst [vmem:[%s278_s16 + $0x28] sm:$0xff] %v304_v5 }
  0x16   : > { %307 = vst [vmem:[%s278_s16 + $0x30] sm:$0xff] %v306_v6 }
  0x17   : > { %309 = vst [vmem:[%s278_s16 + $0x38] sm:$0xff] %v308_v7 }
  0x18 PF: > { %p1105_p6 = scmp.ge.s32.totalorder %s1410_s28, 1  ;;  %p314_p7 = scmp.lt.s32.totalorder %s1410_s28, 5 }
  0x1a   : > { %p315_p8 = pnand %p1105_p6, %p314_p7 }
  0x1b   : > { %s321_s17 = sand.u32 (!%p315_p8), 1, %s1394_s24   ;;  %s1107_s18 = sshll.u32 (!%p315_p8), %s1402_s26, 6 }
  0x1c   : > { %318 = sbr.rel (%p315_p8) target bundleno = 687 (0x2af), region = 67  ;;  %s1106_s19 = sshll.u32 (!%p315_p8), %s321_s17, 6 }
  0x1d   : > { %p373_p9 = scmp.lt.s32.totalorder (!%p315_p8), %s1107_s18, 255  ;;  %s1109_s20 = sshll.u32 (!%p315_p8), %s1402_s26, 2 }
  0x1e   : > { %p379_p10 = scmp.lt.s32.totalorder (!%p315_p8), %s1109_s20, 15  ;;  %s1513_s24 = scalar_lea.vmem (!%p315_p8), [#allocation3], %s1106_s19 }
  0x1f   : > { %p1110_p11 = scmp.ne.s32.totalorder (!%p315_p8), %s1402_s26, 0 }
  0x21   : > { %s1671_s18 = smov (!%p373_p9, %s1107_s18), 255  ;;  %s1673_s20 = smov (!%p379_p10, %s1109_s20), 15 }
  0x22   : > { %s1108_s21 = sshll.u32 %s1671_s18, 2  ;;  %s381_s11 = scalar_lea.vmem %s1658_s2, %s1673_s20 }
  0x23   : > { %s1505_s30 = scalar_lea.vmem %s1657_s1, %s1108_s21  ;;  %394 = sbr.rel (%p1110_p11) target bundleno = 43 (0x2b), region = 75 }
  0x28   : > { %vm395_vm0 = vcmask 261120   ;;  %v1412_v8 = vmov 0.0  }
  0x29   : > { %396 = vst.msk [vmem:[#allocation2] sm:$0xff] %vm395_vm0, %v1412_v8 }
  0x2a   : > { %397 = vst.msk [vmem:[#allocation2 + $0x8] sm:$0xff] %vm395_vm0, %v1412_v8 }
  0x2b PF: > { %v1288_v9 = vld [vmem:[%s1505_s30 + $0x38] sm:$0xff]  ;;  %vm635_vm1 = vcmask 261120   ;;  %v1287_v17 = vld [vmem:[%s1505_s30 + $0x30] sm:$0xff]  ;;  %v1286_v25 = vld [vmem:[%s1505_s30 + $0x28] sm:$0xff]  ;;  %p1275_p12 = scmp.ne.s32.totalorder %s1402_s26, 3 }
  0x2c   : > { %v1296_v10 = vld [vmem:[%s1505_s30 + $0x78] sm:$0xff]  ;;  %v661_v13 = vsel %vm635_vm1, %v1288_v9, 0  ;;  %v1295_v18 = vld [vmem:[%s1505_s30 + $0x70] sm:$0xff]  ;;  %v658_v21 = vsel %vm635_vm1, %v1287_v17, 0  ;;  %v1294_v26 = vld [vmem:[%s1505_s30 + $0x68] sm:$0xff]  ;;  %v655_v29 = vsel %vm635_vm1, %v1286_v25, 0 }
  0x2d   : > { %v1304_v11 = vld [vmem:[%s1505_s30 + $0xb8] sm:$0xff]  ;;  %v685_v14 = vsel %vm635_vm1, %v1296_v10, 0  ;;  %735 = vmatpush.bf16.xpose.msra.mxu0 %v661_v13  ;;  %v1303_v19 = vld [vmem:[%s1505_s30 + $0xb0] sm:$0xff]  ;;  %v682_v22 = vsel %vm635_vm1, %v1295_v18, 0  ;;  %v1302_v27 = vld [vmem:[%s1505_s30 + $0xa8] sm:$0xff]  ;;  %v679_v30 = vsel %vm635_vm1, %v1294_v26, 0 }
  0x2e   : > { %v1312_v12 = vld [vmem:[%s1505_s30 + $0xf8] sm:$0xff]  ;;  %v709_v15 = vsel %vm635_vm1, %v1304_v11, 0  ;;  %749 = vmatpush.bf16.xpose.msra.mxu1 %v685_v14  ;;  %v1311_v20 = vld [vmem:[%s1505_s30 + $0xf0] sm:$0xff]  ;;  %v706_v23 = vsel %vm635_vm1, %v1303_v19, 0  ;;  %v1310_v28 = vld [vmem:[%s1505_s30 + $0xe8] sm:$0xff]  ;;  %v703_v31 = vsel %vm635_vm1, %v1302_v27, 0 }
  0x2f   : > { %v733_v16 = vsel %vm635_vm1, %v1312_v12, 0  ;;  %763 = vmatpush.bf16.xpose.msra.mxu2 %v709_v15  ;;  %v730_v24 = vsel %vm635_vm1, %v1311_v20, 0  ;;  %v727_v32 = vsel %vm635_vm1, %v1310_v28, 0  ;;  %v1285_v33 = vld [vmem:[%s1505_s30 + $0x20] sm:$0xff]  ;;  %v1284_v41 = vld [vmem:[%s1505_s30 + $0x18] sm:$0xff]  ;;  %v1283_v49 = vld [vmem:[%s1505_s30 + $0x10] sm:$0xff] }
  0x30   : > { %777 = vmatpush.bf16.xpose.msra.mxu3 %v733_v16  ;;  %v1293_v34 = vld [vmem:[%s1505_s30 + $0x60] sm:$0xff]  ;;  %v652_v37 = vsel %vm635_vm1, %v1285_v33, 0  ;;  %v1292_v42 = vld [vmem:[%s1505_s30 + $0x58] sm:$0xff]  ;;  %v649_v45 = vsel %vm635_vm1, %v1284_v41, 0  ;;  %v1291_v50 = vld [vmem:[%s1505_s30 + $0x50] sm:$0xff]  ;;  %v646_v53 = vsel %vm635_vm1, %v1283_v49, 0 }
  0x31   : > { %v1301_v35 = vld [vmem:[%s1505_s30 + $0xa0] sm:$0xff]  ;;  %v676_v38 = vsel %vm635_vm1, %v1293_v34, 0  ;;  %v1300_v43 = vld [vmem:[%s1505_s30 + $0x98] sm:$0xff]  ;;  %v673_v46 = vsel %vm635_vm1, %v1292_v42, 0  ;;  %v1299_v51 = vld [vmem:[%s1505_s30 + $0x90] sm:$0xff]  ;;  %v670_v54 = vsel %vm635_vm1, %v1291_v50, 0 }
  0x32   : > { %v1309_v36 = vld [vmem:[%s1505_s30 + $0xe0] sm:$0xff]  ;;  %v700_v39 = vsel %vm635_vm1, %v1301_v35, 0  ;;  %v1308_v44 = vld [vmem:[%s1505_s30 + $0xd8] sm:$0xff]  ;;  %v697_v47 = vsel %vm635_vm1, %v1300_v43, 0  ;;  %v1307_v52 = vld [vmem:[%s1505_s30 + $0xd0] sm:$0xff]  ;;  %v694_v55 = vsel %vm635_vm1, %v1299_v51, 0 }
  0x33   : > { %v724_v40 = vsel %vm635_vm1, %v1309_v36, 0  ;;  %v721_v48 = vsel %vm635_vm1, %v1308_v44, 0  ;;  %v718_v56 = vsel %vm635_vm1, %v1307_v52, 0  ;;  %v1282_v57 = vld [vmem:[%s1505_s30 + $0x8] sm:$0xff]  ;;  %v1281_v1 = vld [vmem:[%s1505_s30] sm:$0xff] }
  0x34   : > { %v1290_v58 = vld [vmem:[%s1505_s30 + $0x48] sm:$0xff]  ;;  %v643_v61 = vsel %vm635_vm1, %v1282_v57, 0  ;;  %v1289_v2 = vld [vmem:[%s1505_s30 + $0x40] sm:$0xff]  ;;  %v640_v5 = vsel %vm635_vm1, %v1281_v1, 0  ;;  %v1261_v12 = vld [vmem:[%s1513_s24 + $0x20] sm:$0xf] }
  0x35   : > { %736 = vmatpush.bf16.xpose.msra.mxu0 %v658_v21  ;;  %v1298_v59 = vld [vmem:[%s1505_s30 + $0x88] sm:$0xff]  ;;  %v667_v62 = vsel %vm635_vm1, %v1290_v58, 0  ;;  %v1297_v3 = vld [vmem:[%s1505_s30 + $0x80] sm:$0xff]  ;;  %v664_v6 = vsel %vm635_vm1, %v1289_v2, 0  ;;  %v1317_v14 = vld [vmem:[%s1513_s24 + $0x24] sm:$0xf] }
  0x36   : > { %750 = vmatpush.bf16.xpose.msra.mxu1 %v682_v22  ;;  %v1306_v60 = vld [vmem:[%s1505_s30 + $0xc8] sm:$0xff]  ;;  %v691_v63 = vsel %vm635_vm1, %v1298_v59, 0  ;;  %v1305_v4 = vld [vmem:[%s1505_s30 + $0xc0] sm:$0xff]  ;;  %v688_v7 = vsel %vm635_vm1, %v1297_v3, 0  ;;  %v1269_v18 = vld [vmem:[%s1513_s24 + $0x28] sm:$0xf] }
  0x37   : > { %764 = vmatpush.bf16.xpose.msra.mxu2 %v706_v23  ;;  %v715_v0 = vsel %vm635_vm1, %v1306_v60, 0  ;;  %v712_v8 = vsel %vm635_vm1, %v1305_v4, 0  ;;  %v398_v9 = vld [vmem:[%s1656_s0] sm:$0xff]  ;;  %v399_v10 = vld [vmem:[%s1656_s0 + $0x8] sm:$0xff]  ;;  %v1318_v21 = vld [vmem:[%s1513_s24 + $0x2c] sm:$0xf] }
  0x38   : > { %778 = vmatpush.bf16.xpose.msra.mxu3 %v730_v24  ;;  %v400_v11 = vpack.c.bf16 %v399_v10, %v398_v9  ;;  %v1319_v13 = vld [vmem:[%s1513_s24 + $0x2c] sm:$0xf0]  ;;  %v1263_v16 = vld [vmem:[%s1513_s24 + $0x30] sm:$0xf0]  ;;  %v1320_v19 = vld [vmem:[%s1513_s24 + $0x34] sm:$0xf0] }
  0x39   : > { %v1262_v15 = vor.u32 %v1319_v13, %v1261_v12  ;;  %v1266_v17 = vor.u32 %v1317_v14, %v1263_v16  ;;  %v1270_v20 = vor.u32 %v1320_v19, %v1269_v18  ;;  %v1271_v22 = vld [vmem:[%s1513_s24 + $0x38] sm:$0xf0]  ;;  %v1245_v24 = vld [vmem:[%s1513_s24] sm:$0xf]  ;;  %v1315_v25 = vld [vmem:[%s1513_s24 + $0xc] sm:$0xf0] }
  0x3a   : > { %v1274_v23 = vor.u32 %v1318_v21, %v1271_v22  ;;  %v1313_v26 = vld [vmem:[%s1513_s24 + $0x4] sm:$0xf]  ;;  %v1246_v27 = vor.u32 %v1315_v25, %v1245_v24  ;;  %v1247_v28 = vld [vmem:[%s1513_s24 + $0x10] sm:$0xf0]  ;;  %v1255_v34 = vld [vmem:[%s1513_s24 + $0x18] sm:$0xf0] }
  0x3b   : > { %v465_v36 = vld [vmem:[%s381_s11] sm:$0xf]  ;;  %v800_v19 = vld [vmem:[#allocation2 + $0x8] sm:$0xff] }
  0x3c   : > { %v469_v51 = vperm.slane %v465_v36, 2  ;;  %v470_v52 = vperm.slane %v465_v36, 3 }
  0x3d   : > { %737 = vmatpush.bf16.xpose.msra.mxu0 %v655_v29  ;;  %v1250_v29 = vor.u32 %v1313_v26, %v1247_v28 }
  0x3e   : > { %751 = vmatpush.bf16.xpose.msra.mxu1 %v679_v30  ;;  %v1253_v30 = vld [vmem:[%s1513_s24 + $0x8] sm:$0xf] }
  0x3f   : > { %765 = vmatpush.bf16.xpose.msra.mxu2 %v703_v31  ;;  %v1316_v31 = vld [vmem:[%s1513_s24 + $0x14] sm:$0xf0] }
  0x40   : > { %779 = vmatpush.bf16.xpose.msra.mxu3 %v727_v32  ;;  %v1314_v32 = vld [vmem:[%s1513_s24 + $0xc] sm:$0xf]  ;;  %v1254_v33 = vor.u32 %v1316_v31, %v1253_v30 }
  0x41   : > { %v1258_v35 = vor.u32 %v1314_v32, %v1255_v34 }
  0x45   : > { %738 = vmatpush.bf16.xpose.msra.mxu0 %v652_v37 }
  0x46   : > { %752 = vmatpush.bf16.xpose.msra.mxu1 %v676_v38 }
  0x47   : > { %766 = vmatpush.bf16.xpose.msra.mxu2 %v700_v39  ;;  %v467_v39 = vperm.slane %v465_v36, 0 }
  0x48   : > { %780 = vmatpush.bf16.xpose.msra.mxu3 %v724_v40  ;;  %v468_v40 = vperm.slane %v465_v36, 1 }
  0x4d   : > { %739 = vmatpush.bf16.xpose.msra.mxu0 %v649_v45 }
  0x4e   : > { %753 = vmatpush.bf16.xpose.msra.mxu1 %v673_v46 }
  0x4f   : > { %767 = vmatpush.bf16.xpose.msra.mxu2 %v697_v47 }
  0x50   : > { %781 = vmatpush.bf16.xpose.msra.mxu3 %v721_v48 }
  0x55   : > { %740 = vmatpush.bf16.xpose.msra.mxu0 %v646_v53 }
  0x56   : > { %754 = vmatpush.bf16.xpose.msra.mxu1 %v670_v54 }
  0x57   : > { %768 = vmatpush.bf16.xpose.msra.mxu2 %v694_v55 }
  0x58   : > { %782 = vmatpush.bf16.xpose.msra.mxu3 %v718_v56 }
  0x5d   : > { %741 = vmatpush.bf16.xpose.msra.mxu0 %v643_v61 }
  0x5e   : > { %755 = vmatpush.bf16.xpose.msra.mxu1 %v667_v62 }
  0x5f   : > { %769 = vmatpush.bf16.xpose.msra.mxu2 %v691_v63 }
  0x60   : > { %783 = vmatpush.bf16.xpose.msra.mxu3 %v715_v0 }
  0x65   : > { %742 = vmatpush.bf16.xpose.msra.mxu0 %v640_v5 }
  0x66   : > { %756 = vmatpush.bf16.xpose.msra.mxu1 %v664_v6 }
  0x67   : > { %770 = vmatpush.bf16.xpose.msra.mxu2 %v688_v7 }
  0x68   : > { %784 = vmatpush.bf16.xpose.msra.mxu3 %v712_v8 }
  0x6c   : > { %1239 = vmatmul.msk.bf16.vlgmr.msra.gmra.mxu0 %vm635_vm1, %v400_v11 }
  0x6d   : > { %1240 = vmatmul.msk.bf16.vlgmr.msra.gmra.mxu1 %vm635_vm1, %v400_v11  ;;  %859 = vmatpush.bf16.xpose.msrb.mxu0 %v1262_v15 }
  0x6e   : > { %1241 = vmatmul.msk.bf16.vlgmr.msra.gmra.mxu2 %vm635_vm1, %v400_v11  ;;  %873 = vmatpush.bf16.xpose.msrb.mxu1 %v1266_v17 }
  0x6f   : > { %1242 = vmatmul.msk.bf16.vlgmr.msra.gmra.mxu3 %vm635_vm1, %v400_v11  ;;  %887 = vmatpush.bf16.xpose.msrb.mxu2 %v1270_v20  ;;  %v799_v11 = vld [vmem:[#allocation2] sm:$0xff] }
  0x70   : > { %901 = vmatpush.bf16.xpose.msrb.mxu3 %v1274_v23 }
  0x75   : > { %860 = vmatpush.bf16.xpose.msrb.mxu0 %v1246_v27 }
  0x76   : > { %874 = vmatpush.bf16.xpose.msrb.mxu1 %v1250_v29 }
  0x77   : > { %888 = vmatpush.bf16.xpose.msrb.mxu2 %v1254_v33 }
  0x78   : > { %902 = vmatpush.bf16.xpose.msrb.mxu3 %v1258_v35 }
  0xe9   : > { %v744_v37 = vpop.f32.mrf.mxu0 }
  0xea   : > { %v758_v38 = vpop.f32.mrf.mxu1  ;;  %v745_v41 = vadd.f32 %v744_v37, %v467_v39 }
  0xeb   : > { %v759_v42 = vadd.f32 %v758_v38, %v468_v40 }
  0xec   : > { %v791_v47 = vmax.f32 %v745_v41, 0.0 }
  0xed   : > { %v792_v48 = vmax.f32 %v759_v42, 0.0 }
  0xf1   : > { %v772_v43 = vpop.f32.mrf.mxu2  ;;  %v746_v45 = vpop.f32.mrf.mxu0 }
  0xf2   : > { %v786_v44 = vpop.f32.mrf.mxu3  ;;  %v760_v46 = vpop.f32.mrf.mxu1  ;;  %v747_v49 = vadd.f32 %v746_v45, %v467_v39  ;;  %v773_v57 = vadd.f32 %v772_v43, %v469_v51 }
  0xf3   : > { %v761_v50 = vadd.f32 %v760_v46, %v468_v40  ;;  %v787_v58 = vadd.f32 %v786_v44, %v470_v52 }
  0xf4   : > { %v795_v53 = vmax.f32 %v747_v49, 0.0  ;;  %v793_v63 = vmax.f32 %v773_v57, 0.0 }
  0xf5   : > { %v796_v54 = vmax.f32 %v761_v50, 0.0  ;;  %v794_v0 = vmax.f32 %v787_v58, 0.0 }
  0xf6   : > { %v801_v55 = vpack.c.bf16 %v795_v53, %v791_v47 }
  0xf7   : > { %v802_v56 = vpack.c.bf16 %v796_v54, %v792_v48 }
  0xf8   : > { %861 = vmatmul.bf16.vlgmr.msrb.gmra.mxu0 %v801_v55 }
  0xf9   : > { %v774_v59 = vpop.f32.mrf.mxu2  ;;  %875 = vmatmul.bf16.vlgmr.msrb.gmra.mxu1 %v802_v56 }
  0xfa   : > { %v788_v60 = vpop.f32.mrf.mxu3  ;;  %v775_v61 = vadd.f32 %v774_v59, %v469_v51 }
  0xfb   : > { %v789_v62 = vadd.f32 %v788_v60, %v470_v52 }
  0xfc   : > { %v797_v1 = vmax.f32 %v775_v61, 0.0 }
  0xfd   : > { %v798_v2 = vmax.f32 %v789_v62, 0.0 }
  0xfe   : > { %v803_v3 = vpack.c.bf16 %v797_v1, %v793_v63 }
  0xff   : > { %v804_v4 = vpack.c.bf16 %v798_v2, %v794_v0 }
 0x100   : > { %889 = vmatmul.bf16.vlgmr.msrb.gmra.mxu2 %v803_v3 }
 0x101   : > { %903 = vmatmul.bf16.vlgmr.msrb.gmra.mxu3 %v804_v4 }
 0x175   : > { %v862_v5 = vpop.f32.mrf.mxu0 }
 0x176   : > { %v876_v6 = vpop.f32.mrf.mxu1 }
 0x177   : > { %v877_v7 = vadd.f32 %v876_v6, %v862_v5 }
 0x17d   : > { %v864_v13 = vpop.f32.mrf.mxu0 }
 0x17e   : > { %v878_v14 = vpop.f32.mrf.mxu1 }
 0x17f   : > { %v879_v16 = vadd.f32 %v878_v14, %v864_v13 }
 0x183   : > { %v890_v8 = vpop.f32.mrf.mxu2 }
 0x184   : > { %v904_v9 = vpop.f32.mrf.mxu3  ;;  %v891_v10 = vadd.f32 %v890_v8, %v877_v7 }
 0x186   : > { %v905_v12 = vadd.f32 %v904_v9, %v891_v10 }
 0x188   : > { %v909_v15 = vadd.f32 %v905_v12, %v799_v11 }
 0x18a   : > { %911 = vst.msk [vmem:[#allocation2] sm:$0xff] %vm635_vm1, %v909_v15 }
 0x18b   : > { %v892_v17 = vpop.f32.mrf.mxu2 }
 0x18c   : > { %v893_v18 = vadd.f32 %v892_v17, %v879_v16  ;;  %v906_v20 = vpop.f32.mrf.mxu3 }
 0x18e   : > { %v907_v21 = vadd.f32 %v906_v20, %v893_v18  ;;  %916 = sbr.rel (%p1275_p12) target bundleno = 687 (0x2af), region = 79 }
 0x190   : > { %v910_v22 = vadd.f32 %v907_v21, %v800_v19 }
 0x192   : > { %912 = vst.msk [vmem:[#allocation2 + $0x8] sm:$0xff] %vm635_vm1, %v910_v22 }
 0x193   : > { %v919_v23 = vld [vmem:[#allocation2] sm:$0xff]  ;;  %v918_v30 = vld [vmem:[%s1656_s0 + $0x8] sm:$0xff]  ;;  %v1413_v34 = vmov 32.0  }
 0x194   : > { %v917_v24 = vld [vmem:[%s1656_s0] sm:$0xff]  ;;  %1366 = vrcp.f32 %v1413_v34 }
 0x195   : > { %v1363_v25 = vld [vmem:[%s1660_s4] ss:$0 sm:$0xff] }
 0x196   : > { %v925_v27 = vadd.f32 %v1363_v25, %v919_v23  ;;  %v1364_v1 = vld [vmem:[%s1661_s5] ss:$0 sm:$0xff] }
 0x197   : > { %v1365_v4 = vld [vmem:[%s1662_s6] ss:$0 sm:$0xff] }
 0x198   : > { %v927_v28 = vadd.f32 %v925_v27, %v917_v24 }
 0x199   : > { %v920_v26 = vld [vmem:[#allocation2 + $0x8] sm:$0xff] }
 0x19a   : > { %v926_v29 = vadd.f32 %v1363_v25, %v920_v26  ;;  %v931_v31 = vsel %vm635_vm1, %v927_v28, 0.0  ;;  %v1367_v35 = vpop.eup %1366 }
 0x19b   : > { %932 = vadd.xlane.f32.xlu0 %v931_v31  ;;  %v938_v36 = vmul.f32 32.0, %v1367_v35  ;;  %vm942_vm2 = vweird.f32 %v1367_v35 }
 0x19c   : > { %v928_v32 = vadd.f32 %v926_v29, %v918_v30 }
 0x19d   : > { %v939_v37 = vsub.f32 1.0, %v938_v36 }
 0x19e   : > { %v934_v33 = vsel %vm635_vm1, %v928_v32, 0.0 }
 0x19f   : > { %v940_v38 = vmul.f32 %v1367_v35, %v939_v37 }
 0x1a1   : > { %v941_v39 = vadd.f32 %v1367_v35, %v940_v38 }
 0x1a3   : > { %935 = vadd.xlane.f32.xlu0 %v934_v33  ;;  %v943_v40 = vsel %vm942_vm2, %v1367_v35, %v941_v39 }
 0x20e   : > { %v933_v41 = vpop.xlane.xlu0 %932 }
 0x20f   : > { %v944_v42 = vmul.f32 %v943_v40, %v933_v41 }
 0x211   : > { %v946_v43 = vsub.f32 %v927_v28, %v944_v42 }
 0x213   : > { %v948_v44 = vmul.f32 %v946_v43, %v946_v43 }
 0x215   : > { %v950_v45 = vsel %vm635_vm1, %v948_v44, 0.0 }
 0x216   : > { %951 = vadd.xlane.f32.xlu1 %v950_v45  ;;  %v936_v46 = vpop.xlane.xlu0 %935 }
 0x217   : > { %v945_v47 = vmul.f32 %v943_v40, %v936_v46 }
 0x219   : > { %v947_v48 = vsub.f32 %v928_v32, %v945_v47 }
 0x21b   : > { %v949_v49 = vmul.f32 %v947_v48, %v947_v48 }
 0x21d   : > { %v953_v50 = vsel %vm635_vm1, %v949_v49, 0.0 }
 0x21e   : > { %954 = vadd.xlane.f32.xlu1 %v953_v50 }
 0x289   : > { %v952_v51 = vpop.xlane.xlu1 %951 }
 0x28a   : > { %v956_v52 = vmul.f32 %v952_v51, %v943_v40 }
 0x28c   : > { %v958_v53 = vadd.f32 1e-05, %v956_v52 }
 0x28e   : > { %1368 = vrsqrt.f32 %v958_v53  ;;  %vm966_vm4 = vweird.f32 %v958_v53 }
 0x291   : > { %v955_v54 = vpop.xlane.xlu1 %954 }
 0x292   : > { %v957_v55 = vmul.f32 %v955_v54, %v943_v40 }
 0x294   : > { %v1369_v56 = vpop.eup %1368  ;;  %v959_v57 = vadd.f32 1e-05, %v957_v55 }
 0x295   : > { %v961_v58 = vmul.f32 %v1369_v56, %v958_v53  ;;  %vm967_vm3 = vweird.f32 %v1369_v56 }
 0x296   : > { %1370 = vrsqrt.f32 %v959_v57  ;;  %vm968_vm5 = vmor %vm966_vm4, %vm967_vm3  ;;  %vm976_vm7 = vweird.f32 %v959_v57 }
 0x297   : > { %v962_v59 = vmul.f32 %v1369_v56, %v961_v58 }
 0x299   : > { %v963_v60 = vmul.f32 0.5, %v962_v59 }
 0x29b   : > { %v964_v61 = vsub.f32 1.5, %v963_v60 }
 0x29c   : > { %v1371_v62 = vpop.eup %1370 }
 0x29d   : > { %v965_v63 = vmul.f32 %v1369_v56, %v964_v61  ;;  %v971_v0 = vmul.f32 %v1371_v62, %v959_v57  ;;  %vm977_vm6 = vweird.f32 %v1371_v62 }
 0x29e   : > { %vm978_vm8 = vmor %vm976_vm7, %vm977_vm6 }
 0x29f   : > { %v969_v2 = vsel %vm968_vm5, %v1369_v56, %v965_v63  ;;  %v972_v3 = vmul.f32 %v1371_v62, %v971_v0 }
 0x2a0   : > { %v980_v5 = vmul.f32 %v969_v2, %v946_v43 }
 0x2a1   : > { %v973_v6 = vmul.f32 0.5, %v972_v3 }
 0x2a2   : > { %v985_v7 = vmul.f32 %v1364_v1, %v980_v5 }
 0x2a3   : > { %v974_v8 = vsub.f32 1.5, %v973_v6 }
 0x2a4   : > { %v990_v9 = vadd.f32 %v1365_v4, %v985_v7 }
 0x2a5   : > { %v975_v10 = vmul.f32 %v1371_v62, %v974_v8 }
 0x2a6   : > { %992 = vst.msk [vmem:[%s1663_s7] sm:$0xff] %vm635_vm1, %v990_v9 }
 0x2a7   : > { %v979_v11 = vsel %vm978_vm8, %v1371_v62, %v975_v10 }
 0x2a8   : > { %v981_v12 = vmul.f32 %v979_v11, %v947_v48 }
 0x2aa   : > { %v986_v13 = vmul.f32 %v1364_v1, %v981_v12 }
 0x2ac   : > { %v991_v14 = vadd.f32 %v1365_v4, %v986_v13 }
 0x2ae   : > { %993 = vst.msk [vmem:[%s1663_s7 + $0x8] sm:$0xff] %vm635_vm1, %v991_v14 }
 0x2af PF: > { %s17_s28 = sadd.s32 1, %s1410_s28   ;;  %s1664_s24 = smov %s1398_s25 }
 0x2b0   : > { %p14_p13 = scmp.ge.s32.totalorder %s17_s28, 6   ;;  %s1665_s25 = smov %s1489_s9 }
 0x2b1   : > { %s1666_s26 = smov %s1406_s27  ;;  %s1667_s27 = smov %s1669_s29 }
 0x2b2   :  { %16 = sbr.rel (!%p14_p13) target bundleno = 3 (0x3), region = 123 }

// kernel: caption_decoder_forward.29
= control target key start
LH: loop header
LB: loop body
LE: loop exit
PB: predicated region body
PF: predicated region fallthrough
CT: control target
= control target key end

     0   :  { %vm20_vm0 = vcmask 408576   ;;  %v140_v1 = vmov 0.0   ;;  %s188_s0 = inlined_call_operand.vmem [shape: f32[16,32], index: 0, kind: input, shape index: {}]   ;;  %s189_s1 = inlined_call_operand.vmem [shape: bf16[32,50], index: 1, kind: input, shape index: {}]   ;;  %s190_s2 = inlined_call_operand.vmem [shape: f32[1,50], index: 2, kind: input, shape index: {}]   ;;  %s191_s3 = inlined_call_operand.hbm [shape: f32[16,50], index: 3, kind: output, shape index: {}]  }
   0x1   :  { %v108_v0 = vld [vmem:[%s189_s1 + $0x8] sm:$0xff]  ;;  %21 = vst.msk [vmem:[#allocation2] sm:$0xff] %vm20_vm0, %v140_v1 }
   0x2   :  { %8 = vsyncpa [#allocation4], 0  ;;  %54 = vmatpush.bf16.msra.mxu0 %v108_v0  ;;  %v107_v2 = vld [vmem:[%s189_s1] sm:$0xff]  ;;  %v24_v4 = vld [vmem:[%s188_s0 + $0x8] sm:$0xff]  ;;  %22 = vst.msk [vmem:[#allocation2 + $0x8] sm:$0xff] %vm20_vm0, %v140_v1  ;;  %vm44_vm1 = vcmask 261120  }
   0x3   :  { %v23_v3 = vld [vmem:[%s188_s0] sm:$0xff]  ;;  %s141_s0 = smov [#allocation3]   ;;  %s86_s24 = sshll.u32 %s191_s3, 4  ;;  %s87_s24 = int_to_ptr.hbm [resolvable:$true] %s86_s24 }
   0x4   :  { %v25_v5 = vpack.c.bf16 %v24_v4, %v23_v3  ;;  %v113_v10 = vld [vmem:[%s190_s2] ss:$0 sm:$0xff]  ;;  %s84_s21 = sshll.u32 %s141_s0, 4  ;;  %s142_s2 = smov 128   ;;  %s85_s21 = int_to_ptr.vmem [resolvable:$true] %s84_s21 }
   0x5   :  { %s143_s25 = smov 8  }
   0x6   :  { %55 = vmatpush.bf16.msra.mxu0 %v107_v2 }
   0x8   :  { %v30_v6 = vld [vmem:[#allocation2] sm:$0xff] }
   0x9   :  { %106 = vmatmul.msk.bf16.vlgmr.msra.gmra.mxu0 %vm44_vm1, %v25_v5  ;;  %v31_v9 = vld [vmem:[#allocation2 + $0x8] sm:$0xff] }
  0x86   :  { %v57_v7 = vpop.f32.mrf.mxu0 }
  0x87   :  { %v62_v8 = vadd.f32 %v57_v7, %v30_v6 }
  0x89   :  { %65 = vst.msk [vmem:[#allocation2] sm:$0xff] %vm20_vm0, %v62_v8 }
  0x8e   :  { %v59_v11 = vpop.f32.mrf.mxu0 }
  0x8f   :  { %v63_v12 = vadd.f32 %v59_v11, %v31_v9 }
  0x90   :  { %v70_v13 = vld [vmem:[#allocation2] sm:$0xff] }
  0x91   :  { %66 = vst.msk [vmem:[#allocation2 + $0x8] sm:$0xff] %vm20_vm0, %v63_v12  ;;  %v76_v14 = vadd.f32 %v113_v10, %v70_v13 }
  0x93   :  { %78 = vst.msk [vmem:[#allocation3] sm:$0xff] %vm20_vm0, %v76_v14 }
  0x98   :  { %v71_v15 = vld [vmem:[#allocation2 + $0x8] sm:$0xff] }
  0x99   :  { %v77_v16 = vadd.f32 %v113_v10, %v71_v15 }
  0x9b   :  { %79 = vst.msk [vmem:[#allocation3 + $0x8] sm:$0xff] %vm20_vm0, %v77_v16 }
  0x9c   :  { %92 = dma.vmem_to_hbm [thread:$0]  %s85_s21, 256, %s87_s24, [#allocation4], %s142_s2, %s142_s2, %s143_s25  }
  0x9d   :  { %138 = dma.done.wait [#allocation4], 256  }
  0x9e   :  { %139 = vsyncadd [#allocation4], 4294967040 }
  0x9f   :  { %97 = vsyncpa [#allocation4], 1 }

// kernel: caption_decoder_forward.20
= control target key start
LH: loop header
LB: loop body
LE: loop exit
PB: predicated region body
PF: predicated region fallthrough
CT: control target
= control target key end

     0   :  { %s1582_s24 = smov 0   ;;  %s1584_s25 = smov 0   ;;  %s1900_s0 = inlined_call_operand.vmem [shape: f32[2,8,32], index: 0, kind: input, shape index: {}]   ;;  %s1901_s1 = inlined_call_operand.vmem [shape: bf16[2,8,32], index: 1, kind: input, shape index: {}]   ;;  %s1902_s2 = inlined_call_operand.vmem [shape: bf16[2,10,64], index: 2, kind: input, shape index: {}]   ;;  %s1903_s3 = inlined_call_operand.vmem [shape: bf16[32,32], index: 3, kind: input, shape index: {}]   ;;  %s1904_s4 = inlined_call_operand.vmem [shape: f32[1,32], index: 4, kind: input, shape index: {}]   ;;  %s1905_s5 = inlined_call_operand.vmem [shape: f32[1,32], index: 5, kind: input, shape index: {}]   ;;  %s1906_s6 = inlined_call_operand.vmem [shape: f32[1,32], index: 6, kind: input, shape index: {}]   ;;  %s1907_s7 = inlined_call_operand.vmem [shape: f32[2,8,32], index: 7, kind: output, shape index: {}]  }
   0x1   :  { %s1586_s26 = smov 0  }
   0x2 LB: > { %s29_s27 = sadd.s32 1, %s1526_s25  ;;  %p1423_p0 = scmp.ge.s32.totalorder %s1530_s26, 1  ;;  %s1530_s26 = sphi %s1586_s26, %s17_s26   ;;  %s1526_s25 = sphi %s1584_s25, %s1909_s25   ;;  %s1522_s24 = sphi %s1582_s24, %s1908_s24  }
   0x3   : > { %p31_p1 = scmp.ge.s32.totalorder %s29_s27, 2  ;;  %p279_p2 = scmp.lt.s32.totalorder %s1530_s26, 3 }
   0x5   : > { %s1911_s27 = smov (%p31_p1, %s29_s27), 0  ;;  %p280_p3 = pnand %p1423_p0, %p279_p2 }
   0x6   : > { %p327_p4 = scmp.lt.s32.totalorder (!%p280_p3), %s1522_s24, 1  ;;  %s1532_s10 = smov (!%p280_p3), 104  }
   0x7   : > { %283 = sbr.rel (%p280_p3) target bundleno = 1244 (0x4dc), region = 48  ;;  %s1533_s11 = smov (!%p280_p3), 120  }
   0x8   : > { %s1534_s12 = smov (!%p280_p3), 112   ;;  %s1535_s16 = smov (!%p280_p3), 96  }
   0x9   : > { %s1538_s17 = smov (!%p280_p3), 24   ;;  %s1539_s18 = smov (!%p280_p3), 16  }
   0xa   : > { %s1540_s19 = smov (!%p280_p3), 8  }
   0xc   : > { %s1913_s24 = smov (!%p327_p4, %s1522_s24), 1  ;;  %v1536_v4 = vmov 1934713408   ;;  %vm388_vm0 = vcmask 1047556   ;;  %v1537_v12 = vmov 1983009808  }
   0xd   : > { %s1600_s28 = sshll.u32 %s1913_s24, 3  ;;  %s1425_s9 = sshll.u32 %s1913_s24, 2  ;;  %v393_v5 = vunpack.c.l.s4 %v1536_v4  ;;  %v379_v13 = vunpack.c.l.s4 %v1537_v12  ;;  %vm879_vm1 = vcmask 64512   ;;  %vm969_vm2 = vcmask 80896  }
   0xe   : > { %s345_s8 = scalar_lea.vmem %s1902_s2, %s1600_s28  ;;  %s340_s15 = scalar_lea.vmem %s1901_s1, %s1425_s9  ;;  %vm1024_vm3 = vcmask 1044480   ;;  %vm1254_vm4 = vcmask 261120   ;;  %vm1231_vm5 = vcmask 130048   ;;  %vm1233_vm6 = vcmask 195584  }
   0xf   : > { %v356_v0 = vld [vmem:[%s345_s8] sm:$0xf]  ;;  %v1606_v1 = vld [vmem:[%s345_s8 + $0x4] sm:$0x1]  ;;  %v1622_v8 = vunpack.c.0.s8 %v393_v5  ;;  %v1633_v18 = vunpack.c.0.s8 %v379_v13  ;;  %s333_s9 = scalar_lea.vmem %s1900_s0, %s1600_s28 }
  0x10   : > { %490 = vrot.lane.b32.xlu1 %v356_v0, %s1532_s10  ;;  %482 = vrot.lane.b32.xlu0 %v356_v0, %s1533_s11  ;;  %v1612_v2 = vld [vmem:[%s340_s15] sm:$0xf] }
  0x11   : > { %488 = vrot.lane.b32.xlu2 %v1606_v1, %s1534_s12  ;;  %v497_v28 = vperm.slane %v356_v0, %v1633_v18  ;;  %v368_v40 = vshrl.u32 %v1612_v2, 16 }
  0x13   : > { %v505_v37 = vrot.slane %v497_v28, 4 }
  0x18   : > { %359 = vrot.lane.b32.xlu1 %v1612_v2, %s1533_s11  ;;  %486 = vrot.lane.b32.xlu0 %v356_v0, %s1534_s12 }
  0x19   : > { %492 = vrot.lane.b32.xlu2 %v1606_v1, %s1532_s10 }
  0x20   : > { %363 = vrot.lane.b32.xlu1 %v1612_v2, %s1532_s10  ;;  %361 = vrot.lane.b32.xlu0 %v1612_v2, %s1534_s12 }
  0x21   : > { %484 = vrot.lane.b32.xlu2 %v1606_v1, %s1533_s11 }
  0x28   : > { %676 = vrot.lane.b32.xlu0 %v356_v0, %s1535_s16 }
  0x6b   : > { %v489_v3 = vpop.permute.xlu2 %488 }
  0x6c   : > { %v546_v6 = vrot.slane %v489_v3, 4 }
  0x6e   : > { %v547_v9 = vsel %vm388_vm0, %v546_v6, %v1606_v1 }
  0x6f   : > { %v551_v11 = vperm.slane %v547_v9, %v1622_v8 }
  0x71   : > { %v595_v16 = vshrl.u32 %v551_v11, 16 }
  0x73   : > { %v1620_v7 = vpop.permute.xlu2 %492 }
  0x74   : > { %v554_v10 = vrot.slane %v1620_v7, 4 }
  0x7b   : > { %v1628_v14 = vpop.permute.xlu2 %484 }
  0x7c   : > { %v555_v15 = vsel %vm388_vm0, %v554_v10, %v1628_v14 }
  0x7d   : > { %v559_v17 = vperm.slane %v555_v15, %v1622_v8 }
  0x7f   : > { %v596_v19 = vshrl.u32 %v559_v17, 16  ;;  %v594_v20 = vpack.i.b16 %v559_v17, %v551_v11 }
  0x81   : > { %v597_v21 = vpack.i.b16 %v596_v19, %v595_v16  ;;  %v642_v26 = vperm.slane %v594_v20, %v1622_v8 }
  0x82   : > { %v491_v22 = vpop.permute.xlu1 %490  ;;  %v483_v23 = vpop.permute.xlu0 %482 }
  0x83   : > { %v528_v24 = vperm.slane %v491_v22, %v1633_v18  ;;  %v523_v25 = vperm.slane %v483_v23, %v1633_v18  ;;  %688 = vrot.lane.b32.xlu0 %v491_v22, %s1535_s16  ;;  %680 = vrot.lane.b32.xlu1 %v483_v23, %s1535_s16  ;;  %v649_v27 = vperm.slane %v597_v21, %v1622_v8  ;;  %v667_v35 = vshrl.u32 %v642_v26, 16 }
  0x84   : > { %v643_v38 = vrot.slane %v642_v26, 4 }
  0x85   : > { %v529_v29 = vrot.slane %v528_v24, 4  ;;  %v531_v30 = vrot.slane %v523_v25, 4  ;;  %v668_v36 = vshrl.u32 %v649_v27, 16  ;;  %v666_v43 = vpack.i.b16 %v649_v27, %v642_v26 }
  0x86   : > { %v650_v44 = vrot.slane %v649_v27, 4  ;;  %v1658_v51 = vsel %vm388_vm0, 0, %v643_v38 }
  0x87   : > { %v530_v31 = vsel %vm388_vm0, %v529_v29, %v523_v25  ;;  %v532_v32 = vsel %vm388_vm0, %v528_v24, %v531_v30  ;;  %v1654_v49 = vpack.i.b16 %v668_v36, %v667_v35  ;;  %v1664_v58 = vunpack.c.l.b16 %v666_v43 }
  0x88   : > { %v1645_v33 = vperm.slane %v530_v31, %v1622_v8  ;;  %v540_v34 = vperm.slane %v532_v32, %v1622_v8  ;;  %v1667_v59 = vsel %vm388_vm0, 0, %v650_v44  ;;  %v673_v38 = vshrl.u32 %v1658_v51, 16 }
  0x89   : > { %v900_v63 = vunpack.c.l.b16 %v1654_v49 }
  0x8a   : > { %v541_v39 = vrot.slane %v1645_v33, 4  ;;  %v360_v41 = vpop.permute.xlu1 %359  ;;  %v487_v42 = vpop.permute.xlu0 %486  ;;  %v543_v45 = vrot.slane %v540_v34, 4  ;;  %v565_v60 = vshrl.u32 %v1645_v33, 16  ;;  %v581_v61 = vshrl.u32 %v540_v34, 16 }
  0x8b   : > { %v367_v46 = vpack.i.b16 %v360_v41, %v1612_v2  ;;  %v369_v47 = vshrl.u32 %v360_v41, 16  ;;  %v502_v48 = vperm.slane %v487_v42, %v1633_v18  ;;  %686 = vrot.lane.b32.xlu1 %v489_v3, %s1535_s16  ;;  %684 = vrot.lane.b32.xlu2 %v487_v42, %s1535_s16 }
  0x8c   : > { %v542_v50 = vsel %vm388_vm0, 0, %v541_v39  ;;  %v544_v56 = vsel %vm388_vm0, 0, %v543_v45 }
  0x8d   : > { %v370_v52 = vpack.i.b16 %v369_v47, %v368_v40  ;;  %v381_v53 = vperm.slane %v367_v46, %v1633_v18  ;;  %v503_v54 = vrot.slane %v502_v48, 4  ;;  %v506_v55 = vsel %vm388_vm0, %v502_v48, %v505_v37 }
  0x8e   : > { %v514_v57 = vperm.slane %v506_v55, %v1622_v8  ;;  %v573_v0 = vshrl.u32 %v542_v50, 16  ;;  %v589_v9 = vshrl.u32 %v544_v56, 16 }
  0x8f   : > { %v504_v62 = vsel %vm388_vm0, %v503_v54, %v497_v28  ;;  %v390_v5 = vrot.slane %v381_v53, 4  ;;  %v408_v6 = vperm.slane %v370_v52, %v1633_v18 }
  0x90   : > { %v510_v2 = vperm.slane %v504_v62, %v1622_v8  ;;  %v517_v3 = vrot.slane %v514_v57, 4  ;;  %v578_v4 = vpack.i.b16 %v540_v34, %v514_v57  ;;  %v580_v10 = vshrl.u32 %v514_v57, 16 }
  0x91   : > { %v416_v43 = vrot.slane %v408_v6, 4  ;;  %v674_v57 = vshrl.u32 %v1667_v59, 16 }
  0x92   : > { %v364_v11 = vpop.permute.xlu1 %363  ;;  %v362_v12 = vpop.permute.xlu0 %361  ;;  %v515_v13 = vrot.slane %v510_v2, 4  ;;  %v518_v15 = vsel %vm388_vm0, 0, %v517_v3  ;;  %v562_v16 = vpack.i.b16 %v1645_v33, %v510_v2  ;;  %v564_v17 = vshrl.u32 %v510_v2, 16 }
  0x93   : > { %v582_v19 = vpack.i.b16 %v581_v61, %v580_v10  ;;  %v586_v20 = vpack.i.b16 %v544_v56, %v518_v15  ;;  %v588_v21 = vshrl.u32 %v518_v15, 16  ;;  %v598_v22 = vrot.slane %v578_v4, 4 }
  0x94   : > { %v516_v23 = vsel %vm388_vm0, 0, %v515_v13  ;;  %v566_v24 = vpack.i.b16 %v565_v60, %v564_v17  ;;  %v375_v25 = vshrl.u32 %v364_v11, 16  ;;  %v373_v26 = vpack.i.b16 %v364_v11, %v362_v12 }
  0x95   : > { %v570_v27 = vpack.i.b16 %v542_v50, %v516_v23  ;;  %v572_v28 = vshrl.u32 %v516_v23, 16  ;;  %v590_v29 = vpack.i.b16 %v589_v9, %v588_v21  ;;  %v604_v30 = vrot.slane %v586_v20, 4 }
  0x96   : > { %v618_v31 = vrot.slane %v582_v19, 4  ;;  %v374_v32 = vshrl.u32 %v362_v12, 16  ;;  %v386_v34 = vperm.slane %v373_v26, %v1633_v18  ;;  %v599_v33 = vsel %vm388_vm0, %v598_v22, %v562_v16 }
  0x97   : > { %v574_v35 = vpack.i.b16 %v573_v0, %v572_v28  ;;  %v624_v36 = vrot.slane %v590_v29, 4  ;;  %v605_v37 = vsel %vm388_vm0, %v604_v30, %v570_v27  ;;  %v603_v45 = vperm.slane %v599_v33, %v1633_v18 }
  0x98   : > { %v376_v39 = vpack.i.b16 %v375_v25, %v374_v32  ;;  %v387_v40 = vrot.slane %v386_v34, 4  ;;  %v391_v41 = vsel %vm388_vm0, %v386_v34, %v390_v5  ;;  %v609_v42 = vperm.slane %v605_v37, %v1633_v18 }
  0x99   : > { %v399_v44 = vperm.slane %v391_v41, %v1622_v8  ;;  %v625_v46 = vsel %vm388_vm0, %v624_v36, %v574_v35  ;;  %v619_v52 = vsel %vm388_vm0, %v618_v31, %v566_v24 }
  0x9a   : > { %v389_v47 = vsel %vm388_vm0, %v387_v40, %v381_v53  ;;  %v413_v48 = vperm.slane %v376_v39, %v1633_v18  ;;  %v610_v50 = vrot.slane %v609_v42, 4  ;;  %v629_v56 = vperm.slane %v625_v46, %v1633_v18 }
  0x9b   : > { %v395_v54 = vperm.slane %v389_v47, %v1622_v8  ;;  %v402_v55 = vrot.slane %v399_v44, 4  ;;  %v672_v53 = vpack.i.b16 %v1667_v59, %v1658_v51  ;;  %v623_v4 = vperm.slane %v619_v52, %v1633_v18 }
  0x9c   : > { %v414_v60 = vrot.slane %v413_v48, 4  ;;  %v417_v61 = vsel %vm388_vm0, %v413_v48, %v416_v43  ;;  %v611_v62 = vsel %vm388_vm0, %v610_v50, %v603_v45  ;;  %v630_v11 = vrot.slane %v629_v56, 4 }
  0x9d   : > { %v400_v0 = vrot.slane %v395_v54, 4  ;;  %v403_v2 = vsel %vm388_vm0, 0, %v402_v55  ;;  %v425_v3 = vperm.slane %v417_v61, %v1622_v8  ;;  %v615_v10 = vperm.slane %v611_v62, %v1622_v8 }
  0x9e   : > { %v415_v5 = vsel %vm388_vm0, %v414_v60, %v408_v6  ;;  %v435_v9 = vrot.slane %v403_v2, 4  ;;  %v675_v51 = vpack.i.b16 %v674_v57, %v673_v38  ;;  %v430_v59 = vsel %vm388_vm0, %v402_v55, %v395_v54 }
  0x9f   : > { %v401_v12 = vsel %vm388_vm0, 0, %v400_v0  ;;  %v421_v13 = vperm.slane %v415_v5, %v1622_v8  ;;  %v428_v15 = vrot.slane %v425_v3, 4  ;;  %v631_v16 = vsel %vm388_vm0, %v630_v11, %v623_v4 }
  0xa0   : > { %v616_v17 = vrot.slane %v615_v10, 4  ;;  %v436_v19 = vsel %vm388_vm0, %v435_v9, %v401_v12  ;;  %v635_v21 = vperm.slane %v631_v16, %v1622_v8  ;;  %v655_v24 = vshrl.u32 %v615_v10, 16 }
  0xa1   : > { %v426_v20 = vrot.slane %v421_v13, 4  ;;  %v429_v6 = vsel %vm388_vm0, 0, %v428_v15  ;;  %v440_v22 = vperm.slane %v436_v19, %v1633_v18  ;;  %v449_v26 = vsel %vm388_vm0, %v428_v15, %v421_v13 }
  0xa2   : > { %v454_v23 = vrot.slane %v429_v6, 4  ;;  %v617_v25 = vsel %vm388_vm0, 0, %v616_v17  ;;  %v654_v28 = vpack.i.b16 %v635_v21, %v615_v10  ;;  %v656_v29 = vshrl.u32 %v635_v21, 16 }
  0xa3   : > { %v427_v27 = vsel %vm388_vm0, 0, %v426_v20  ;;  %v636_v30 = vrot.slane %v635_v21, 4  ;;  %v661_v31 = vshrl.u32 %v617_v25, 16  ;;  %v434_v32 = vperm.slane %v430_v59, %v1633_v18 }
  0xa4   : > { %v441_v34 = vrot.slane %v440_v22, 4  ;;  %v455_v33 = vsel %vm388_vm0, %v454_v23, %v427_v27  ;;  %v876_v35 = vunpack.c.l.b16 %v654_v28  ;;  %v657_v36 = vpack.i.b16 %v656_v29, %v655_v24 }
  0xa5   : > { %v637_v37 = vsel %vm388_vm0, 0, %v636_v30  ;;  %v459_v38 = vperm.slane %v455_v33, %v1633_v18  ;;  %v453_v42 = vperm.slane %v449_v26, %v1633_v18  ;;  %v922_v48 = vunpack.c.l.b16 %v672_v53  ;;  %v677_v30 = vpop.permute.xlu0 %676 }
  0xa6   : > { %v660_v39 = vpack.i.b16 %v637_v37, %v617_v25  ;;  %v662_v40 = vshrl.u32 %v637_v37, 16  ;;  %v442_v41 = vsel %vm388_vm0, %v441_v34, %v434_v32  ;;  %v878_v43 = vpack.c.b16 %v1664_v58, %v876_v35 }
  0xa7   : > { %v899_v44 = vunpack.c.l.b16 %v657_v36  ;;  %v446_v45 = vperm.slane %v442_v41, %v1622_v8  ;;  %v460_v46 = vrot.slane %v459_v38, 4  ;;  %v944_v60 = vunpack.c.l.b16 %v675_v51 }
  0xa8   : > { %v921_v47 = vunpack.c.l.b16 %v660_v39  ;;  %v663_v50 = vpack.i.b16 %v662_v40, %v661_v31  ;;  %v884_v52 = vsel %vm879_vm1, %v878_v43, 0  ;;  %v696_v34 = vperm.slane %v677_v30, %v1633_v18 }
  0xa9   : > { %v901_v54 = vpack.c.b16 %v900_v63, %v899_v44  ;;  %v461_v55 = vsel %vm388_vm0, %v460_v46, %v453_v42  ;;  %893 = vmatpush.bf16.xpose.msra.mxu0 %v884_v52  ;;  %v447_v62 = vrot.slane %v446_v45, 4  ;;  %v471_v4 = vshrl.u32 %v446_v45, 16 }
  0xaa   : > { %v923_v56 = vpack.c.b16 %v922_v48, %v921_v47  ;;  %v943_v57 = vunpack.c.l.b16 %v663_v50  ;;  %v465_v58 = vperm.slane %v461_v55, %v1622_v8  ;;  %v704_v38 = vrot.slane %v696_v34, 4 }
  0xab   : > { %v906_v61 = vsel %vm879_vm1, %v901_v54, 0  ;;  %v448_v5 = vsel %vm388_vm0, 0, %v447_v62 }
  0xac   : > { %915 = vmatpush.bf16.xpose.msra.mxu1 %v906_v61  ;;  %v928_v53 = vsel %vm879_vm1, %v923_v56, 0  ;;  %v945_v0 = vpack.c.b16 %v944_v60, %v943_v57  ;;  %v472_v2 = vshrl.u32 %v465_v58, 16  ;;  %v466_v3 = vrot.slane %v465_v58, 4 }
  0xad   : > { %937 = vmatpush.bf16.xpose.msra.mxu2 %v928_v53  ;;  %v470_v63 = vpack.i.b16 %v465_v58, %v446_v45  ;;  %v477_v13 = vshrl.u32 %v448_v5, 16 }
  0xae   : > { %v950_v49 = vsel %vm879_vm1, %v945_v0, 0  ;;  %v467_v9 = vsel %vm388_vm0, 0, %v466_v3  ;;  %v473_v11 = vpack.i.b16 %v472_v2, %v471_v4 }
  0xaf   : > { %959 = vmatpush.bf16.xpose.msra.mxu3 %v950_v49  ;;  %v478_v10 = vshrl.u32 %v467_v9, 16  ;;  %v476_v12 = vpack.i.b16 %v467_v9, %v448_v5 }
  0xb0   : > { %1429 = vmatmul.msk.bf16.vlgmr.msra.gmra.mxu0 %vm879_vm1, %v470_v63 }
  0xb1   : > { %v479_v15 = vpack.i.b16 %v478_v10, %v477_v13 }
  0xb3   : > { %1430 = vmatmul.msk.bf16.vlgmr.msra.gmra.mxu1 %vm879_vm1, %v473_v11 }
  0xb4   : > { %1431 = vmatmul.msk.bf16.vlgmr.msra.gmra.mxu2 %vm879_vm1, %v476_v12 }
  0xb6   : > { %1432 = vmatmul.msk.bf16.vlgmr.msra.gmra.mxu3 %vm879_vm1, %v479_v15 }
  0xe5   : > { %v685_v35 = vpop.permute.xlu2 %684 }
  0xf5   : > { %v681_v31 = vpop.permute.xlu1 %680  ;;  %v689_v33 = vpop.permute.xlu0 %688 }
  0xf6   : > { %v722_v32 = vperm.slane %v681_v31, %v1633_v18  ;;  %v727_v37 = vperm.slane %v689_v33, %v1633_v18 }
  0xf8   : > { %v730_v36 = vrot.slane %v722_v32, 4 }
  0xfa   : > { %v731_v39 = vsel %vm388_vm0, %v727_v37, %v730_v36 }
  0xfd   : > { %v1763_v55 = vpop.permute.xlu1 %686 }
 0x12d   : > { %v895_v51 = vpop.f32.mrf.mxu0 }
 0x12e   : > { %v965_v59 = vmul.f32 0.35355338, %v895_v51 }
 0x130   : > { %v917_v16 = vpop.f32.mrf.mxu1  ;;  %v970_v17 = vsel %vm969_vm2, %v965_v59, -inf }
 0x131   : > { %971 = vmax.xlane.f32.xlu2 %v970_v17  ;;  %v1735_v19 = vmul.f32 0.35355338, %v917_v16 }
 0x133   : > { %v973_v24 = vsel %vm969_vm2, %v1735_v19, -inf }
 0x135   : > { %v897_v20 = vpop.f32.mrf.mxu0 }
 0x137   : > { %v939_v6 = vpop.f32.mrf.mxu2 }
 0x138   : > { %v967_v21 = vmul.f32 0.35355338, %v939_v6  ;;  %v919_v22 = vpop.f32.mrf.mxu1 }
 0x139   : > { %v961_v23 = vpop.f32.mrf.mxu3  ;;  %974 = vmax.xlane.f32.xlu2 %v973_v24 }
 0x13a   : > { %v1739_v25 = vmul.f32 0.35355338, %v961_v23  ;;  %v976_v26 = vsel %vm969_vm2, %v967_v21, -inf }
 0x13b   : > { %977 = vmax.xlane.f32.xlu0 %v976_v26 }
 0x13c   : > { %v979_v27 = vsel %vm969_vm2, %v1739_v25, -inf }
 0x13d   : > { %980 = vmax.xlane.f32.xlu1 %v979_v27 }
 0x13f   : > { %v941_v28 = vpop.f32.mrf.mxu2 }
 0x141   : > { %v963_v29 = vpop.f32.mrf.mxu3 }
 0x14f   : > { %690 = vrot.lane.b32.xlu0 %v1620_v7, %s1535_s16  ;;  %v701_v7 = vperm.slane %v685_v35, %v1633_v18 }
 0x151   : > { %678 = vrot.lane.b32.xlu2 %v1606_v1, %s1535_s16  ;;  %v728_v1 = vrot.slane %v727_v37, 4  ;;  %v705_v40 = vsel %vm388_vm0, %v701_v7, %v704_v38  ;;  %v702_v41 = vrot.slane %v701_v7, 4 }
 0x152   : > { %v713_v42 = vperm.slane %v705_v40, %v1622_v8 }
 0x153   : > { %v729_v43 = vsel %vm388_vm0, %v728_v1, %v722_v32  ;;  %v703_v45 = vsel %vm388_vm0, %v702_v41, %v696_v34 }
 0x154   : > { %v735_v46 = vperm.slane %v729_v43, %v1622_v8  ;;  %v716_v48 = vrot.slane %v713_v42, 4  ;;  %v709_v52 = vperm.slane %v703_v45, %v1622_v8 }
 0x156   : > { %682 = vrot.lane.b32.xlu1 %v1628_v14, %s1535_s16  ;;  %v739_v14 = vperm.slane %v731_v39, %v1622_v8  ;;  %v740_v57 = vrot.slane %v735_v46, 4  ;;  %v717_v60 = vsel %vm388_vm0, 0, %v716_v48  ;;  %v714_v61 = vrot.slane %v709_v52, 4  ;;  %s352_s16 = scalar_lea.vmem %s1907_s7, %s1600_s28 }
 0x157   : > { %v788_v62 = vshrl.u32 %v717_v60, 16  ;;  %v764_v29 = vshrl.u32 %v709_v52, 16  ;;  %v762_v37 = vpack.i.b16 %v735_v46, %v709_v52 }
 0x158   : > { %v742_v44 = vrot.slane %v739_v14, 4  ;;  %v741_v53 = vsel %vm388_vm0, 0, %v740_v57  ;;  %v715_v4 = vsel %vm388_vm0, 0, %v714_v61  ;;  %v781_v9 = vshrl.u32 %v739_v14, 16 }
 0x159   : > { %v773_v5 = vshrl.u32 %v741_v53, 16  ;;  %v772_v16 = vshrl.u32 %v715_v4, 16  ;;  %v770_v24 = vpack.i.b16 %v741_v53, %v715_v4  ;;  %v778_v26 = vpack.i.b16 %v739_v14, %v713_v42 }
 0x15a   : > { %v743_v54 = vsel %vm388_vm0, 0, %v742_v44 }
 0x15b   : > { %v789_v58 = vshrl.u32 %v743_v54, 16  ;;  %v786_v10 = vpack.i.b16 %v743_v54, %v717_v60  ;;  %v798_v31 = vrot.slane %v778_v26, 4 }
 0x15d   : > { %v790_v3 = vpack.i.b16 %v789_v58, %v788_v62  ;;  %v804_v6 = vrot.slane %v786_v10, 4  ;;  %v799_v39 = vsel %vm388_vm0, %v798_v31, %v762_v37 }
 0x15f   : > { %v824_v17 = vrot.slane %v790_v3, 4 }
 0x1a4   : > { %v972_v47 = vpop.xlane.xlu2 %971 }
 0x1a5   : > { %v982_v50 = vsub.f32 %v965_v59, %v972_v47  ;;  %v780_v59 = vshrl.u32 %v713_v42, 16  ;;  %v803_v42 = vperm.slane %v799_v39, %v1633_v18 }
 0x1a7   : > { %v986_v56 = vmul.f32 1.442695, %v982_v50  ;;  %v782_v22 = vpack.i.b16 %v781_v9, %v780_v59 }
 0x1a9   : > { %1488 = vpow2.f32 %v986_v56  ;;  %v818_v30 = vrot.slane %v782_v22, 4 }
 0x1ac   : > { %v975_v0 = vpop.xlane.xlu2 %974 }
 0x1ad   : > { %v983_v12 = vsub.f32 %v1735_v19, %v975_v0  ;;  %v765_v19 = vshrl.u32 %v735_v46, 16  ;;  %v746_v46 = vrot.slane %v1763_v55, 4 }
 0x1ae   : > { %v978_v2 = vpop.xlane.xlu0 %977 }
 0x1af   : > { %v984_v49 = vsub.f32 %v967_v21, %v978_v2  ;;  %v1767_v63 = vpop.eup %1488  ;;  %v774_v21 = vpack.i.b16 %v773_v5, %v772_v16  ;;  %v988_v23 = vmul.f32 1.442695, %v983_v12  ;;  %v766_v35 = vpack.i.b16 %v765_v19, %v764_v29 }
 0x1b0   : > { %v981_v11 = vpop.xlane.xlu1 %980  ;;  %v994_v51 = vsel %vm969_vm2, %v1767_v63, 0.0 }
 0x1b1   : > { %v990_v13 = vmul.f32 1.442695, %v984_v49  ;;  %v985_v15 = vsub.f32 %v1739_v25, %v981_v11  ;;  %995 = vadd.xlane.f32.xlu1 %v994_v51  ;;  %v825_v27 = vsel %vm388_vm0, %v824_v17, %v774_v21  ;;  %v805_v25 = vsel %vm388_vm0, %v804_v6, %v770_v24 }
 0x1b2   : > { %v829_v34 = vperm.slane %v825_v27, %v1633_v18  ;;  %v809_v36 = vperm.slane %v805_v25, %v1633_v18  ;;  %v819_v7 = vsel %vm388_vm0, %v818_v30, %v766_v35 }
 0x1b3   : > { %1490 = vpow2.f32 %v990_v13  ;;  %v992_v20 = vmul.f32 1.442695, %v985_v15  ;;  %v823_v41 = vperm.slane %v819_v7, %v1633_v18 }
 0x1b4   : > { %v830_v1 = vrot.slane %v829_v34, 4  ;;  %v810_v14 = vrot.slane %v809_v36, 4  ;;  %v679_v43 = vpop.permute.xlu2 %678 }
 0x1b5   : > { %1492 = vpow2.f32 %v992_v20  ;;  %v747_v50 = vsel %vm388_vm0, %v746_v46, %v679_v43 }
 0x1b6   : > { %1494 = vpow2.f32 %v988_v23  ;;  %v831_v45 = vsel %vm388_vm0, %v830_v1, %v823_v41  ;;  %v811_v47 = vsel %vm388_vm0, %v810_v14, %v803_v42  ;;  %v751_v57 = vperm.slane %v747_v50, %v1622_v8 }
 0x1b7   : > { %v835_v52 = vperm.slane %v831_v45, %v1622_v8  ;;  %v815_v54 = vperm.slane %v811_v47, %v1622_v8 }
 0x1b8   : > { %v795_v53 = vshrl.u32 %v751_v57, 16 }
 0x1b9   : > { %v1776_v28 = vpop.eup %1490  ;;  %v836_v61 = vrot.slane %v835_v52, 4  ;;  %v816_v55 = vrot.slane %v815_v54, 4  ;;  %v856_v3 = vshrl.u32 %v835_v52, 16  ;;  %v854_v10 = vpack.i.b16 %v835_v52, %v815_v54 }
 0x1ba   : > { %v1000_v32 = vsel %vm969_vm2, %v1776_v28, 0.0  ;;  %v855_v11 = vshrl.u32 %v815_v54, 16 }
 0x1bb   : > { %v1781_v33 = vpop.eup %1492  ;;  %1001 = vadd.xlane.f32.xlu0 %v1000_v32  ;;  %v837_v49 = vsel %vm388_vm0, 0, %v836_v61  ;;  %v817_v9 = vsel %vm388_vm0, 0, %v816_v55  ;;  %v1018_v22 = vunpack.c.l.b16 %v854_v10 }
 0x1bc   : > { %v1003_v38 = vsel %vm969_vm2, %v1781_v33, 0.0  ;;  %v1788_v40 = vpop.eup %1494  ;;  %v862_v15 = vshrl.u32 %v837_v49, 16  ;;  %v857_v51 = vpack.i.b16 %v856_v3, %v855_v11  ;;  %v861_v16 = vshrl.u32 %v817_v9, 16 }
 0x1bd   : > { %1004 = vadd.xlane.f32.xlu2 %v1003_v38  ;;  %v997_v44 = vsel %vm969_vm2, %v1788_v40, 0.0  ;;  %v860_v23 = vpack.i.b16 %v837_v49, %v817_v9 }
 0x1be   : > { %v863_v27 = vpack.i.b16 %v862_v15, %v861_v16  ;;  %v1041_v32 = vunpack.c.l.b16 %v857_v51 }
 0x1bf   : > { %v1063_v35 = vunpack.c.l.b16 %v860_v23 }
 0x1c0   : > { %v1085_v1 = vunpack.c.l.b16 %v863_v27 }
 0x1c1   : > { %v691_v48 = vpop.permute.xlu0 %690 }
 0x1c2   : > { %v754_v56 = vrot.slane %v691_v48, 4 }
 0x1c3   : > { %998 = vadd.xlane.f32.xlu0 %v997_v44 }
 0x1c8   : > { %v683_v60 = vpop.permute.xlu1 %682 }
 0x1c9   : > { %v755_v58 = vsel %vm388_vm0, %v754_v56, %v683_v60 }
 0x1ca   : > { %v759_v62 = vperm.slane %v755_v58, %v1622_v8 }
 0x1cc   : > { %v794_v0 = vpack.i.b16 %v759_v62, %v751_v57  ;;  %v796_v2 = vshrl.u32 %v759_v62, 16 }
 0x1ce   : > { %v797_v4 = vpack.i.b16 %v796_v2, %v795_v53  ;;  %v842_v5 = vperm.slane %v794_v0, %v1622_v8 }
 0x1d0   : > { %v849_v12 = vperm.slane %v797_v4, %v1622_v8  ;;  %v843_v13 = vrot.slane %v842_v5, 4  ;;  %v867_v59 = vshrl.u32 %v842_v5, 16 }
 0x1d2   : > { %v866_v17 = vpack.i.b16 %v849_v12, %v842_v5  ;;  %v868_v20 = vshrl.u32 %v849_v12, 16  ;;  %v844_v6 = vsel %vm388_vm0, 0, %v843_v13  ;;  %v850_v21 = vrot.slane %v849_v12, 4 }
 0x1d3   : > { %v873_v29 = vshrl.u32 %v844_v6, 16 }
 0x1d4   : > { %v1019_v24 = vunpack.c.l.b16 %v866_v17  ;;  %v869_v26 = vpack.i.b16 %v868_v20, %v867_v59  ;;  %v851_v19 = vsel %vm388_vm0, 0, %v850_v21 }
 0x1d5   : > { %v872_v25 = vpack.i.b16 %v851_v19, %v844_v6  ;;  %v874_v30 = vshrl.u32 %v851_v19, 16 }
 0x1d6   : > { %v1020_v31 = vpack.c.b16 %v1019_v24, %v1018_v22  ;;  %v1042_v34 = vunpack.c.l.b16 %v869_v26 }
 0x1d7   : > { %v1064_v36 = vunpack.c.l.b16 %v872_v25  ;;  %v875_v37 = vpack.i.b16 %v874_v30, %v873_v29 }
 0x1d8   : > { %v1026_v38 = vsel %vm1024_vm3, %v1020_v31, 0  ;;  %v1043_v7 = vpack.c.b16 %v1042_v34, %v1041_v32 }
 0x1d9   : > { %1035 = vmatpush.bf16.msrb.mxu0 %v1026_v38  ;;  %v1065_v39 = vpack.c.b16 %v1064_v36, %v1063_v35  ;;  %v1086_v14 = vunpack.c.l.b16 %v875_v37 }
 0x1da   : > { %v1048_v41 = vsel %vm1024_vm3, %v1043_v7, 0 }
 0x1db   : > { %1057 = vmatpush.bf16.msrb.mxu1 %v1048_v41  ;;  %v1070_v42 = vsel %vm1024_vm3, %v1065_v39, 0  ;;  %v1087_v43 = vpack.c.b16 %v1086_v14, %v1085_v1 }
 0x1dc   : > { %1079 = vmatpush.bf16.msrb.mxu2 %v1070_v42 }
 0x1dd   : > { %v1092_v44 = vsel %vm1024_vm3, %v1087_v43, 0 }
 0x1de   : > { %1101 = vmatpush.bf16.msrb.mxu3 %v1092_v44 }
 0x224   : > { %v996_v45 = vpop.xlane.xlu1 %995 }
 0x225   : > { %1496 = vrcp.f32 %v996_v45 }
 0x22b   : > { %v1497_v46 = vpop.eup %1496 }
 0x22c   : > { %v1010_v47 = vmul.f32 %v1497_v46, %v1767_v63 }
 0x22e   : > { %v1002_v48 = vpop.xlane.xlu0 %1001  ;;  %v1014_v50 = vpack.c.bf16 %v1010_v47, %v1010_v47 }
 0x22f   : > { %1498 = vrcp.f32 %v1002_v48 }
 0x230   : > { %v1005_v52 = vpop.xlane.xlu2 %1004  ;;  %1433 = vmatmul.msk.bf16.vlgmr.msrb.gmra.mxu0 %vm969_vm2, %v1014_v50 }
 0x231   : > { %1500 = vrcp.f32 %v1005_v52 }
 0x235   : > { %v1499_v54 = vpop.eup %1498 }
 0x236   : > { %v1012_v56 = vmul.f32 %v1499_v54, %v1776_v28  ;;  %v999_v57 = vpop.xlane.xlu0 %998 }
 0x237   : > { %v1501_v60 = vpop.eup %1500  ;;  %1502 = vrcp.f32 %v999_v57 }
 0x238   : > { %v1013_v58 = vmul.f32 %v1501_v60, %v1781_v33  ;;  %v1016_v61 = vpack.c.bf16 %v1012_v56, %v1012_v56 }
 0x23a   : > { %1435 = vmatmul.msk.bf16.vlgmr.msrb.gmra.mxu2 %vm969_vm2, %v1016_v61  ;;  %v1017_v62 = vpack.c.bf16 %v1013_v58, %v1013_v58 }
 0x23c   : > { %1436 = vmatmul.msk.bf16.vlgmr.msrb.gmra.mxu3 %vm969_vm2, %v1017_v62 }
 0x23d   : > { %v1503_v63 = vpop.eup %1502 }
 0x23e   : > { %v1011_v55 = vmul.f32 %v1503_v63, %v1788_v40 }
 0x240   : > { %v1015_v53 = vpack.c.bf16 %v1011_v55, %v1011_v55 }
 0x242   : > { %1434 = vmatmul.msk.bf16.vlgmr.msrb.gmra.mxu1 %vm969_vm2, %v1015_v53 }
 0x2ad   : > { %v1037_v0 = vpop.f32.mrf.mxu0 }
 0x2ae   : > { %v1110_v28 = vrot.slane %v1037_v0, 4 }
 0x2b5   : > { %v1039_v2 = vpop.f32.mrf.mxu0 }
 0x2bd   : > { %v1081_v3 = vpop.f32.mrf.mxu2 }
 0x2be   : > { %v1107_v49 = vrot.slane %v1081_v3, 4  ;;  %v1111_v4 = vsel %vm388_vm0, %v1081_v3, %v1110_v28 }
 0x2bf   : > { %v1119_v33 = vperm.slane %v1111_v4, %v1633_v18  ;;  %v1059_v5 = vpop.f32.mrf.mxu1  ;;  %v1103_v9 = vpop.f32.mrf.mxu3 }
 0x2c0   : > { %v1109_v10 = vsel %vm388_vm0, %v1107_v49, %v1037_v0  ;;  %v1122_v11 = vrot.slane %v1059_v5, 4  ;;  %v1120_v12 = vrot.slane %v1103_v9, 4 }
 0x2c1   : > { %v1115_v40 = vperm.slane %v1109_v10, %v1633_v18  ;;  %v1146_v59 = vrot.slane %v1119_v33, 4 }
 0x2c2   : > { %v1121_v13 = vsel %vm388_vm0, %v1120_v12, %v1059_v5  ;;  %v1123_v15 = vsel %vm388_vm0, %v1103_v9, %v1122_v11  ;;  %v1449_v9 = vld [vmem:[%s1903_s3] sm:$0xff] }
 0x2c3   : > { %v1134_v51 = vrot.slane %v1115_v40, 4  ;;  %v1127_v16 = vperm.slane %v1121_v13, %v1633_v18  ;;  %v1131_v17 = vperm.slane %v1123_v15, %v1633_v18  ;;  %v1259_v10 = vsel %vm1254_vm4, %v1449_v9, 0 }
 0x2c5   : > { %v1132_v20 = vrot.slane %v1127_v16, 4  ;;  %v1135_v6 = vsel %vm388_vm0, %v1127_v16, %v1134_v51  ;;  %v1144_v21 = vrot.slane %v1131_v17, 4  ;;  %v1147_v22 = vsel %vm388_vm0, %v1131_v17, %v1146_v59  ;;  %v1083_v23 = vpop.f32.mrf.mxu2  ;;  %v1485_v16 = vld [vmem:[%s1904_s4] ss:$0 sm:$0xff] }
 0x2c6   : > { %v1143_v24 = vperm.slane %v1135_v6, %v1622_v8  ;;  %v1155_v26 = vperm.slane %v1147_v22, %v1622_v8 }
 0x2c7   : > { %v1133_v19 = vsel %vm388_vm0, %v1132_v20, %v1115_v40  ;;  %v1145_v27 = vsel %vm388_vm0, %v1144_v21, %v1119_v33  ;;  %v1061_v25 = vpop.f32.mrf.mxu1  ;;  %v1105_v29 = vpop.f32.mrf.mxu3  ;;  %v354_v20 = vld [vmem:[%s333_s9] sm:$0xff] }
 0x2c8   : > { %v1139_v30 = vperm.slane %v1133_v19, %v1622_v8  ;;  %v1151_v31 = vperm.slane %v1145_v27, %v1622_v8  ;;  %v1158_v32 = vrot.slane %v1143_v24, 4  ;;  %v1162_v34 = vrot.slane %v1155_v26, 4 }
 0x2c9   : > { %v1541_v24 = vmov 32.0  }
 0x2ca   : > { %v1156_v35 = vrot.slane %v1139_v30, 4  ;;  %v1159_v36 = vsel %vm388_vm0, 0.0, %v1158_v32  ;;  %v1160_v37 = vrot.slane %v1151_v31, 4  ;;  %v1163_v38 = vsel %vm388_vm0, 0.0, %v1162_v34 }
 0x2cb   : > { %v1169_v7 = vrot.slane %v1159_v36, 4  ;;  %v1175_v39 = vsel %vm388_vm0, %v1162_v34, %v1151_v31  ;;  %v1180_v1 = vrot.slane %v1163_v38, 4  ;;  %v1164_v14 = vsel %vm388_vm0, %v1158_v32, %v1139_v30 }
 0x2cc   : > { %v1161_v41 = vsel %vm388_vm0, 0.0, %v1160_v37  ;;  %v1157_v42 = vsel %vm388_vm0, 0.0, %v1156_v35  ;;  %v1168_v43 = vperm.slane %v1164_v14, %v1633_v18  ;;  %v1179_v44 = vperm.slane %v1175_v39, %v1633_v18 }
 0x2cd   : > { %v1170_v45 = vsel %vm388_vm0, %v1169_v7, %v1157_v42  ;;  %v1181_v46 = vsel %vm388_vm0, %v1180_v1, %v1161_v41  ;;  %1504 = vrcp.f32 %v1541_v24 }
 0x2ce   : > { %v1174_v47 = vperm.slane %v1170_v45, %v1633_v18  ;;  %v1185_v48 = vperm.slane %v1181_v46, %v1633_v18  ;;  %v1188_v50 = vrot.slane %v1168_v43, 4  ;;  %v1200_v52 = vrot.slane %v1179_v44, 4  ;;  %v1487_v46 = vld [vmem:[%s1906_s6] ss:$0 sm:$0xff] }
 0x2d0   : > { %v1189_v54 = vsel %vm388_vm0, %v1174_v47, %v1188_v50  ;;  %v1201_v56 = vsel %vm388_vm0, %v1185_v48, %v1200_v52  ;;  %v1186_v57 = vrot.slane %v1174_v47, 4  ;;  %v1198_v60 = vrot.slane %v1185_v48, 4 }
 0x2d1   : > { %v1197_v58 = vperm.slane %v1189_v54, %v1622_v8  ;;  %v1209_v61 = vperm.slane %v1201_v56, %v1622_v8 }
 0x2d2   : > { %v1187_v62 = vsel %vm388_vm0, %v1186_v57, %v1168_v43  ;;  %v1199_v63 = vsel %vm388_vm0, %v1198_v60, %v1179_v44  ;;  %v1486_v44 = vld [vmem:[%s1905_s5] ss:$0 sm:$0xff] }
 0x2d3   : > { %v1216_v55 = vrot.slane %v1197_v58, 4  ;;  %v1214_v53 = vrot.slane %v1209_v61, 4  ;;  %v1193_v18 = vperm.slane %v1187_v62, %v1622_v8  ;;  %v1205_v0 = vperm.slane %v1199_v63, %v1622_v8  ;;  %v1450_v8 = vld [vmem:[%s1903_s3 + $0x8] sm:$0xff]  ;;  %v1505_v26 = vpop.eup %1504 }
 0x2d4   : > { %v1262_v5 = vsel %vm1254_vm4, %v1450_v8, 0  ;;  %v1284_v19 = vmul.f32 32.0, %v1505_v26  ;;  %vm1288_vm7 = vweird.f32 %v1505_v26 }
 0x2d5   : > { %v1217_v2 = vsel %vm388_vm0, %v1209_v61, %v1216_v55  ;;  %v1215_v28 = vsel %vm388_vm0, %v1214_v53, %v1197_v58  ;;  %v1210_v3 = vrot.slane %v1205_v0, 4  ;;  %v1212_v49 = vrot.slane %v1193_v18, 4  ;;  %1270 = vmatpush.bf16.xpose.msra.mxu0 %v1262_v5 }
 0x2d6   : > { %1227 = vrot.lane.b32.xlu0 %v1217_v2, %s1538_s17  ;;  %1223 = vrot.lane.b32.xlu1 %v1215_v28, %s1539_s18  ;;  %v1285_v27 = vsub.f32 1.0, %v1284_v19 }
 0x2d7   : > { %v1213_v4 = vsel %vm388_vm0, %v1205_v0, %v1212_v49  ;;  %v1211_v33 = vsel %vm388_vm0, %v1210_v3, %v1193_v18 }
 0x2d8   : > { %1219 = vrot.lane.b32.xlu2 %v1213_v4, %s1540_s19  ;;  %v1286_v25 = vmul.f32 %v1505_v26, %v1285_v27 }
 0x2da   : > { %v1287_v29 = vadd.f32 %v1505_v26, %v1286_v25 }
 0x2dc   : > { %v1289_v30 = vsel %vm1288_vm7, %v1505_v26, %v1287_v29 }
 0x2dd   : > { %1271 = vmatpush.bf16.xpose.msra.mxu0 %v1259_v10 }
 0x332   : > { %v1220_v11 = vpop.permute.xlu2 %1219 }
 0x333   : > { %v1230_v12 = vsel %vm879_vm1, %v1211_v33, %v1220_v11 }
 0x348   : > { %v1228_v40 = vpop.permute.xlu0 %1227  ;;  %v1224_v13 = vpop.permute.xlu1 %1223 }
 0x349   : > { %v1232_v15 = vsel %vm1231_vm5, %v1230_v12, %v1224_v13 }
 0x34a   : > { %v1234_v51 = vsel %vm1233_vm6, %v1232_v15, %v1228_v40 }
 0x34b   : > { %v1235_v59 = vpack.c.bf16 %v1234_v51, %v1234_v51 }
 0x34d   : > { %1445 = vmatmul.msk.bf16.vlgmr.msra.gmra.mxu0 %vm1254_vm4, %v1235_v59 }
 0x3ca   : > { %v1273_v17 = vpop.f32.mrf.mxu0 }
 0x3cb   : > { %v1274_v6 = vadd.f32 %v1485_v16, %v1273_v17 }
 0x3cd   : > { %v1277_v21 = vadd.f32 %v1274_v6, %v354_v20 }
 0x3cf   : > { %v1280_v22 = vsel %vm1254_vm4, %v1277_v21, 0.0 }
 0x3d0   : > { %1281 = vadd.xlane.f32.xlu2 %v1280_v22 }
 0x3d2   : > { %v1275_v23 = vpop.f32.mrf.mxu0 }
 0x443   : > { %v1282_v31 = vpop.xlane.xlu2 %1281 }
 0x444   : > { %v1290_v32 = vmul.f32 %v1289_v30, %v1282_v31 }
 0x446   : > { %v1291_v34 = vsub.f32 %v1277_v21, %v1290_v32 }
 0x448   : > { %v1292_v35 = vmul.f32 %v1291_v34, %v1291_v34 }
 0x44a   : > { %v1293_v36 = vsel %vm1254_vm4, %v1292_v35, 0.0 }
 0x44b   : > { %1294 = vadd.xlane.f32.xlu0 %v1293_v36 }
 0x4be   : > { %v1295_v37 = vpop.xlane.xlu0 %1294 }
 0x4bf   : > { %v1296_v38 = vmul.f32 %v1295_v37, %v1289_v30 }
 0x4c1   : > { %v1297_v7 = vadd.f32 1e-05, %v1296_v38 }
 0x4c3   : > { %1506 = vrsqrt.f32 %v1297_v7  ;;  %vm1304_vm9 = vweird.f32 %v1297_v7 }
 0x4c9   : > { %v1507_v39 = vpop.eup %1506 }
 0x4ca   : > { %v1299_v1 = vmul.f32 %v1507_v39, %v1297_v7  ;;  %vm1305_vm8 = vweird.f32 %v1507_v39 }
 0x4cb   : > { %vm1306_vm10 = vmor %vm1304_vm9, %vm1305_vm8 }
 0x4cc   : > { %v1300_v14 = vmul.f32 %v1507_v39, %v1299_v1 }
 0x4ce   : > { %v1301_v41 = vmul.f32 0.5, %v1300_v14 }
 0x4d0   : > { %v1302_v42 = vsub.f32 1.5, %v1301_v41 }
 0x4d2   : > { %v1303_v43 = vmul.f32 %v1507_v39, %v1302_v42 }
 0x4d4   : > { %v1307_v45 = vsel %vm1306_vm10, %v1507_v39, %v1303_v43 }
 0x4d5   : > { %v1308_v47 = vmul.f32 %v1307_v45, %v1291_v34 }
 0x4d7   : > { %v1312_v48 = vmul.f32 %v1486_v44, %v1308_v47 }
 0x4d9   : > { %v1316_v50 = vadd.f32 %v1487_v46, %v1312_v48 }
 0x4db   : > { %1317 = vst.msk [vmem:[%s352_s16] sm:$0xff] %vm1254_vm4, %v1316_v50 }
 0x4dc PF: > { %s17_s26 = sadd.s32 1, %s1530_s26   ;;  %s1908_s24 = smov %s1526_s25 }
 0x4dd   : > { %p14_p5 = scmp.ge.s32.totalorder %s17_s26, 4   ;;  %s1909_s25 = smov %s1911_s27 }
 0x4df   :  { %16 = sbr.rel (!%p14_p5) target bundleno = 2 (0x2), region = 84 }

</bundles_post_ra>
